<compile_context>
chip_gen: v7x
topology: tpu7x:2x2x1
jax: 0.10.0
libtpu: 0.0.40
codegen_flags: <defaults>
</compile_context>

<pallas_src>
import functools
import math

import jax
import jax.numpy as jnp
from jax import lax
from jax.experimental import pallas as pl
from jax.experimental.pallas import tpu as pltpu


def _graph_conv_kernel(num_step, node_ref, src_ref, dst_ref, edge_ref,
                       w_edge_ref, gamma_ref, beta_ref, bias_ref,
                       w_top_ref, w_bot_ref, bg_ref, out_ref, ew_ref):
    x = node_ref[...]                       # (N, D) f32 original node features
    n_node, d = x.shape
    src = src_ref[...]                      # (E, 1) int32 source node id per edge
    dst = dst_ref[...]                      # (1, E) int32 destination node id per edge
    n_edge = src.shape[0]

    # ---- edge embedding: Linear(128 -> D*D, no bias) + BatchNorm1d (training) --
    # edge / w_edge arrive pre-cast to bf16; accumulate in f32 on the MXU.
    ew = jnp.dot(edge_ref[...], w_edge_ref[...],
                 preferred_element_type=jnp.float32)                  # (E, D*D) f32
    # Batch statistics (biased var, eps=1e-5) via MXU column sums, then fold the
    # whole BN into a single per-column affine ew*scale + shift (2 VPU passes).
    inv_e = 1.0 / float(n_edge)
    ones_e = jnp.ones((1, n_edge), jnp.float32)
    mu = jnp.dot(ones_e, ew, preferred_element_type=jnp.float32) * inv_e
    ex2 = jnp.dot(ones_e, ew * ew, preferred_element_type=jnp.float32) * inv_e
    var = jnp.maximum(ex2 - mu * mu, 0.0)
    scale = gamma_ref[...] * lax.rsqrt(var + 1e-5)
    shift = beta_ref[...] - mu * scale
    # Stage normalized edge weights once in a bf16 VMEM scratch; slabs are
    # re-read per step (3 vld slots/cycle cover it) instead of living in vregs.
    ew_ref[...] = (ew * scale + shift).astype(jnp.bfloat16)

    # ---- one-hot gather/scatter selectors (small-graph path), built once -------
    # TODO(synk): for production N*E, replace the one-hot matmuls with
    # scalar-prefetched indexed gather / segment-sum over an edge-tiled grid
    # (also gives a "parallel" axis for v7x's second TensorCore).
    col_n = lax.broadcasted_iota(jnp.int32, (n_edge, n_node), 1)
    sel_src = (src == col_n).astype(jnp.bfloat16)                     # (E, N)
    row_n = lax.broadcasted_iota(jnp.int32, (n_node, n_edge), 0)
    sel_dst = (dst == row_n).astype(jnp.bfloat16)                     # (N, E)
    deg = jnp.dot(sel_dst, jnp.ones((n_edge, 1), jnp.bfloat16),
                  preferred_element_type=jnp.float32)                 # exact deg
    inv_cnt = jnp.broadcast_to(1.0 / jnp.maximum(deg, 1.0), (n_node, d))

    # Hoisted broadcasts (JAX does not CSE broadcast_in_dim inside the loop).
    bias_b = jnp.broadcast_to(bias_ref[...], (n_node, d))             # (N, D)
    gbias_b = jnp.broadcast_to(bg_ref[...], (n_node, 4 * d))          # (N, 4D)
    w_top = w_top_ref[...]                                            # (D, 4D) bf16
    w_bot = w_bot_ref[...]                                            # (D, 4D) bf16

    def step(carry):
        node, hidden, acc = carry
        acc = acc + node + x

        # gather: x_i[e] = node[src[e]]  ==  (E, N) @ (N, D) on the MXU
        x_i = jnp.dot(sel_src, node.astype(jnp.bfloat16),
                      preferred_element_type=jnp.float32)             # (E, D)

        # per-edge (1, D) @ (D, D): accumulate over k on flat (E, D) slabs read
        # from the bf16 VMEM scratch (no (E, D, D) rank-3 temp, f32 accumulate).
        msg = x_i[:, 0:1] * ew_ref[:, 0:d].astype(jnp.float32)
        for k in range(1, d):
            msg = msg + x_i[:, k:k + 1] * ew_ref[:, k * d:(k + 1) * d].astype(jnp.float32)

        # scatter-mean over destination nodes: (N, E) @ (E, D), then 1/deg
        agg = jnp.dot(sel_dst, msg.astype(jnp.bfloat16),
                      preferred_element_type=jnp.float32) * inv_cnt   # (N, D)
        m = jnp.maximum(agg + bias_b, 0.0)                            # ReLU(+bias)

        # fused GRU cell, no per-step concatenate: two accumulated dots
        #   g = m @ [Wir Wiz Win 0] + h @ [Whr Whz 0 Whn] + b    -> (N, 4D)
        g = (jnp.dot(m.astype(jnp.bfloat16), w_top,
                     preferred_element_type=jnp.float32)
             + jnp.dot(hidden.astype(jnp.bfloat16), w_bot,
                       preferred_element_type=jnp.float32)
             + gbias_b)
        rz = jax.nn.sigmoid(g[:, 0:2 * d])
        r = rz[:, 0:d]
        z = rz[:, d:2 * d]
        n_gate = jnp.tanh(g[:, 2 * d:3 * d] + r * g[:, 3 * d:4 * d])
        hidden = (1.0 - z) * n_gate + z * hidden
        return hidden, hidden, acc

    carry = (x, x, jnp.zeros_like(x))        # node, hidden, acc
    if num_step <= 4:                        # small: unroll for LLO scheduling
        for _ in range(num_step):
            carry = step(carry)
    else:                                    # large: bound code size / live ranges
        carry = lax.fori_loop(0, num_step, lambda i, c: step(c), carry)
    _, _, acc = carry

    out_ref[...] = acc * (1.0 / float(num_step))


def _pack_gru_weights(w_ih, w_hh, b_ih, b_hh, d):
    """Block-structured GRU weights (D,4D)+(D,4D) and fused bias (1,4D)."""
    zeros = jnp.zeros((d, d), jnp.float32)
    w_top = jnp.concatenate(
        [w_ih[:, 0:d], w_ih[:, d:2 * d], w_ih[:, 2 * d:3 * d], zeros], axis=1)
    w_bot = jnp.concatenate(
        [w_hh[:, 0:d], w_hh[:, d:2 * d], zeros, w_hh[:, 2 * d:3 * d]], axis=1)
    b_big = jnp.concatenate(
        [b_ih[:, 0:d] + b_hh[:, 0:d],          # r: b_ir + b_hr (pre-summed)
         b_ih[:, d:2 * d] + b_hh[:, d:2 * d],  # z: b_iz + b_hz (pre-summed)
         b_ih[:, 2 * d:3 * d],                 # b_in
         b_hh[:, 2 * d:3 * d]], axis=1)        # b_hn
    return w_top, w_bot, b_big


def graph_conv_forward(node, edge_index, edge, params, num_step):
    assert num_step >= 1, "num_step must be >= 1"
    n_node, d = node.shape
    n_edge = edge.shape[0]

    # Pre-orient index rows once so the kernel never relayouts edge_index.
    src_col = edge_index[0, :].reshape(n_edge, 1).astype(jnp.int32)   # (E, 1)
    dst_row = edge_index[1:2, :].astype(jnp.int32)                    # (1, E)

    w_top, w_bot, b_big = _pack_gru_weights(params["w_ih"], params["w_hh"],
                                            params["b_ih"], params["b_hh"], d)

    # Pre-cast MXU-only operands to bf16 in the wrapper (halves DMA + VMEM).
    edge_bf = edge.astype(jnp.bfloat16)
    w_edge_bf = params["w_edge"].astype(jnp.bfloat16)
    w_top_bf = w_top.astype(jnp.bfloat16)
    w_bot_bf = w_bot.astype(jnp.bfloat16)

    flops = (2 * n_edge * 128 * d * d                 # edge embedding
             + 4 * n_edge * d * d                     # BN stat dots
             + 2 * n_node * n_edge                    # degree dot
             + num_step * (2 * n_edge * n_node * d    # gather
                           + 2 * n_edge * d * d       # per-edge transform
                           + 2 * n_node * n_edge * d  # scatter
                           + 2 * 2 * n_node * d * 4 * d  # two GRU dots
                           + 12 * n_node * d))        # gating / relu / acc
    transcendentals = d * d + num_step * 3 * n_node * d
    bytes_accessed = (4 * (2 * n_node * d + 2 * d * d + d + 4 * d)
                      + 2 * (n_edge * 128 + 128 * d * d + 2 * d * 4 * d)
                      + 4 * 2 * n_edge)

    # Whole-array VMEM residency (small-graph kernel).
    est_vmem = (2 * n_edge * 128                      # edge bf16
                + 2 * 128 * d * d                     # w_edge bf16
                + 4 * n_edge * d * d                  # ew f32 temp (embedding phase)
                + 2 * n_edge * d * d                  # bf16 ew scratch
                + 8 * n_edge * n_node                 # selectors + iota transients
                + 64 * n_node * d                     # node/hidden/acc/m/g slabs
                + 2 * 2 * d * 4 * d                   # GRU weights bf16
                + 4 * (2 * d * d + 8 * d))            # BN affine + biases
    try:
        vmem_cap = int(pltpu.get_tpu_info().vmem_capacity_bytes)
    except Exception:
        vmem_cap = 64 << 20
    vmem_limit = int(min(max(2 * est_vmem, 4 << 20), (3 * vmem_cap) // 4))

    out = pl.pallas_call(
        functools.partial(_graph_conv_kernel, num_step),
        out_shape=jax.ShapeDtypeStruct((n_node, d), jnp.float32),
        in_specs=[pl.BlockSpec(memory_space=pltpu.MemorySpace.VMEM)] * 11,
        out_specs=pl.BlockSpec(memory_space=pltpu.MemorySpace.VMEM),
        scratch_shapes=[pltpu.VMEM((n_edge, d * d), jnp.bfloat16)],
        compiler_params=pltpu.CompilerParams(vmem_limit_bytes=vmem_limit),
        cost_estimate=pl.CostEstimate(flops=int(flops),
                                      transcendentals=int(transcendentals),
                                      bytes_accessed=int(bytes_accessed)),
    )(node, src_col, dst_row, edge_bf, w_edge_bf, params["bn_gamma"],
      params["bn_beta"], params["bias"], w_top_bf, w_bot_bf, b_big)
    return out


if __name__ == "__main__":
    node_dim = 32
    num_step = 3
    num_node = 8
    num_edge = 16

    key = jax.random.PRNGKey(0)
    ks = jax.random.split(key, 10)

    node = jax.random.normal(ks[0], (num_node, node_dim), jnp.float32)
    edge = jax.random.normal(ks[1], (num_edge, 128), jnp.float32)
    src = jax.random.randint(ks[2], (num_edge,), 0, num_node, jnp.int32)
    dst = jax.random.randint(ks[3], (num_edge,), 0, num_node, jnp.int32)
    edge_index = jnp.stack([src, dst], axis=0)          # (2, E) int32

    bound = 1.0 / math.sqrt(node_dim)
    params = {
        # LinearBn(128, D*D): linear weight stored (in, out); BN affine (gamma, beta)
        "w_edge": jax.random.uniform(ks[4], (128, node_dim * node_dim),
                                     jnp.float32, -1.0 / math.sqrt(128),
                                     1.0 / math.sqrt(128)),
        "bn_gamma": jnp.ones((1, node_dim * node_dim), jnp.float32),
        "bn_beta": jnp.zeros((1, node_dim * node_dim), jnp.float32),
        # GraphConv.bias ~ U(-1/sqrt(D), 1/sqrt(D))
        "bias": jax.random.uniform(ks[5], (1, node_dim), jnp.float32, -bound, bound),
        # GRU weights, transposed from PyTorch (3D, D) -> (D, 3D), gates [r|z|n]
        "w_ih": jax.random.uniform(ks[6], (node_dim, 3 * node_dim), jnp.float32, -bound, bound),
        "w_hh": jax.random.uniform(ks[7], (node_dim, 3 * node_dim), jnp.float32, -bound, bound),
        "b_ih": jax.random.uniform(ks[8], (1, 3 * node_dim), jnp.float32, -bound, bound),
        "b_hh": jax.random.uniform(ks[9], (1, 3 * node_dim), jnp.float32, -bound, bound),
    }

    out = graph_conv_forward(node, edge_index, edge, params, num_step)
    jax.block_until_ready(out)
    assert out.shape == (num_node, node_dim) and out.dtype == jnp.float32
    print("KERNEL_OK")
</pallas_src>

<mosaic_0001>
module attributes {stable_mosaic.version = 11 : i64} {
  func.func @_graph_conv_kernel(%arg0: memref<8x32xf32, #tpu.memory_space<vmem>>, %arg1: memref<16x1xi32, #tpu.memory_space<vmem>>, %arg2: memref<1x16xi32, #tpu.memory_space<vmem>>, %arg3: memref<16x128xbf16, #tpu.memory_space<vmem>>, %arg4: memref<128x1024xbf16, #tpu.memory_space<vmem>>, %arg5: memref<1x1024xf32, #tpu.memory_space<vmem>>, %arg6: memref<1x1024xf32, #tpu.memory_space<vmem>>, %arg7: memref<1x32xf32, #tpu.memory_space<vmem>>, %arg8: memref<32x128xbf16, #tpu.memory_space<vmem>>, %arg9: memref<32x128xbf16, #tpu.memory_space<vmem>>, %arg10: memref<1x128xf32, #tpu.memory_space<vmem>>, %arg11: memref<8x32xf32, #tpu.memory_space<vmem>>, %arg12: memref<16x1024xbf16, #tpu.memory_space<vmem>>) attributes {dimension_semantics = [], scalar_prefetch = 0 : i64, scratch_operands = 1 : i64, tpu.core_type = #tpu.core_type<tc>} {
    %c0 = arith.constant 0 : index
    %c0_0 = arith.constant 0 : index
    %0 = vector.load %arg0[%c0, %c0_0] : memref<8x32xf32, #tpu.memory_space<vmem>>, vector<8x32xf32>
    %c0_1 = arith.constant 0 : index
    %c0_2 = arith.constant 0 : index
    %1 = vector.load %arg1[%c0_1, %c0_2] : memref<16x1xi32, #tpu.memory_space<vmem>>, vector<16x1xi32>
    %c0_3 = arith.constant 0 : index
    %c0_4 = arith.constant 0 : index
    %2 = vector.load %arg2[%c0_3, %c0_4] : memref<1x16xi32, #tpu.memory_space<vmem>>, vector<1x16xi32>
    %c0_5 = arith.constant 0 : index
    %c0_6 = arith.constant 0 : index
    %3 = vector.load %arg3[%c0_5, %c0_6] : memref<16x128xbf16, #tpu.memory_space<vmem>>, vector<16x128xbf16>
    %c0_7 = arith.constant 0 : index
    %c0_8 = arith.constant 0 : index
    %4 = vector.load %arg4[%c0_7, %c0_8] : memref<128x1024xbf16, #tpu.memory_space<vmem>>, vector<128x1024xbf16>
    %cst = arith.constant dense<0.000000e+00> : vector<16x1024xf32>
    %5 = tpu.matmul %3, %4, %cst {dimension_numbers = #tpu.dot_dimension_numbers<[1], [0], [0], [1], [0, 0, 1, 1], [], []>} : vector<16x128xbf16>, vector<128x1024xbf16>, vector<16x1024xf32> -> vector<16x1024xf32>
    %cst_9 = arith.constant 1.000000e+00 : f32
    %6 = vector.broadcast %cst_9 : f32 to vector<1x16xf32>
    %cst_10 = arith.constant dense<0.000000e+00> : vector<1x1024xf32>
    %7 = tpu.matmul %6, %5, %cst_10 {dimension_numbers = #tpu.dot_dimension_numbers<[1], [0], [0], [1], [0, 0, 1, 1], [], []>} : vector<1x16xf32>, vector<16x1024xf32>, vector<1x1024xf32> -> vector<1x1024xf32>
    %cst_11 = arith.constant 6.250000e-02 : f32
    %8 = vector.broadcast %cst_11 : f32 to vector<1x1024xf32>
    %9 = arith.mulf %7, %8 : vector<1x1024xf32>
    %10 = arith.mulf %5, %5 : vector<16x1024xf32>
    %cst_12 = arith.constant dense<0.000000e+00> : vector<1x1024xf32>
    %11 = tpu.matmul %6, %10, %cst_12 {dimension_numbers = #tpu.dot_dimension_numbers<[1], [0], [0], [1], [0, 0, 1, 1], [], []>} : vector<1x16xf32>, vector<16x1024xf32>, vector<1x1024xf32> -> vector<1x1024xf32>
    %cst_13 = arith.constant 6.250000e-02 : f32
    %12 = vector.broadcast %cst_13 : f32 to vector<1x1024xf32>
    %13 = arith.mulf %11, %12 : vector<1x1024xf32>
    %14 = arith.mulf %9, %9 : vector<1x1024xf32>
    %15 = arith.subf %13, %14 : vector<1x1024xf32>
    %cst_14 = arith.constant 0.000000e+00 : f32
    %16 = vector.broadcast %cst_14 : f32 to vector<1x1024xf32>
    %17 = arith.maximumf %15, %16 : vector<1x1024xf32>
    %c0_15 = arith.constant 0 : index
    %c0_16 = arith.constant 0 : index
    %18 = vector.load %arg5[%c0_15, %c0_16] : memref<1x1024xf32, #tpu.memory_space<vmem>>, vector<1x1024xf32>
    %cst_17 = arith.constant 9.99999974E-6 : f32
    %19 = vector.broadcast %cst_17 : f32 to vector<1x1024xf32>
    %20 = arith.addf %17, %19 : vector<1x1024xf32>
    %21 = math.rsqrt %20 : vector<1x1024xf32>
    %22 = arith.mulf %18, %21 : vector<1x1024xf32>
    %c0_18 = arith.constant 0 : index
    %c0_19 = arith.constant 0 : index
    %23 = vector.load %arg6[%c0_18, %c0_19] : memref<1x1024xf32, #tpu.memory_space<vmem>>, vector<1x1024xf32>
    %24 = arith.mulf %9, %22 : vector<1x1024xf32>
    %25 = arith.subf %23, %24 : vector<1x1024xf32>
    %26 = vector.broadcast %22 : vector<1x1024xf32> to vector<16x1024xf32>
    %27 = arith.mulf %5, %26 : vector<16x1024xf32>
    %28 = vector.broadcast %25 : vector<1x1024xf32> to vector<16x1024xf32>
    %29 = arith.addf %27, %28 : vector<16x1024xf32>
    %30 = arith.truncf %29 : vector<16x1024xf32> to vector<16x1024xbf16>
    %c0_20 = arith.constant 0 : index
    %c0_21 = arith.constant 0 : index
    %31 = vector.load %arg12[%c0_20, %c0_21] : memref<16x1024xbf16, #tpu.memory_space<vmem>>, vector<16x1024xbf16>
    tpu.vector_store %arg12[%c0_20, %c0_21], %30 {strides = array<i32>} : memref<16x1024xbf16, #tpu.memory_space<vmem>>, vector<16x1024xbf16>,
    %32 = tpu.iota {dimensions = array<i32: 1>} : vector<16x8xi32>
    %33 = vector.broadcast %1 : vector<16x1xi32> to vector<16x8xi32>
    %34 = arith.cmpi eq, %33, %32 : vector<16x8xi32>
    %35 = arith.extui %34 : vector<16x8xi1> to vector<16x8xi32>
    %36 = arith.sitofp %35 : vector<16x8xi32> to vector<16x8xf32>
    %37 = arith.truncf %36 : vector<16x8xf32> to vector<16x8xbf16>
    %38 = tpu.iota {dimensions = array<i32: 0>} : vector<8x16xi32>
    %39 = vector.broadcast %2 : vector<1x16xi32> to vector<8x16xi32>
    %40 = arith.cmpi eq, %39, %38 : vector<8x16xi32>
    %41 = arith.extui %40 : vector<8x16xi1> to vector<8x16xi32>
    %42 = arith.sitofp %41 : vector<8x16xi32> to vector<8x16xf32>
    %43 = arith.truncf %42 : vector<8x16xf32> to vector<8x16xbf16>
    %cst_22 = arith.constant 1.000000e+00 : bf16
    %44 = vector.broadcast %cst_22 : bf16 to vector<16x1xbf16>
    %cst_23 = arith.constant dense<0.000000e+00> : vector<8x1xf32>
    %45 = tpu.matmul %43, %44, %cst_23 {dimension_numbers = #tpu.dot_dimension_numbers<[1], [0], [0], [1], [0, 0, 1, 1], [], []>} : vector<8x16xbf16>, vector<16x1xbf16>, vector<8x1xf32> -> vector<8x1xf32>
    %cst_24 = arith.constant 1.000000e+00 : f32
    %46 = vector.broadcast %cst_24 : f32 to vector<8x1xf32>
    %47 = arith.maximumf %45, %46 : vector<8x1xf32>
    %cst_25 = arith.constant 1.000000e+00 : f32
    %48 = vector.broadcast %cst_25 : f32 to vector<8x1xf32>
    %49 = arith.divf %48, %47 : vector<8x1xf32>
    %50 = vector.shape_cast %49 : vector<8x1xf32> to vector<8x1xf32>
    %51 = vector.broadcast %50 : vector<8x1xf32> to vector<8x32xf32>
    %c0_26 = arith.constant 0 : index
    %c0_27 = arith.constant 0 : index
    %52 = vector.load %arg7[%c0_26, %c0_27] : memref<1x32xf32, #tpu.memory_space<vmem>>, vector<1x32xf32>
    %53 = vector.shape_cast %52 : vector<1x32xf32> to vector<1x32xf32>
    %54 = vector.broadcast %53 : vector<1x32xf32> to vector<8x32xf32>
    %c0_28 = arith.constant 0 : index
    %c0_29 = arith.constant 0 : index
    %55 = vector.load %arg10[%c0_28, %c0_29] : memref<1x128xf32, #tpu.memory_space<vmem>>, vector<1x128xf32>
    %56 = vector.shape_cast %55 : vector<1x128xf32> to vector<1x128xf32>
    %57 = vector.broadcast %56 : vector<1x128xf32> to vector<8x128xf32>
    %c0_30 = arith.constant 0 : index
    %c0_31 = arith.constant 0 : index
    %58 = vector.load %arg8[%c0_30, %c0_31] : memref<32x128xbf16, #tpu.memory_space<vmem>>, vector<32x128xbf16>
    %c0_32 = arith.constant 0 : index
    %c0_33 = arith.constant 0 : index
    %59 = vector.load %arg9[%c0_32, %c0_33] : memref<32x128xbf16, #tpu.memory_space<vmem>>, vector<32x128xbf16>
    %cst_34 = arith.constant 0.000000e+00 : f32
    %60 = vector.broadcast %cst_34 : f32 to vector<8x32xf32>
    %61 = arith.addf %60, %0 : vector<8x32xf32>
    %62 = arith.addf %61, %0 : vector<8x32xf32>
    %63 = arith.truncf %0 : vector<8x32xf32> to vector<8x32xbf16>
    %cst_35 = arith.constant dense<0.000000e+00> : vector<16x32xf32>
    %64 = tpu.matmul %37, %63, %cst_35 {dimension_numbers = #tpu.dot_dimension_numbers<[1], [0], [0], [1], [0, 0, 1, 1], [], []>} : vector<16x8xbf16>, vector<8x32xbf16>, vector<16x32xf32> -> vector<16x32xf32>
    %65 = vector.extract_strided_slice %64 {offsets = [0, 0], sizes = [16, 1], strides = [1, 1]} : vector<16x32xf32> to vector<16x1xf32>
    %c0_36 = arith.constant 0 : index
    %c0_37 = arith.constant 0 : index
    %66 = vector.load %arg12[%c0_36, %c0_37] : memref<16x1024xbf16, #tpu.memory_space<vmem>>, vector<16x32xbf16>
    %67 = arith.extf %66 : vector<16x32xbf16> to vector<16x32xf32>
    %68 = vector.broadcast %65 : vector<16x1xf32> to vector<16x32xf32>
    %69 = arith.mulf %68, %67 : vector<16x32xf32>
    %70 = vector.extract_strided_slice %64 {offsets = [0, 1], sizes = [16, 1], strides = [1, 1]} : vector<16x32xf32> to vector<16x1xf32>
    %c0_38 = arith.constant 0 : index
    %c32 = arith.constant 32 : index
    %71 = vector.load %arg12[%c0_38, %c32] : memref<16x1024xbf16, #tpu.memory_space<vmem>>, vector<16x32xbf16>
    %72 = arith.extf %71 : vector<16x32xbf16> to vector<16x32xf32>
    %73 = vector.broadcast %70 : vector<16x1xf32> to vector<16x32xf32>
    %74 = arith.mulf %73, %72 : vector<16x32xf32>
    %75 = arith.addf %69, %74 : vector<16x32xf32>
    %76 = vector.extract_strided_slice %64 {offsets = [0, 2], sizes = [16, 1], strides = [1, 1]} : vector<16x32xf32> to vector<16x1xf32>
    %c0_39 = arith.constant 0 : index
    %c64 = arith.constant 64 : index
    %77 = vector.load %arg12[%c0_39, %c64] : memref<16x1024xbf16, #tpu.memory_space<vmem>>, vector<16x32xbf16>
    %78 = arith.extf %77 : vector<16x32xbf16> to vector<16x32xf32>
    %79 = vector.broadcast %76 : vector<16x1xf32> to vector<16x32xf32>
    %80 = arith.mulf %79, %78 : vector<16x32xf32>
    %81 = arith.addf %75, %80 : vector<16x32xf32>
    %82 = vector.extract_strided_slice %64 {offsets = [0, 3], sizes = [16, 1], strides = [1, 1]} : vector<16x32xf32> to vector<16x1xf32>
    %c0_40 = arith.constant 0 : index
    %c96 = arith.constant 96 : index
    %83 = vector.load %arg12[%c0_40, %c96] : memref<16x1024xbf16, #tpu.memory_space<vmem>>, vector<16x32xbf16>
    %84 = arith.extf %83 : vector<16x32xbf16> to vector<16x32xf32>
    %85 = vector.broadcast %82 : vector<16x1xf32> to vector<16x32xf32>
    %86 = arith.mulf %85, %84 : vector<16x32xf32>
    %87 = arith.addf %81, %86 : vector<16x32xf32>
    %88 = vector.extract_strided_slice %64 {offsets = [0, 4], sizes = [16, 1], strides = [1, 1]} : vector<16x32xf32> to vector<16x1xf32>
    %c0_41 = arith.constant 0 : index
    %c128 = arith.constant 128 : index
    %89 = vector.load %arg12[%c0_41, %c128] : memref<16x1024xbf16, #tpu.memory_space<vmem>>, vector<16x32xbf16>
    %90 = arith.extf %89 : vector<16x32xbf16> to vector<16x32xf32>
    %91 = vector.broadcast %88 : vector<16x1xf32> to vector<16x32xf32>
    %92 = arith.mulf %91, %90 : vector<16x32xf32>
    %93 = arith.addf %87, %92 : vector<16x32xf32>
    %94 = vector.extract_strided_slice %64 {offsets = [0, 5], sizes = [16, 1], strides = [1, 1]} : vector<16x32xf32> to vector<16x1xf32>
    %c0_42 = arith.constant 0 : index
    %c160 = arith.constant 160 : index
    %95 = vector.load %arg12[%c0_42, %c160] : memref<16x1024xbf16, #tpu.memory_space<vmem>>, vector<16x32xbf16>
    %96 = arith.extf %95 : vector<16x32xbf16> to vector<16x32xf32>
    %97 = vector.broadcast %94 : vector<16x1xf32> to vector<16x32xf32>
    %98 = arith.mulf %97, %96 : vector<16x32xf32>
    %99 = arith.addf %93, %98 : vector<16x32xf32>
    %100 = vector.extract_strided_slice %64 {offsets = [0, 6], sizes = [16, 1], strides = [1, 1]} : vector<16x32xf32> to vector<16x1xf32>
    %c0_43 = arith.constant 0 : index
    %c192 = arith.constant 192 : index
    %101 = vector.load %arg12[%c0_43, %c192] : memref<16x1024xbf16, #tpu.memory_space<vmem>>, vector<16x32xbf16>
    %102 = arith.extf %101 : vector<16x32xbf16> to vector<16x32xf32>
    %103 = vector.broadcast %100 : vector<16x1xf32> to vector<16x32xf32>
    %104 = arith.mulf %103, %102 : vector<16x32xf32>
    %105 = arith.addf %99, %104 : vector<16x32xf32>
    %106 = vector.extract_strided_slice %64 {offsets = [0, 7], sizes = [16, 1], strides = [1, 1]} : vector<16x32xf32> to vector<16x1xf32>
    %c0_44 = arith.constant 0 : index
    %c224 = arith.constant 224 : index
    %107 = vector.load %arg12[%c0_44, %c224] : memref<16x1024xbf16, #tpu.memory_space<vmem>>, vector<16x32xbf16>
    %108 = arith.extf %107 : vector<16x32xbf16> to vector<16x32xf32>
    %109 = vector.broadcast %106 : vector<16x1xf32> to vector<16x32xf32>
    %110 = arith.mulf %109, %108 : vector<16x32xf32>
    %111 = arith.addf %105, %110 : vector<16x32xf32>
    %112 = vector.extract_strided_slice %64 {offsets = [0, 8], sizes = [16, 1], strides = [1, 1]} : vector<16x32xf32> to vector<16x1xf32>
    %c0_45 = arith.constant 0 : index
    %c256 = arith.constant 256 : index
    %113 = vector.load %arg12[%c0_45, %c256] : memref<16x1024xbf16, #tpu.memory_space<vmem>>, vector<16x32xbf16>
    %114 = arith.extf %113 : vector<16x32xbf16> to vector<16x32xf32>
    %115 = vector.broadcast %112 : vector<16x1xf32> to vector<16x32xf32>
    %116 = arith.mulf %115, %114 : vector<16x32xf32>
    %117 = arith.addf %111, %116 : vector<16x32xf32>
    %118 = vector.extract_strided_slice %64 {offsets = [0, 9], sizes = [16, 1], strides = [1, 1]} : vector<16x32xf32> to vector<16x1xf32>
    %c0_46 = arith.constant 0 : index
    %c288 = arith.constant 288 : index
    %119 = vector.load %arg12[%c0_46, %c288] : memref<16x1024xbf16, #tpu.memory_space<vmem>>, vector<16x32xbf16>
    %120 = arith.extf %119 : vector<16x32xbf16> to vector<16x32xf32>
    %121 = vector.broadcast %118 : vector<16x1xf32> to vector<16x32xf32>
    %122 = arith.mulf %121, %120 : vector<16x32xf32>
    %123 = arith.addf %117, %122 : vector<16x32xf32>
    %124 = vector.extract_strided_slice %64 {offsets = [0, 10], sizes = [16, 1], strides = [1, 1]} : vector<16x32xf32> to vector<16x1xf32>
    %c0_47 = arith.constant 0 : index
    %c320 = arith.constant 320 : index
    %125 = vector.load %arg12[%c0_47, %c320] : memref<16x1024xbf16, #tpu.memory_space<vmem>>, vector<16x32xbf16>
    %126 = arith.extf %125 : vector<16x32xbf16> to vector<16x32xf32>
    %127 = vector.broadcast %124 : vector<16x1xf32> to vector<16x32xf32>
    %128 = arith.mulf %127, %126 : vector<16x32xf32>
    %129 = arith.addf %123, %128 : vector<16x32xf32>
    %130 = vector.extract_strided_slice %64 {offsets = [0, 11], sizes = [16, 1], strides = [1, 1]} : vector<16x32xf32> to vector<16x1xf32>
    %c0_48 = arith.constant 0 : index
    %c352 = arith.constant 352 : index
    %131 = vector.load %arg12[%c0_48, %c352] : memref<16x1024xbf16, #tpu.memory_space<vmem>>, vector<16x32xbf16>
    %132 = arith.extf %131 : vector<16x32xbf16> to vector<16x32xf32>
    %133 = vector.broadcast %130 : vector<16x1xf32> to vector<16x32xf32>
    %134 = arith.mulf %133, %132 : vector<16x32xf32>
    %135 = arith.addf %129, %134 : vector<16x32xf32>
    %136 = vector.extract_strided_slice %64 {offsets = [0, 12], sizes = [16, 1], strides = [1, 1]} : vector<16x32xf32> to vector<16x1xf32>
    %c0_49 = arith.constant 0 : index
    %c384 = arith.constant 384 : index
    %137 = vector.load %arg12[%c0_49, %c384] : memref<16x1024xbf16, #tpu.memory_space<vmem>>, vector<16x32xbf16>
    %138 = arith.extf %137 : vector<16x32xbf16> to vector<16x32xf32>
    %139 = vector.broadcast %136 : vector<16x1xf32> to vector<16x32xf32>
    %140 = arith.mulf %139, %138 : vector<16x32xf32>
    %141 = arith.addf %135, %140 : vector<16x32xf32>
    %142 = vector.extract_strided_slice %64 {offsets = [0, 13], sizes = [16, 1], strides = [1, 1]} : vector<16x32xf32> to vector<16x1xf32>
    %c0_50 = arith.constant 0 : index
    %c416 = arith.constant 416 : index
    %143 = vector.load %arg12[%c0_50, %c416] : memref<16x1024xbf16, #tpu.memory_space<vmem>>, vector<16x32xbf16>
    %144 = arith.extf %143 : vector<16x32xbf16> to vector<16x32xf32>
    %145 = vector.broadcast %142 : vector<16x1xf32> to vector<16x32xf32>
    %146 = arith.mulf %145, %144 : vector<16x32xf32>
    %147 = arith.addf %141, %146 : vector<16x32xf32>
    %148 = vector.extract_strided_slice %64 {offsets = [0, 14], sizes = [16, 1], strides = [1, 1]} : vector<16x32xf32> to vector<16x1xf32>
    %c0_51 = arith.constant 0 : index
    %c448 = arith.constant 448 : index
    %149 = vector.load %arg12[%c0_51, %c448] : memref<16x1024xbf16, #tpu.memory_space<vmem>>, vector<16x32xbf16>
    %150 = arith.extf %149 : vector<16x32xbf16> to vector<16x32xf32>
    %151 = vector.broadcast %148 : vector<16x1xf32> to vector<16x32xf32>
    %152 = arith.mulf %151, %150 : vector<16x32xf32>
    %153 = arith.addf %147, %152 : vector<16x32xf32>
    %154 = vector.extract_strided_slice %64 {offsets = [0, 15], sizes = [16, 1], strides = [1, 1]} : vector<16x32xf32> to vector<16x1xf32>
    %c0_52 = arith.constant 0 : index
    %c480 = arith.constant 480 : index
    %155 = vector.load %arg12[%c0_52, %c480] : memref<16x1024xbf16, #tpu.memory_space<vmem>>, vector<16x32xbf16>
    %156 = arith.extf %155 : vector<16x32xbf16> to vector<16x32xf32>
    %157 = vector.broadcast %154 : vector<16x1xf32> to vector<16x32xf32>
    %158 = arith.mulf %157, %156 : vector<16x32xf32>
    %159 = arith.addf %153, %158 : vector<16x32xf32>
    %160 = vector.extract_strided_slice %64 {offsets = [0, 16], sizes = [16, 1], strides = [1, 1]} : vector<16x32xf32> to vector<16x1xf32>
    %c0_53 = arith.constant 0 : index
    %c512 = arith.constant 512 : index
    %161 = vector.load %arg12[%c0_53, %c512] : memref<16x1024xbf16, #tpu.memory_space<vmem>>, vector<16x32xbf16>
    %162 = arith.extf %161 : vector<16x32xbf16> to vector<16x32xf32>
    %163 = vector.broadcast %160 : vector<16x1xf32> to vector<16x32xf32>
    %164 = arith.mulf %163, %162 : vector<16x32xf32>
    %165 = arith.addf %159, %164 : vector<16x32xf32>
    %166 = vector.extract_strided_slice %64 {offsets = [0, 17], sizes = [16, 1], strides = [1, 1]} : vector<16x32xf32> to vector<16x1xf32>
    %c0_54 = arith.constant 0 : index
    %c544 = arith.constant 544 : index
    %167 = vector.load %arg12[%c0_54, %c544] : memref<16x1024xbf16, #tpu.memory_space<vmem>>, vector<16x32xbf16>
    %168 = arith.extf %167 : vector<16x32xbf16> to vector<16x32xf32>
    %169 = vector.broadcast %166 : vector<16x1xf32> to vector<16x32xf32>
    %170 = arith.mulf %169, %168 : vector<16x32xf32>
    %171 = arith.addf %165, %170 : vector<16x32xf32>
    %172 = vector.extract_strided_slice %64 {offsets = [0, 18], sizes = [16, 1], strides = [1, 1]} : vector<16x32xf32> to vector<16x1xf32>
    %c0_55 = arith.constant 0 : index
    %c576 = arith.constant 576 : index
    %173 = vector.load %arg12[%c0_55, %c576] : memref<16x1024xbf16, #tpu.memory_space<vmem>>, vector<16x32xbf16>
    %174 = arith.extf %173 : vector<16x32xbf16> to vector<16x32xf32>
    %175 = vector.broadcast %172 : vector<16x1xf32> to vector<16x32xf32>
    %176 = arith.mulf %175, %174 : vector<16x32xf32>
    %177 = arith.addf %171, %176 : vector<16x32xf32>
    %178 = vector.extract_strided_slice %64 {offsets = [0, 19], sizes = [16, 1], strides = [1, 1]} : vector<16x32xf32> to vector<16x1xf32>
    %c0_56 = arith.constant 0 : index
    %c608 = arith.constant 608 : index
    %179 = vector.load %arg12[%c0_56, %c608] : memref<16x1024xbf16, #tpu.memory_space<vmem>>, vector<16x32xbf16>
    %180 = arith.extf %179 : vector<16x32xbf16> to vector<16x32xf32>
    %181 = vector.broadcast %178 : vector<16x1xf32> to vector<16x32xf32>
    %182 = arith.mulf %181, %180 : vector<16x32xf32>
    %183 = arith.addf %177, %182 : vector<16x32xf32>
    %184 = vector.extract_strided_slice %64 {offsets = [0, 20], sizes = [16, 1], strides = [1, 1]} : vector<16x32xf32> to vector<16x1xf32>
    %c0_57 = arith.constant 0 : index
    %c640 = arith.constant 640 : index
    %185 = vector.load %arg12[%c0_57, %c640] : memref<16x1024xbf16, #tpu.memory_space<vmem>>, vector<16x32xbf16>
    %186 = arith.extf %185 : vector<16x32xbf16> to vector<16x32xf32>
    %187 = vector.broadcast %184 : vector<16x1xf32> to vector<16x32xf32>
    %188 = arith.mulf %187, %186 : vector<16x32xf32>
    %189 = arith.addf %183, %188 : vector<16x32xf32>
    %190 = vector.extract_strided_slice %64 {offsets = [0, 21], sizes = [16, 1], strides = [1, 1]} : vector<16x32xf32> to vector<16x1xf32>
    %c0_58 = arith.constant 0 : index
    %c672 = arith.constant 672 : index
    %191 = vector.load %arg12[%c0_58, %c672] : memref<16x1024xbf16, #tpu.memory_space<vmem>>, vector<16x32xbf16>
    %192 = arith.extf %191 : vector<16x32xbf16> to vector<16x32xf32>
    %193 = vector.broadcast %190 : vector<16x1xf32> to vector<16x32xf32>
    %194 = arith.mulf %193, %192 : vector<16x32xf32>
    %195 = arith.addf %189, %194 : vector<16x32xf32>
    %196 = vector.extract_strided_slice %64 {offsets = [0, 22], sizes = [16, 1], strides = [1, 1]} : vector<16x32xf32> to vector<16x1xf32>
    %c0_59 = arith.constant 0 : index
    %c704 = arith.constant 704 : index
    %197 = vector.load %arg12[%c0_59, %c704] : memref<16x1024xbf16, #tpu.memory_space<vmem>>, vector<16x32xbf16>
    %198 = arith.extf %197 : vector<16x32xbf16> to vector<16x32xf32>
    %199 = vector.broadcast %196 : vector<16x1xf32> to vector<16x32xf32>
    %200 = arith.mulf %199, %198 : vector<16x32xf32>
    %201 = arith.addf %195, %200 : vector<16x32xf32>
    %202 = vector.extract_strided_slice %64 {offsets = [0, 23], sizes = [16, 1], strides = [1, 1]} : vector<16x32xf32> to vector<16x1xf32>
    %c0_60 = arith.constant 0 : index
    %c736 = arith.constant 736 : index
    %203 = vector.load %arg12[%c0_60, %c736] : memref<16x1024xbf16, #tpu.memory_space<vmem>>, vector<16x32xbf16>
    %204 = arith.extf %203 : vector<16x32xbf16> to vector<16x32xf32>
    %205 = vector.broadcast %202 : vector<16x1xf32> to vector<16x32xf32>
    %206 = arith.mulf %205, %204 : vector<16x32xf32>
    %207 = arith.addf %201, %206 : vector<16x32xf32>
    %208 = vector.extract_strided_slice %64 {offsets = [0, 24], sizes = [16, 1], strides = [1, 1]} : vector<16x32xf32> to vector<16x1xf32>
    %c0_61 = arith.constant 0 : index
    %c768 = arith.constant 768 : index
    %209 = vector.load %arg12[%c0_61, %c768] : memref<16x1024xbf16, #tpu.memory_space<vmem>>, vector<16x32xbf16>
    %210 = arith.extf %209 : vector<16x32xbf16> to vector<16x32xf32>
    %211 = vector.broadcast %208 : vector<16x1xf32> to vector<16x32xf32>
    %212 = arith.mulf %211, %210 : vector<16x32xf32>
    %213 = arith.addf %207, %212 : vector<16x32xf32>
    %214 = vector.extract_strided_slice %64 {offsets = [0, 25], sizes = [16, 1], strides = [1, 1]} : vector<16x32xf32> to vector<16x1xf32>
    %c0_62 = arith.constant 0 : index
    %c800 = arith.constant 800 : index
    %215 = vector.load %arg12[%c0_62, %c800] : memref<16x1024xbf16, #tpu.memory_space<vmem>>, vector<16x32xbf16>
    %216 = arith.extf %215 : vector<16x32xbf16> to vector<16x32xf32>
    %217 = vector.broadcast %214 : vector<16x1xf32> to vector<16x32xf32>
    %218 = arith.mulf %217, %216 : vector<16x32xf32>
    %219 = arith.addf %213, %218 : vector<16x32xf32>
    %220 = vector.extract_strided_slice %64 {offsets = [0, 26], sizes = [16, 1], strides = [1, 1]} : vector<16x32xf32> to vector<16x1xf32>
    %c0_63 = arith.constant 0 : index
    %c832 = arith.constant 832 : index
    %221 = vector.load %arg12[%c0_63, %c832] : memref<16x1024xbf16, #tpu.memory_space<vmem>>, vector<16x32xbf16>
    %222 = arith.extf %221 : vector<16x32xbf16> to vector<16x32xf32>
    %223 = vector.broadcast %220 : vector<16x1xf32> to vector<16x32xf32>
    %224 = arith.mulf %223, %222 : vector<16x32xf32>
    %225 = arith.addf %219, %224 : vector<16x32xf32>
    %226 = vector.extract_strided_slice %64 {offsets = [0, 27], sizes = [16, 1], strides = [1, 1]} : vector<16x32xf32> to vector<16x1xf32>
    %c0_64 = arith.constant 0 : index
    %c864 = arith.constant 864 : index
    %227 = vector.load %arg12[%c0_64, %c864] : memref<16x1024xbf16, #tpu.memory_space<vmem>>, vector<16x32xbf16>
    %228 = arith.extf %227 : vector<16x32xbf16> to vector<16x32xf32>
    %229 = vector.broadcast %226 : vector<16x1xf32> to vector<16x32xf32>
    %230 = arith.mulf %229, %228 : vector<16x32xf32>
    %231 = arith.addf %225, %230 : vector<16x32xf32>
    %232 = vector.extract_strided_slice %64 {offsets = [0, 28], sizes = [16, 1], strides = [1, 1]} : vector<16x32xf32> to vector<16x1xf32>
    %c0_65 = arith.constant 0 : index
    %c896 = arith.constant 896 : index
    %233 = vector.load %arg12[%c0_65, %c896] : memref<16x1024xbf16, #tpu.memory_space<vmem>>, vector<16x32xbf16>
    %234 = arith.extf %233 : vector<16x32xbf16> to vector<16x32xf32>
    %235 = vector.broadcast %232 : vector<16x1xf32> to vector<16x32xf32>
    %236 = arith.mulf %235, %234 : vector<16x32xf32>
    %237 = arith.addf %231, %236 : vector<16x32xf32>
    %238 = vector.extract_strided_slice %64 {offsets = [0, 29], sizes = [16, 1], strides = [1, 1]} : vector<16x32xf32> to vector<16x1xf32>
    %c0_66 = arith.constant 0 : index
    %c928 = arith.constant 928 : index
    %239 = vector.load %arg12[%c0_66, %c928] : memref<16x1024xbf16, #tpu.memory_space<vmem>>, vector<16x32xbf16>
    %240 = arith.extf %239 : vector<16x32xbf16> to vector<16x32xf32>
    %241 = vector.broadcast %238 : vector<16x1xf32> to vector<16x32xf32>
    %242 = arith.mulf %241, %240 : vector<16x32xf32>
    %243 = arith.addf %237, %242 : vector<16x32xf32>
    %244 = vector.extract_strided_slice %64 {offsets = [0, 30], sizes = [16, 1], strides = [1, 1]} : vector<16x32xf32> to vector<16x1xf32>
    %c0_67 = arith.constant 0 : index
    %c960 = arith.constant 960 : index
    %245 = vector.load %arg12[%c0_67, %c960] : memref<16x1024xbf16, #tpu.memory_space<vmem>>, vector<16x32xbf16>
    %246 = arith.extf %245 : vector<16x32xbf16> to vector<16x32xf32>
    %247 = vector.broadcast %244 : vector<16x1xf32> to vector<16x32xf32>
    %248 = arith.mulf %247, %246 : vector<16x32xf32>
    %249 = arith.addf %243, %248 : vector<16x32xf32>
    %250 = vector.extract_strided_slice %64 {offsets = [0, 31], sizes = [16, 1], strides = [1, 1]} : vector<16x32xf32> to vector<16x1xf32>
    %c0_68 = arith.constant 0 : index
    %c992 = arith.constant 992 : index
    %251 = vector.load %arg12[%c0_68, %c992] : memref<16x1024xbf16, #tpu.memory_space<vmem>>, vector<16x32xbf16>
    %252 = arith.extf %251 : vector<16x32xbf16> to vector<16x32xf32>
    %253 = vector.broadcast %250 : vector<16x1xf32> to vector<16x32xf32>
    %254 = arith.mulf %253, %252 : vector<16x32xf32>
    %255 = arith.addf %249, %254 : vector<16x32xf32>
    %256 = arith.truncf %255 : vector<16x32xf32> to vector<16x32xbf16>
    %cst_69 = arith.constant dense<0.000000e+00> : vector<8x32xf32>
    %257 = tpu.matmul %43, %256, %cst_69 {dimension_numbers = #tpu.dot_dimension_numbers<[1], [0], [0], [1], [0, 0, 1, 1], [], []>} : vector<8x16xbf16>, vector<16x32xbf16>, vector<8x32xf32> -> vector<8x32xf32>
    %258 = arith.mulf %257, %51 : vector<8x32xf32>
    %259 = arith.addf %258, %54 : vector<8x32xf32>
    %cst_70 = arith.constant 0.000000e+00 : f32
    %260 = vector.broadcast %cst_70 : f32 to vector<8x32xf32>
    %261 = arith.maximumf %259, %260 : vector<8x32xf32>
    %262 = arith.truncf %261 : vector<8x32xf32> to vector<8x32xbf16>
    %cst_71 = arith.constant dense<0.000000e+00> : vector<8x128xf32>
    %263 = tpu.matmul %262, %58, %cst_71 {dimension_numbers = #tpu.dot_dimension_numbers<[1], [0], [0], [1], [0, 0, 1, 1], [], []>} : vector<8x32xbf16>, vector<32x128xbf16>, vector<8x128xf32> -> vector<8x128xf32>
    %264 = arith.truncf %0 : vector<8x32xf32> to vector<8x32xbf16>
    %cst_72 = arith.constant dense<0.000000e+00> : vector<8x128xf32>
    %265 = tpu.matmul %264, %59, %cst_72 {dimension_numbers = #tpu.dot_dimension_numbers<[1], [0], [0], [1], [0, 0, 1, 1], [], []>} : vector<8x32xbf16>, vector<32x128xbf16>, vector<8x128xf32> -> vector<8x128xf32>
    %266 = arith.addf %263, %265 : vector<8x128xf32>
    %267 = arith.addf %266, %57 : vector<8x128xf32>
    %268 = vector.extract_strided_slice %267 {offsets = [0, 0], sizes = [8, 64], strides = [1, 1]} : vector<8x128xf32> to vector<8x64xf32>
    %269 = arith.negf %268 : vector<8x64xf32>
    %270 = math.exp %269 : vector<8x64xf32>
    %cst_73 = arith.constant 1.000000e+00 : f32
    %271 = vector.broadcast %cst_73 : f32 to vector<8x64xf32>
    %272 = arith.addf %271, %270 : vector<8x64xf32>
    %273 = arith.divf %271, %272 : vector<8x64xf32>
    %274 = vector.extract_strided_slice %273 {offsets = [0, 0], sizes = [8, 32], strides = [1, 1]} : vector<8x64xf32> to vector<8x32xf32>
    %275 = vector.extract_strided_slice %273 {offsets = [0, 32], sizes = [8, 32], strides = [1, 1]} : vector<8x64xf32> to vector<8x32xf32>
    %276 = vector.extract_strided_slice %267 {offsets = [0, 64], sizes = [8, 32], strides = [1, 1]} : vector<8x128xf32> to vector<8x32xf32>
    %277 = vector.extract_strided_slice %267 {offsets = [0, 96], sizes = [8, 32], strides = [1, 1]} : vector<8x128xf32> to vector<8x32xf32>
    %278 = arith.mulf %274, %277 : vector<8x32xf32>
    %279 = arith.addf %276, %278 : vector<8x32xf32>
    %280 = math.tanh %279 : vector<8x32xf32>
    %cst_74 = arith.constant 1.000000e+00 : f32
    %281 = vector.broadcast %cst_74 : f32 to vector<8x32xf32>
    %282 = arith.subf %281, %275 : vector<8x32xf32>
    %283 = arith.mulf %282, %280 : vector<8x32xf32>
    %284 = arith.mulf %275, %0 : vector<8x32xf32>
    %285 = arith.addf %283, %284 : vector<8x32xf32>
    %286 = arith.addf %62, %285 : vector<8x32xf32>
    %287 = arith.addf %286, %0 : vector<8x32xf32>
    %288 = arith.truncf %285 : vector<8x32xf32> to vector<8x32xbf16>
    %cst_75 = arith.constant dense<0.000000e+00> : vector<16x32xf32>
    %289 = tpu.matmul %37, %288, %cst_75 {dimension_numbers = #tpu.dot_dimension_numbers<[1], [0], [0], [1], [0, 0, 1, 1], [], []>} : vector<16x8xbf16>, vector<8x32xbf16>, vector<16x32xf32> -> vector<16x32xf32>
    %290 = vector.extract_strided_slice %289 {offsets = [0, 0], sizes = [16, 1], strides = [1, 1]} : vector<16x32xf32> to vector<16x1xf32>
    %c0_76 = arith.constant 0 : index
    %c0_77 = arith.constant 0 : index
    %291 = vector.load %arg12[%c0_76, %c0_77] : memref<16x1024xbf16, #tpu.memory_space<vmem>>, vector<16x32xbf16>
    %292 = arith.extf %291 : vector<16x32xbf16> to vector<16x32xf32>
    %293 = vector.broadcast %290 : vector<16x1xf32> to vector<16x32xf32>
    %294 = arith.mulf %293, %292 : vector<16x32xf32>
    %295 = vector.extract_strided_slice %289 {offsets = [0, 1], sizes = [16, 1], strides = [1, 1]} : vector<16x32xf32> to vector<16x1xf32>
    %c0_78 = arith.constant 0 : index
    %c32_79 = arith.constant 32 : index
    %296 = vector.load %arg12[%c0_78, %c32_79] : memref<16x1024xbf16, #tpu.memory_space<vmem>>, vector<16x32xbf16>
    %297 = arith.extf %296 : vector<16x32xbf16> to vector<16x32xf32>
    %298 = vector.broadcast %295 : vector<16x1xf32> to vector<16x32xf32>
    %299 = arith.mulf %298, %297 : vector<16x32xf32>
    %300 = arith.addf %294, %299 : vector<16x32xf32>
    %301 = vector.extract_strided_slice %289 {offsets = [0, 2], sizes = [16, 1], strides = [1, 1]} : vector<16x32xf32> to vector<16x1xf32>
    %c0_80 = arith.constant 0 : index
    %c64_81 = arith.constant 64 : index
    %302 = vector.load %arg12[%c0_80, %c64_81] : memref<16x1024xbf16, #tpu.memory_space<vmem>>, vector<16x32xbf16>
    %303 = arith.extf %302 : vector<16x32xbf16> to vector<16x32xf32>
    %304 = vector.broadcast %301 : vector<16x1xf32> to vector<16x32xf32>
    %305 = arith.mulf %304, %303 : vector<16x32xf32>
    %306 = arith.addf %300, %305 : vector<16x32xf32>
    %307 = vector.extract_strided_slice %289 {offsets = [0, 3], sizes = [16, 1], strides = [1, 1]} : vector<16x32xf32> to vector<16x1xf32>
    %c0_82 = arith.constant 0 : index
    %c96_83 = arith.constant 96 : index
    %308 = vector.load %arg12[%c0_82, %c96_83] : memref<16x1024xbf16, #tpu.memory_space<vmem>>, vector<16x32xbf16>
    %309 = arith.extf %308 : vector<16x32xbf16> to vector<16x32xf32>
    %310 = vector.broadcast %307 : vector<16x1xf32> to vector<16x32xf32>
    %311 = arith.mulf %310, %309 : vector<16x32xf32>
    %312 = arith.addf %306, %311 : vector<16x32xf32>
    %313 = vector.extract_strided_slice %289 {offsets = [0, 4], sizes = [16, 1], strides = [1, 1]} : vector<16x32xf32> to vector<16x1xf32>
    %c0_84 = arith.constant 0 : index
    %c128_85 = arith.constant 128 : index
    %314 = vector.load %arg12[%c0_84, %c128_85] : memref<16x1024xbf16, #tpu.memory_space<vmem>>, vector<16x32xbf16>
    %315 = arith.extf %314 : vector<16x32xbf16> to vector<16x32xf32>
    %316 = vector.broadcast %313 : vector<16x1xf32> to vector<16x32xf32>
    %317 = arith.mulf %316, %315 : vector<16x32xf32>
    %318 = arith.addf %312, %317 : vector<16x32xf32>
    %319 = vector.extract_strided_slice %289 {offsets = [0, 5], sizes = [16, 1], strides = [1, 1]} : vector<16x32xf32> to vector<16x1xf32>
    %c0_86 = arith.constant 0 : index
    %c160_87 = arith.constant 160 : index
    %320 = vector.load %arg12[%c0_86, %c160_87] : memref<16x1024xbf16, #tpu.memory_space<vmem>>, vector<16x32xbf16>
    %321 = arith.extf %320 : vector<16x32xbf16> to vector<16x32xf32>
    %322 = vector.broadcast %319 : vector<16x1xf32> to vector<16x32xf32>
    %323 = arith.mulf %322, %321 : vector<16x32xf32>
    %324 = arith.addf %318, %323 : vector<16x32xf32>
    %325 = vector.extract_strided_slice %289 {offsets = [0, 6], sizes = [16, 1], strides = [1, 1]} : vector<16x32xf32> to vector<16x1xf32>
    %c0_88 = arith.constant 0 : index
    %c192_89 = arith.constant 192 : index
    %326 = vector.load %arg12[%c0_88, %c192_89] : memref<16x1024xbf16, #tpu.memory_space<vmem>>, vector<16x32xbf16>
    %327 = arith.extf %326 : vector<16x32xbf16> to vector<16x32xf32>
    %328 = vector.broadcast %325 : vector<16x1xf32> to vector<16x32xf32>
    %329 = arith.mulf %328, %327 : vector<16x32xf32>
    %330 = arith.addf %324, %329 : vector<16x32xf32>
    %331 = vector.extract_strided_slice %289 {offsets = [0, 7], sizes = [16, 1], strides = [1, 1]} : vector<16x32xf32> to vector<16x1xf32>
    %c0_90 = arith.constant 0 : index
    %c224_91 = arith.constant 224 : index
    %332 = vector.load %arg12[%c0_90, %c224_91] : memref<16x1024xbf16, #tpu.memory_space<vmem>>, vector<16x32xbf16>
    %333 = arith.extf %332 : vector<16x32xbf16> to vector<16x32xf32>
    %334 = vector.broadcast %331 : vector<16x1xf32> to vector<16x32xf32>
    %335 = arith.mulf %334, %333 : vector<16x32xf32>
    %336 = arith.addf %330, %335 : vector<16x32xf32>
    %337 = vector.extract_strided_slice %289 {offsets = [0, 8], sizes = [16, 1], strides = [1, 1]} : vector<16x32xf32> to vector<16x1xf32>
    %c0_92 = arith.constant 0 : index
    %c256_93 = arith.constant 256 : index
    %338 = vector.load %arg12[%c0_92, %c256_93] : memref<16x1024xbf16, #tpu.memory_space<vmem>>, vector<16x32xbf16>
    %339 = arith.extf %338 : vector<16x32xbf16> to vector<16x32xf32>
    %340 = vector.broadcast %337 : vector<16x1xf32> to vector<16x32xf32>
    %341 = arith.mulf %340, %339 : vector<16x32xf32>
    %342 = arith.addf %336, %341 : vector<16x32xf32>
    %343 = vector.extract_strided_slice %289 {offsets = [0, 9], sizes = [16, 1], strides = [1, 1]} : vector<16x32xf32> to vector<16x1xf32>
    %c0_94 = arith.constant 0 : index
    %c288_95 = arith.constant 288 : index
    %344 = vector.load %arg12[%c0_94, %c288_95] : memref<16x1024xbf16, #tpu.memory_space<vmem>>, vector<16x32xbf16>
    %345 = arith.extf %344 : vector<16x32xbf16> to vector<16x32xf32>
    %346 = vector.broadcast %343 : vector<16x1xf32> to vector<16x32xf32>
    %347 = arith.mulf %346, %345 : vector<16x32xf32>
    %348 = arith.addf %342, %347 : vector<16x32xf32>
    %349 = vector.extract_strided_slice %289 {offsets = [0, 10], sizes = [16, 1], strides = [1, 1]} : vector<16x32xf32> to vector<16x1xf32>
    %c0_96 = arith.constant 0 : index
    %c320_97 = arith.constant 320 : index
    %350 = vector.load %arg12[%c0_96, %c320_97] : memref<16x1024xbf16, #tpu.memory_space<vmem>>, vector<16x32xbf16>
    %351 = arith.extf %350 : vector<16x32xbf16> to vector<16x32xf32>
    %352 = vector.broadcast %349 : vector<16x1xf32> to vector<16x32xf32>
    %353 = arith.mulf %352, %351 : vector<16x32xf32>
    %354 = arith.addf %348, %353 : vector<16x32xf32>
    %355 = vector.extract_strided_slice %289 {offsets = [0, 11], sizes = [16, 1], strides = [1, 1]} : vector<16x32xf32> to vector<16x1xf32>
    %c0_98 = arith.constant 0 : index
    %c352_99 = arith.constant 352 : index
    %356 = vector.load %arg12[%c0_98, %c352_99] : memref<16x1024xbf16, #tpu.memory_space<vmem>>, vector<16x32xbf16>
    %357 = arith.extf %356 : vector<16x32xbf16> to vector<16x32xf32>
    %358 = vector.broadcast %355 : vector<16x1xf32> to vector<16x32xf32>
    %359 = arith.mulf %358, %357 : vector<16x32xf32>
    %360 = arith.addf %354, %359 : vector<16x32xf32>
    %361 = vector.extract_strided_slice %289 {offsets = [0, 12], sizes = [16, 1], strides = [1, 1]} : vector<16x32xf32> to vector<16x1xf32>
    %c0_100 = arith.constant 0 : index
    %c384_101 = arith.constant 384 : index
    %362 = vector.load %arg12[%c0_100, %c384_101] : memref<16x1024xbf16, #tpu.memory_space<vmem>>, vector<16x32xbf16>
    %363 = arith.extf %362 : vector<16x32xbf16> to vector<16x32xf32>
    %364 = vector.broadcast %361 : vector<16x1xf32> to vector<16x32xf32>
    %365 = arith.mulf %364, %363 : vector<16x32xf32>
    %366 = arith.addf %360, %365 : vector<16x32xf32>
    %367 = vector.extract_strided_slice %289 {offsets = [0, 13], sizes = [16, 1], strides = [1, 1]} : vector<16x32xf32> to vector<16x1xf32>
    %c0_102 = arith.constant 0 : index
    %c416_103 = arith.constant 416 : index
    %368 = vector.load %arg12[%c0_102, %c416_103] : memref<16x1024xbf16, #tpu.memory_space<vmem>>, vector<16x32xbf16>
    %369 = arith.extf %368 : vector<16x32xbf16> to vector<16x32xf32>
    %370 = vector.broadcast %367 : vector<16x1xf32> to vector<16x32xf32>
    %371 = arith.mulf %370, %369 : vector<16x32xf32>
    %372 = arith.addf %366, %371 : vector<16x32xf32>
    %373 = vector.extract_strided_slice %289 {offsets = [0, 14], sizes = [16, 1], strides = [1, 1]} : vector<16x32xf32> to vector<16x1xf32>
    %c0_104 = arith.constant 0 : index
    %c448_105 = arith.constant 448 : index
    %374 = vector.load %arg12[%c0_104, %c448_105] : memref<16x1024xbf16, #tpu.memory_space<vmem>>, vector<16x32xbf16>
    %375 = arith.extf %374 : vector<16x32xbf16> to vector<16x32xf32>
    %376 = vector.broadcast %373 : vector<16x1xf32> to vector<16x32xf32>
    %377 = arith.mulf %376, %375 : vector<16x32xf32>
    %378 = arith.addf %372, %377 : vector<16x32xf32>
    %379 = vector.extract_strided_slice %289 {offsets = [0, 15], sizes = [16, 1], strides = [1, 1]} : vector<16x32xf32> to vector<16x1xf32>
    %c0_106 = arith.constant 0 : index
    %c480_107 = arith.constant 480 : index
    %380 = vector.load %arg12[%c0_106, %c480_107] : memref<16x1024xbf16, #tpu.memory_space<vmem>>, vector<16x32xbf16>
    %381 = arith.extf %380 : vector<16x32xbf16> to vector<16x32xf32>
    %382 = vector.broadcast %379 : vector<16x1xf32> to vector<16x32xf32>
    %383 = arith.mulf %382, %381 : vector<16x32xf32>
    %384 = arith.addf %378, %383 : vector<16x32xf32>
    %385 = vector.extract_strided_slice %289 {offsets = [0, 16], sizes = [16, 1], strides = [1, 1]} : vector<16x32xf32> to vector<16x1xf32>
    %c0_108 = arith.constant 0 : index
    %c512_109 = arith.constant 512 : index
    %386 = vector.load %arg12[%c0_108, %c512_109] : memref<16x1024xbf16, #tpu.memory_space<vmem>>, vector<16x32xbf16>
    %387 = arith.extf %386 : vector<16x32xbf16> to vector<16x32xf32>
    %388 = vector.broadcast %385 : vector<16x1xf32> to vector<16x32xf32>
    %389 = arith.mulf %388, %387 : vector<16x32xf32>
    %390 = arith.addf %384, %389 : vector<16x32xf32>
    %391 = vector.extract_strided_slice %289 {offsets = [0, 17], sizes = [16, 1], strides = [1, 1]} : vector<16x32xf32> to vector<16x1xf32>
    %c0_110 = arith.constant 0 : index
    %c544_111 = arith.constant 544 : index
    %392 = vector.load %arg12[%c0_110, %c544_111] : memref<16x1024xbf16, #tpu.memory_space<vmem>>, vector<16x32xbf16>
    %393 = arith.extf %392 : vector<16x32xbf16> to vector<16x32xf32>
    %394 = vector.broadcast %391 : vector<16x1xf32> to vector<16x32xf32>
    %395 = arith.mulf %394, %393 : vector<16x32xf32>
    %396 = arith.addf %390, %395 : vector<16x32xf32>
    %397 = vector.extract_strided_slice %289 {offsets = [0, 18], sizes = [16, 1], strides = [1, 1]} : vector<16x32xf32> to vector<16x1xf32>
    %c0_112 = arith.constant 0 : index
    %c576_113 = arith.constant 576 : index
    %398 = vector.load %arg12[%c0_112, %c576_113] : memref<16x1024xbf16, #tpu.memory_space<vmem>>, vector<16x32xbf16>
    %399 = arith.extf %398 : vector<16x32xbf16> to vector<16x32xf32>
    %400 = vector.broadcast %397 : vector<16x1xf32> to vector<16x32xf32>
    %401 = arith.mulf %400, %399 : vector<16x32xf32>
    %402 = arith.addf %396, %401 : vector<16x32xf32>
    %403 = vector.extract_strided_slice %289 {offsets = [0, 19], sizes = [16, 1], strides = [1, 1]} : vector<16x32xf32> to vector<16x1xf32>
    %c0_114 = arith.constant 0 : index
    %c608_115 = arith.constant 608 : index
    %404 = vector.load %arg12[%c0_114, %c608_115] : memref<16x1024xbf16, #tpu.memory_space<vmem>>, vector<16x32xbf16>
    %405 = arith.extf %404 : vector<16x32xbf16> to vector<16x32xf32>
    %406 = vector.broadcast %403 : vector<16x1xf32> to vector<16x32xf32>
    %407 = arith.mulf %406, %405 : vector<16x32xf32>
    %408 = arith.addf %402, %407 : vector<16x32xf32>
    %409 = vector.extract_strided_slice %289 {offsets = [0, 20], sizes = [16, 1], strides = [1, 1]} : vector<16x32xf32> to vector<16x1xf32>
    %c0_116 = arith.constant 0 : index
    %c640_117 = arith.constant 640 : index
    %410 = vector.load %arg12[%c0_116, %c640_117] : memref<16x1024xbf16, #tpu.memory_space<vmem>>, vector<16x32xbf16>
    %411 = arith.extf %410 : vector<16x32xbf16> to vector<16x32xf32>
    %412 = vector.broadcast %409 : vector<16x1xf32> to vector<16x32xf32>
    %413 = arith.mulf %412, %411 : vector<16x32xf32>
    %414 = arith.addf %408, %413 : vector<16x32xf32>
    %415 = vector.extract_strided_slice %289 {offsets = [0, 21], sizes = [16, 1], strides = [1, 1]} : vector<16x32xf32> to vector<16x1xf32>
    %c0_118 = arith.constant 0 : index
    %c672_119 = arith.constant 672 : index
    %416 = vector.load %arg12[%c0_118, %c672_119] : memref<16x1024xbf16, #tpu.memory_space<vmem>>, vector<16x32xbf16>
    %417 = arith.extf %416 : vector<16x32xbf16> to vector<16x32xf32>
    %418 = vector.broadcast %415 : vector<16x1xf32> to vector<16x32xf32>
    %419 = arith.mulf %418, %417 : vector<16x32xf32>
    %420 = arith.addf %414, %419 : vector<16x32xf32>
    %421 = vector.extract_strided_slice %289 {offsets = [0, 22], sizes = [16, 1], strides = [1, 1]} : vector<16x32xf32> to vector<16x1xf32>
    %c0_120 = arith.constant 0 : index
    %c704_121 = arith.constant 704 : index
    %422 = vector.load %arg12[%c0_120, %c704_121] : memref<16x1024xbf16, #tpu.memory_space<vmem>>, vector<16x32xbf16>
    %423 = arith.extf %422 : vector<16x32xbf16> to vector<16x32xf32>
    %424 = vector.broadcast %421 : vector<16x1xf32> to vector<16x32xf32>
    %425 = arith.mulf %424, %423 : vector<16x32xf32>
    %426 = arith.addf %420, %425 : vector<16x32xf32>
    %427 = vector.extract_strided_slice %289 {offsets = [0, 23], sizes = [16, 1], strides = [1, 1]} : vector<16x32xf32> to vector<16x1xf32>
    %c0_122 = arith.constant 0 : index
    %c736_123 = arith.constant 736 : index
    %428 = vector.load %arg12[%c0_122, %c736_123] : memref<16x1024xbf16, #tpu.memory_space<vmem>>, vector<16x32xbf16>
    %429 = arith.extf %428 : vector<16x32xbf16> to vector<16x32xf32>
    %430 = vector.broadcast %427 : vector<16x1xf32> to vector<16x32xf32>
    %431 = arith.mulf %430, %429 : vector<16x32xf32>
    %432 = arith.addf %426, %431 : vector<16x32xf32>
    %433 = vector.extract_strided_slice %289 {offsets = [0, 24], sizes = [16, 1], strides = [1, 1]} : vector<16x32xf32> to vector<16x1xf32>
    %c0_124 = arith.constant 0 : index
    %c768_125 = arith.constant 768 : index
    %434 = vector.load %arg12[%c0_124, %c768_125] : memref<16x1024xbf16, #tpu.memory_space<vmem>>, vector<16x32xbf16>
    %435 = arith.extf %434 : vector<16x32xbf16> to vector<16x32xf32>
    %436 = vector.broadcast %433 : vector<16x1xf32> to vector<16x32xf32>
    %437 = arith.mulf %436, %435 : vector<16x32xf32>
    %438 = arith.addf %432, %437 : vector<16x32xf32>
    %439 = vector.extract_strided_slice %289 {offsets = [0, 25], sizes = [16, 1], strides = [1, 1]} : vector<16x32xf32> to vector<16x1xf32>
    %c0_126 = arith.constant 0 : index
    %c800_127 = arith.constant 800 : index
    %440 = vector.load %arg12[%c0_126, %c800_127] : memref<16x1024xbf16, #tpu.memory_space<vmem>>, vector<16x32xbf16>
    %441 = arith.extf %440 : vector<16x32xbf16> to vector<16x32xf32>
    %442 = vector.broadcast %439 : vector<16x1xf32> to vector<16x32xf32>
    %443 = arith.mulf %442, %441 : vector<16x32xf32>
    %444 = arith.addf %438, %443 : vector<16x32xf32>
    %445 = vector.extract_strided_slice %289 {offsets = [0, 26], sizes = [16, 1], strides = [1, 1]} : vector<16x32xf32> to vector<16x1xf32>
    %c0_128 = arith.constant 0 : index
    %c832_129 = arith.constant 832 : index
    %446 = vector.load %arg12[%c0_128, %c832_129] : memref<16x1024xbf16, #tpu.memory_space<vmem>>, vector<16x32xbf16>
    %447 = arith.extf %446 : vector<16x32xbf16> to vector<16x32xf32>
    %448 = vector.broadcast %445 : vector<16x1xf32> to vector<16x32xf32>
    %449 = arith.mulf %448, %447 : vector<16x32xf32>
    %450 = arith.addf %444, %449 : vector<16x32xf32>
    %451 = vector.extract_strided_slice %289 {offsets = [0, 27], sizes = [16, 1], strides = [1, 1]} : vector<16x32xf32> to vector<16x1xf32>
    %c0_130 = arith.constant 0 : index
    %c864_131 = arith.constant 864 : index
    %452 = vector.load %arg12[%c0_130, %c864_131] : memref<16x1024xbf16, #tpu.memory_space<vmem>>, vector<16x32xbf16>
    %453 = arith.extf %452 : vector<16x32xbf16> to vector<16x32xf32>
    %454 = vector.broadcast %451 : vector<16x1xf32> to vector<16x32xf32>
    %455 = arith.mulf %454, %453 : vector<16x32xf32>
    %456 = arith.addf %450, %455 : vector<16x32xf32>
    %457 = vector.extract_strided_slice %289 {offsets = [0, 28], sizes = [16, 1], strides = [1, 1]} : vector<16x32xf32> to vector<16x1xf32>
    %c0_132 = arith.constant 0 : index
    %c896_133 = arith.constant 896 : index
    %458 = vector.load %arg12[%c0_132, %c896_133] : memref<16x1024xbf16, #tpu.memory_space<vmem>>, vector<16x32xbf16>
    %459 = arith.extf %458 : vector<16x32xbf16> to vector<16x32xf32>
    %460 = vector.broadcast %457 : vector<16x1xf32> to vector<16x32xf32>
    %461 = arith.mulf %460, %459 : vector<16x32xf32>
    %462 = arith.addf %456, %461 : vector<16x32xf32>
    %463 = vector.extract_strided_slice %289 {offsets = [0, 29], sizes = [16, 1], strides = [1, 1]} : vector<16x32xf32> to vector<16x1xf32>
    %c0_134 = arith.constant 0 : index
    %c928_135 = arith.constant 928 : index
    %464 = vector.load %arg12[%c0_134, %c928_135] : memref<16x1024xbf16, #tpu.memory_space<vmem>>, vector<16x32xbf16>
    %465 = arith.extf %464 : vector<16x32xbf16> to vector<16x32xf32>
    %466 = vector.broadcast %463 : vector<16x1xf32> to vector<16x32xf32>
    %467 = arith.mulf %466, %465 : vector<16x32xf32>
    %468 = arith.addf %462, %467 : vector<16x32xf32>
    %469 = vector.extract_strided_slice %289 {offsets = [0, 30], sizes = [16, 1], strides = [1, 1]} : vector<16x32xf32> to vector<16x1xf32>
    %c0_136 = arith.constant 0 : index
    %c960_137 = arith.constant 960 : index
    %470 = vector.load %arg12[%c0_136, %c960_137] : memref<16x1024xbf16, #tpu.memory_space<vmem>>, vector<16x32xbf16>
    %471 = arith.extf %470 : vector<16x32xbf16> to vector<16x32xf32>
    %472 = vector.broadcast %469 : vector<16x1xf32> to vector<16x32xf32>
    %473 = arith.mulf %472, %471 : vector<16x32xf32>
    %474 = arith.addf %468, %473 : vector<16x32xf32>
    %475 = vector.extract_strided_slice %289 {offsets = [0, 31], sizes = [16, 1], strides = [1, 1]} : vector<16x32xf32> to vector<16x1xf32>
    %c0_138 = arith.constant 0 : index
    %c992_139 = arith.constant 992 : index
    %476 = vector.load %arg12[%c0_138, %c992_139] : memref<16x1024xbf16, #tpu.memory_space<vmem>>, vector<16x32xbf16>
    %477 = arith.extf %476 : vector<16x32xbf16> to vector<16x32xf32>
    %478 = vector.broadcast %475 : vector<16x1xf32> to vector<16x32xf32>
    %479 = arith.mulf %478, %477 : vector<16x32xf32>
    %480 = arith.addf %474, %479 : vector<16x32xf32>
    %481 = arith.truncf %480 : vector<16x32xf32> to vector<16x32xbf16>
    %cst_140 = arith.constant dense<0.000000e+00> : vector<8x32xf32>
    %482 = tpu.matmul %43, %481, %cst_140 {dimension_numbers = #tpu.dot_dimension_numbers<[1], [0], [0], [1], [0, 0, 1, 1], [], []>} : vector<8x16xbf16>, vector<16x32xbf16>, vector<8x32xf32> -> vector<8x32xf32>
    %483 = arith.mulf %482, %51 : vector<8x32xf32>
    %484 = arith.addf %483, %54 : vector<8x32xf32>
    %cst_141 = arith.constant 0.000000e+00 : f32
    %485 = vector.broadcast %cst_141 : f32 to vector<8x32xf32>
    %486 = arith.maximumf %484, %485 : vector<8x32xf32>
    %487 = arith.truncf %486 : vector<8x32xf32> to vector<8x32xbf16>
    %cst_142 = arith.constant dense<0.000000e+00> : vector<8x128xf32>
    %488 = tpu.matmul %487, %58, %cst_142 {dimension_numbers = #tpu.dot_dimension_numbers<[1], [0], [0], [1], [0, 0, 1, 1], [], []>} : vector<8x32xbf16>, vector<32x128xbf16>, vector<8x128xf32> -> vector<8x128xf32>
    %489 = arith.truncf %285 : vector<8x32xf32> to vector<8x32xbf16>
    %cst_143 = arith.constant dense<0.000000e+00> : vector<8x128xf32>
    %490 = tpu.matmul %489, %59, %cst_143 {dimension_numbers = #tpu.dot_dimension_numbers<[1], [0], [0], [1], [0, 0, 1, 1], [], []>} : vector<8x32xbf16>, vector<32x128xbf16>, vector<8x128xf32> -> vector<8x128xf32>
    %491 = arith.addf %488, %490 : vector<8x128xf32>
    %492 = arith.addf %491, %57 : vector<8x128xf32>
    %493 = vector.extract_strided_slice %492 {offsets = [0, 0], sizes = [8, 64], strides = [1, 1]} : vector<8x128xf32> to vector<8x64xf32>
    %494 = arith.negf %493 : vector<8x64xf32>
    %495 = math.exp %494 : vector<8x64xf32>
    %cst_144 = arith.constant 1.000000e+00 : f32
    %496 = vector.broadcast %cst_144 : f32 to vector<8x64xf32>
    %497 = arith.addf %496, %495 : vector<8x64xf32>
    %498 = arith.divf %496, %497 : vector<8x64xf32>
    %499 = vector.extract_strided_slice %498 {offsets = [0, 0], sizes = [8, 32], strides = [1, 1]} : vector<8x64xf32> to vector<8x32xf32>
    %500 = vector.extract_strided_slice %498 {offsets = [0, 32], sizes = [8, 32], strides = [1, 1]} : vector<8x64xf32> to vector<8x32xf32>
    %501 = vector.extract_strided_slice %492 {offsets = [0, 64], sizes = [8, 32], strides = [1, 1]} : vector<8x128xf32> to vector<8x32xf32>
    %502 = vector.extract_strided_slice %492 {offsets = [0, 96], sizes = [8, 32], strides = [1, 1]} : vector<8x128xf32> to vector<8x32xf32>
    %503 = arith.mulf %499, %502 : vector<8x32xf32>
    %504 = arith.addf %501, %503 : vector<8x32xf32>
    %505 = math.tanh %504 : vector<8x32xf32>
    %cst_145 = arith.constant 1.000000e+00 : f32
    %506 = vector.broadcast %cst_145 : f32 to vector<8x32xf32>
    %507 = arith.subf %506, %500 : vector<8x32xf32>
    %508 = arith.mulf %507, %505 : vector<8x32xf32>
    %509 = arith.mulf %500, %285 : vector<8x32xf32>
    %510 = arith.addf %508, %509 : vector<8x32xf32>
    %511 = arith.addf %287, %510 : vector<8x32xf32>
    %512 = arith.addf %511, %0 : vector<8x32xf32>
    %cst_146 = arith.constant 0.333333343 : f32
    %513 = vector.broadcast %cst_146 : f32 to vector<8x32xf32>
    %514 = arith.mulf %512, %513 : vector<8x32xf32>
    %c0_147 = arith.constant 0 : index
    %c0_148 = arith.constant 0 : index
    %515 = vector.load %arg11[%c0_147, %c0_148] : memref<8x32xf32, #tpu.memory_space<vmem>>, vector<8x32xf32>
    tpu.vector_store %arg11[%c0_147, %c0_148], %514 {strides = array<i32>} : memref<8x32xf32, #tpu.memory_space<vmem>>, vector<8x32xf32>,
    return
  }
}

</mosaic_0001>

<bundles_post_ra>
// kernel: tpu_custom_call.1
= control target key start
LH: loop header
LB: loop body
LE: loop exit
PB: predicated region body
PF: predicated region fallthrough
CT: control target
= control target key end

     0   :  { %16 = vsyncpa [#allocation4], 0  ;;  %s5225_s0 = inlined_call_operand.hbm [shape: f32[8,32], index: 0, kind: input, shape index: {}]   ;;  %s5226_s1 = inlined_call_operand.vmem [shape: s32[16,1], index: 1, kind: input, shape index: {}]   ;;  %s5227_s2 = inlined_call_operand.hbm [shape: s32[1,16], index: 2, kind: input, shape index: {}]   ;;  %s5228_s3 = inlined_call_operand.hbm [shape: bf16[16,128], index: 3, kind: input, shape index: {}]   ;;  %s5229_s4 = inlined_call_operand.hbm [shape: bf16[128,1024], index: 4, kind: input, shape index: {}]   ;;  %s5230_s5 = inlined_call_operand.hbm [shape: f32[1,1024], index: 5, kind: input, shape index: {}]   ;;  %s5231_s6 = inlined_call_operand.hbm [shape: f32[1,1024], index: 6, kind: input, shape index: {}]   ;;  %s5232_s7 = inlined_call_operand.vmem [shape: f32[1,32], index: 7, kind: input, shape index: {}]   ;;  %s5233_s8 = inlined_call_operand.vmem [shape: bf16[32,128], index: 8, kind: input, shape index: {}]   ;;  %s5234_s9 = inlined_call_operand.vmem [shape: bf16[32,128], index: 9, kind: input, shape index: {}]   ;;  %s5235_s10 = inlined_call_operand.vmem [shape: f32[1,128], index: 10, kind: input, shape index: {}]   ;;  %s5236_s11 = inlined_call_operand.hbm [shape: f32[8,32], index: 11, kind: output, shape index: {}]  }
   0x1   :  { %17 = vsyncpa [#allocation7], 0 }
   0x2   :  { %18 = vsyncpa [#allocation10], 0 }
   0x3   :  { %19 = vsyncpa [#allocation13], 0 }
   0x4   :  { %20 = vsyncpa [#allocation5], 0  ;;  %s3922_s17 = smov [#allocation6]   ;;  %s3923_s19 = smov [#allocation9]  }
   0x5   :  { %s39_s18 = sshll.u32 %s3922_s17, 4  ;;  %s60_s20 = sshll.u32 %s3923_s19, 4  ;;  %s40_s18 = int_to_ptr.vmem [resolvable:$true] %s39_s18  ;;  %s4031_s20 = int_to_ptr.vmem [resolvable:$true] %s60_s20 }
   0x6   :  { %s3758_s23 = scalar_lea.hbm %s5227_s2, 16 }
   0x7   :  { %p3759_p0 = scmp.ne.s32.totalorder %s5227_s2, %s3758_s23  ;;  %p3762_p1 = scmp.lt.u32.totalorder %s3758_s23, %s5227_s2 }
   0x9   :  { %p3764_p2 = pnand %p3762_p1, %p3759_p0 }
   0xb   :  { %3767 = shalt.err (!%p3764_p2)
}
   0xc   :  { %s3768_s28 = scalar_lea.vmem %s40_s18, 16  ;;  %s3772_s29 = scalar_lea.vmem %s40_s18, 32 }
   0xd   :  { %p3769_p3 = scmp.ne.s32.totalorder %s40_s18, %s3768_s28  ;;  %p3773_p4 = scmp.lt.s32.totalorder %s40_s18, %s40_s18 }
   0xe   :  { %p3774_p5 = scmp.lt.s32.totalorder %s3772_s29, %s3768_s28 }
  0x10   :  { %p3775_p6 = por %p3774_p5, %p3773_p4 }
  0x12   :  { %p3776_p7 = pnand %p3775_p6, %p3769_p3 }
  0x14   :  { %3779 = shalt.err (!%p3776_p7)
}
  0x15   :  { %42 = dma.hbm_to_vmem [thread:$0]  %s5227_s2, 16, %s40_s18, [#allocation7]  }
  0x16   :  { %s3780_s15 = scalar_lea.hbm %s5229_s4, 8192 }
  0x17   :  { %p3781_p8 = scmp.ne.s32.totalorder %s5229_s4, %s3780_s15  ;;  %p3784_p9 = scmp.lt.u32.totalorder %s3780_s15, %s5229_s4 }
  0x19   :  { %p3786_p10 = pnand %p3784_p9, %p3781_p8 }
  0x1b   :  { %3789 = shalt.err (!%p3786_p10)
}
  0x1c   :  { %s3790_s22 = scalar_lea.vmem %s4031_s20, 8192  ;;  %p3795_p12 = scmp.lt.s32.totalorder %s4031_s20, %s4031_s20 }
  0x1d   :  { %p3791_p11 = scmp.ne.s32.totalorder %s4031_s20, %s3790_s22  ;;  %p3796_p13 = scmp.lt.s32.totalorder %s3790_s22, %s3790_s22 }
  0x1f   :  { %p3797_p0 = por %p3796_p13, %p3795_p12 }
  0x21   :  { %p3798_p1 = pnand %p3797_p0, %p3791_p11 }
  0x23   :  { %3801 = shalt.err (!%p3798_p1)
}
  0x24   :  { %s3924_s2 = smov 512   ;;  %s3925_s18 = smov 32  }
  0x25   :  { %66 = dma.hbm_to_vmem [thread:$0]  %s5229_s4, 8192, %s4031_s20, [#allocation10], %s3924_s2, %s3924_s2, %s3925_s18  }
  0x26   :  { %s3926_s25 = smov [#allocation3]   ;;  %s3927_s27 = smov [#allocation8]  }
  0x27   :  { %s27_s26 = sshll.u32 %s3926_s25, 4  ;;  %s48_s28 = sshll.u32 %s3927_s27, 4  ;;  %s28_s26 = int_to_ptr.vmem [resolvable:$true] %s27_s26  ;;  %s4063_s28 = int_to_ptr.vmem [resolvable:$true] %s48_s28 }
  0x28   :  { %s3802_s12 = scalar_lea.hbm %s5225_s0, 128 }
  0x29   :  { %p3803_p2 = scmp.ne.s32.totalorder %s5225_s0, %s3802_s12  ;;  %p3806_p3 = scmp.lt.u32.totalorder %s3802_s12, %s5225_s0 }
  0x2b   :  { %p3808_p4 = pnand %p3806_p3, %p3803_p2 }
  0x2d   :  { %3811 = shalt.err (!%p3808_p4)
}
  0x2e   :  { %s3812_s4 = scalar_lea.vmem %s28_s26, 128  ;;  %p3817_p6 = scmp.lt.s32.totalorder %s28_s26, %s28_s26 }
  0x2f   :  { %p3813_p5 = scmp.ne.s32.totalorder %s28_s26, %s3812_s4  ;;  %p3818_p7 = scmp.lt.s32.totalorder %s3812_s4, %s3812_s4 }
  0x31   :  { %p3819_p8 = por %p3818_p7, %p3817_p6 }
  0x33   :  { %p3820_p9 = pnand %p3819_p8, %p3813_p5 }
  0x35   :  { %3823 = shalt.err (!%p3820_p9)
}
  0x36   :  { %30 = dma.hbm_to_vmem [thread:$0]  %s5225_s0, 128, %s28_s26, [#allocation4]  }
  0x37   :  { %s3824_s22 = scalar_lea.hbm %s5228_s3, 128 }
  0x38   :  { %p3825_p10 = scmp.ne.s32.totalorder %s5228_s3, %s3824_s22  ;;  %p3828_p11 = scmp.lt.u32.totalorder %s3824_s22, %s5228_s3 }
  0x3a   :  { %p3830_p12 = pnand %p3828_p11, %p3825_p10 }
  0x3c   :  { %3833 = shalt.err (!%p3830_p12)
}
  0x3d   :  { %s3834_s27 = scalar_lea.vmem %s4063_s28, 128  ;;  %p3839_p0 = scmp.lt.s32.totalorder %s4063_s28, %s4063_s28 }
  0x3e   :  { %p3835_p13 = scmp.ne.s32.totalorder %s4063_s28, %s3834_s27  ;;  %p3840_p1 = scmp.lt.s32.totalorder %s3834_s27, %s3834_s27 }
  0x40   :  { %p3841_p2 = por %p3840_p1, %p3839_p0 }
  0x42   :  { %p3842_p3 = pnand %p3841_p2, %p3835_p13 }
  0x44   :  { %3845 = shalt.err (!%p3842_p3)
}
  0x45   :  { %s3928_s0 = smov 64   ;;  %s3929_s26 = smov 4  }
  0x46   :  { %54 = dma.hbm_to_vmem [thread:$0]  %s5228_s3, 128, %s4063_s28, [#allocation7], %s3928_s0, %s3928_s0, %s3929_s26  }
  0x47   :  { %s3930_s12 = smov [#allocation11]   ;;  %s3931_s14 = smov [#allocation12]  }
  0x48   :  { %s73_s13 = sshll.u32 %s3930_s12, 4  ;;  %s83_s15 = sshll.u32 %s3931_s14, 4  ;;  %s74_s13 = int_to_ptr.vmem [resolvable:$true] %s73_s13  ;;  %s84_s15 = int_to_ptr.vmem [resolvable:$true] %s83_s15 }
  0x49   :  { %s3846_s20 = scalar_lea.hbm %s5230_s5, 128 }
  0x4a   :  { %p3847_p4 = scmp.ne.s32.totalorder %s5230_s5, %s3846_s20  ;;  %p3850_p5 = scmp.lt.u32.totalorder %s3846_s20, %s5230_s5 }
  0x4c   :  { %p3852_p6 = pnand %p3850_p5, %p3847_p4 }
  0x4e   :  { %3855 = shalt.err (!%p3852_p6)
}
  0x4f   :  { %s3856_s3 = scalar_lea.vmem %s74_s13, 128  ;;  %p3861_p8 = scmp.lt.s32.totalorder %s74_s13, %s74_s13 }
  0x50   :  { %p3857_p7 = scmp.ne.s32.totalorder %s74_s13, %s3856_s3  ;;  %p3862_p9 = scmp.lt.s32.totalorder %s3856_s3, %s3856_s3 }
  0x52   :  { %p3863_p10 = por %p3862_p9, %p3861_p8 }
  0x54   :  { %p3864_p11 = pnand %p3863_p10, %p3857_p7 }
  0x56   :  { %3867 = shalt.err (!%p3864_p11)
}
  0x57   :  { %76 = dma.hbm_to_vmem [thread:$0]  %s5230_s5, 128, %s74_s13, [#allocation10]  }
  0x58   :  { %s3868_s25 = scalar_lea.hbm %s5231_s6, 128 }
  0x59   :  { %p3869_p12 = scmp.ne.s32.totalorder %s5231_s6, %s3868_s25  ;;  %p3872_p13 = scmp.lt.u32.totalorder %s3868_s25, %s5231_s6 }
  0x5b   :  { %p3874_p0 = pnand %p3872_p13, %p3869_p12 }
  0x5d   :  { %3877 = shalt.err (!%p3874_p0)
}
  0x5e   :  { %s3878_s12 = scalar_lea.vmem %s84_s15, 128  ;;  %p3883_p2 = scmp.lt.s32.totalorder %s84_s15, %s84_s15 }
  0x5f   :  { %p3879_p1 = scmp.ne.s32.totalorder %s84_s15, %s3878_s12  ;;  %p3884_p3 = scmp.lt.s32.totalorder %s3878_s12, %s3878_s12 }
  0x61   :  { %p3885_p4 = por %p3884_p3, %p3883_p2 }
  0x63   :  { %p3886_p5 = pnand %p3885_p4, %p3879_p1 }
  0x65   :  { %3889 = shalt.err (!%p3886_p5)
}
  0x66   :  { %86 = dma.hbm_to_vmem [thread:$0]  %s5231_s6, 128, %s84_s15, [#allocation13]  }
  0x67   :  { %3912 = dma.done.wait [#allocation4], 128  }
  0x68   :  { %3913 = vsyncadd [#allocation4], 4294967168 }
  0x69   :  { %3914 = dma.done.wait [#allocation7], 144  }
  0x6a   :  { %3915 = vsyncadd [#allocation7], 4294967152 }
  0x6b   :  { %3916 = dma.done.wait [#allocation10], 8320  }
  0x6c   :  { %3917 = vsyncadd [#allocation10], 4294958976 }
  0x6d   :  { %3918 = dma.done.wait [#allocation13], 128  }
  0x6e   :  { %3919 = vsyncadd [#allocation13], 4294967168  ;;  %v5282_v0 = vmov 0   ;;  %v121_v1 = vld [vmem:[#allocation9] sm:$0xff]  ;;  %v122_v3 = vld [vmem:[#allocation9 + $0x8] sm:$0xff]  ;;  %vm683_vm0 = vcmask 130048  }
  0x6f   :  { %543 = vmatprep.mubr.bf16.mxu0 %v5282_v0  ;;  %586 = vmatprep.mubr.bf16.mxu1 %v5282_v0  ;;  %v125_v2 = vld [vmem:[#allocation9 + $0x20] sm:$0xff]  ;;  %v126_v5 = vld [vmem:[#allocation9 + $0x28] sm:$0xff]  ;;  %v117_v60 = vld [vmem:[%s5226_s1 + $0x8] sm:$0xff]  ;;  %vm1690_vm1 = vcmask 1043456   ;;  %vm3935_vm4 = vmmov 0   ;;  %vm1686_vm5 = vcmask 64512  }
  0x70   :  { %3591 = vset.pattern.permute.xlu0 %v5282_v0  ;;  %v3334_v4 = vcombine.high %v121_v1, %v125_v2  ;;  %v3333_v6 = vcombine.low %v121_v1, %v125_v2  ;;  %v129_v7 = vld [vmem:[#allocation9 + $0x40] sm:$0xff]  ;;  %v3336_v9 = vcombine.high %v122_v3, %v126_v5  ;;  %v3335_v10 = vcombine.low %v122_v3, %v126_v5  ;;  %v130_v12 = vld [vmem:[#allocation9 + $0x48] sm:$0xff]  ;;  %v123_v2 = vld [vmem:[#allocation9 + $0x10] sm:$0xff] }
  0x71   :  { %v133_v8 = vld [vmem:[#allocation9 + $0x60] sm:$0xff]  ;;  %v134_v13 = vld [vmem:[#allocation9 + $0x68] sm:$0xff]  ;;  %v127_v3 = vld [vmem:[#allocation9 + $0x30] sm:$0xff]  ;;  %vm2392_vm7 = vcmask 261120  }
  0x72   :  { %v3342_v11 = vcombine.high %v129_v7, %v133_v8  ;;  %v137_v14 = vld [vmem:[#allocation9 + $0x80] sm:$0xff]  ;;  %511 = vmatprep.subr.bf16.mxu0 %v3334_v4  ;;  %v3344_v15 = vcombine.high %v130_v12, %v134_v13  ;;  %v138_v17 = vld [vmem:[#allocation9 + $0x88] sm:$0xff]  ;;  %554 = vmatprep.subr.bf16.mxu1 %v3336_v9  ;;  %v3341_v19 = vcombine.low %v129_v7, %v133_v8  ;;  %v124_v4 = vld [vmem:[#allocation9 + $0x18] sm:$0xff] }
  0x73   :  { %v141_v16 = vld [vmem:[#allocation9 + $0xa0] sm:$0xff]  ;;  %v142_v18 = vld [vmem:[#allocation9 + $0xa8] sm:$0xff]  ;;  %512 = vmatpush1.bf16.msra.mxu0 %v3333_v6  ;;  %555 = vmatpush1.bf16.msra.mxu1 %v3335_v10  ;;  %v3343_v20 = vcombine.low %v130_v12, %v134_v13  ;;  %v128_v5 = vld [vmem:[#allocation9 + $0x38] sm:$0xff]  ;;  %v3338_v8 = vcombine.high %v123_v2, %v127_v3 }
  0x74   :  { %513 = vmatprep.subr.bf16.mxu0 %v3342_v11  ;;  %v3350_v21 = vcombine.high %v137_v14, %v141_v16  ;;  %556 = vmatprep.subr.bf16.mxu1 %v3344_v15  ;;  %v3352_v22 = vcombine.high %v138_v17, %v142_v18  ;;  %v145_v23 = vld [vmem:[#allocation9 + $0xc0] sm:$0xff]  ;;  %v146_v25 = vld [vmem:[#allocation9 + $0xc8] sm:$0xff]  ;;  %v3349_v27 = vcombine.low %v137_v14, %v141_v16  ;;  %v131_v10 = vld [vmem:[#allocation9 + $0x50] sm:$0xff] }
  0x75   :  { %v149_v24 = vld [vmem:[#allocation9 + $0xe0] sm:$0xff]  ;;  %v150_v26 = vld [vmem:[#allocation9 + $0xe8] sm:$0xff]  ;;  %v3351_v28 = vcombine.low %v138_v17, %v142_v18  ;;  %v3340_v9 = vcombine.high %v124_v4, %v128_v5  ;;  %v135_v11 = vld [vmem:[#allocation9 + $0x70] sm:$0xff]  ;;  %v3337_v15 = vcombine.low %v123_v2, %v127_v3  ;;  %v3339_v16 = vcombine.low %v124_v4, %v128_v5 }
  0x76   :  { %v3358_v29 = vcombine.high %v145_v23, %v149_v24  ;;  %v3360_v30 = vcombine.high %v146_v25, %v150_v26  ;;  %v153_v31 = vld [vmem:[#allocation9 + $0x100] sm:$0xff]  ;;  %v154_v33 = vld [vmem:[#allocation9 + $0x108] sm:$0xff]  ;;  %v3357_v35 = vcombine.low %v145_v23, %v149_v24  ;;  %v3359_v36 = vcombine.low %v146_v25, %v150_v26  ;;  %v4129_v12 = vld [vmem:[#allocation8] sm:$0xff]  }
  0x77   :  { %514 = vmatpush1.bf16.msra.mxu0 %v3341_v19  ;;  %557 = vmatpush1.bf16.msra.mxu1 %v3343_v20  ;;  %v157_v32 = vld [vmem:[#allocation9 + $0x120] sm:$0xff]  ;;  %v158_v34 = vld [vmem:[#allocation9 + $0x128] sm:$0xff]  ;;  %v132_v13 = vld [vmem:[#allocation9 + $0x58] sm:$0xff]  ;;  %v3346_v17 = vcombine.high %v131_v10, %v135_v11  ;;  %v3345_v23 = vcombine.low %v131_v10, %v135_v11 }
  0x78   :  { %515 = vmatprep.subr.bf16.mxu0 %v3350_v21  ;;  %558 = vmatprep.subr.bf16.mxu1 %v3352_v22  ;;  %v3366_v37 = vcombine.high %v153_v31, %v157_v32  ;;  %v3368_v38 = vcombine.high %v154_v33, %v158_v34  ;;  %v161_v39 = vld [vmem:[#allocation9 + $0x140] sm:$0xff]  ;;  %v162_v41 = vld [vmem:[#allocation9 + $0x148] sm:$0xff]  ;;  %v3365_v43 = vcombine.low %v153_v31, %v157_v32  ;;  %v136_v14 = vld [vmem:[#allocation9 + $0x78] sm:$0xff] }
  0x79   :  { %v165_v40 = vld [vmem:[#allocation9 + $0x160] sm:$0xff]  ;;  %v166_v42 = vld [vmem:[#allocation9 + $0x168] sm:$0xff]  ;;  %v3367_v44 = vcombine.low %v154_v33, %v158_v34  ;;  %v3348_v18 = vcombine.high %v132_v13, %v136_v14  ;;  %v139_v19 = vld [vmem:[#allocation9 + $0x90] sm:$0xff]  ;;  %v3347_v24 = vcombine.low %v132_v13, %v136_v14 }
  0x7a   :  { %v3374_v45 = vcombine.high %v161_v39, %v165_v40  ;;  %v3376_v46 = vcombine.high %v162_v41, %v166_v42  ;;  %v169_v47 = vld [vmem:[#allocation9 + $0x180] sm:$0xff]  ;;  %v170_v49 = vld [vmem:[#allocation9 + $0x188] sm:$0xff]  ;;  %v3373_v51 = vcombine.low %v161_v39, %v165_v40  ;;  %v3375_v52 = vcombine.low %v162_v41, %v166_v42  ;;  %v143_v20 = vld [vmem:[#allocation9 + $0xb0] sm:$0xff] }
  0x7b   :  { %516 = vmatpush1.bf16.msra.mxu0 %v3349_v27  ;;  %559 = vmatpush1.bf16.msra.mxu1 %v3351_v28  ;;  %v173_v48 = vld [vmem:[#allocation9 + $0x1a0] sm:$0xff]  ;;  %v174_v50 = vld [vmem:[#allocation9 + $0x1a8] sm:$0xff]  ;;  %v140_v21 = vld [vmem:[#allocation9 + $0x98] sm:$0xff]  ;;  %v3354_v25 = vcombine.high %v139_v19, %v143_v20  ;;  %v3353_v31 = vcombine.low %v139_v19, %v143_v20 }
  0x7c   :  { %517 = vmatprep.subr.bf16.mxu0 %v3358_v29  ;;  %560 = vmatprep.subr.bf16.mxu1 %v3360_v30  ;;  %v3382_v53 = vcombine.high %v169_v47, %v173_v48  ;;  %v177_v54 = vld [vmem:[#allocation9 + $0x1c0] sm:$0xff]  ;;  %v178_v56 = vld [vmem:[#allocation9 + $0x1c8] sm:$0xff]  ;;  %v3384_v57 = vcombine.high %v170_v49, %v174_v50  ;;  %v3381_v61 = vcombine.low %v169_v47, %v173_v48  ;;  %v144_v22 = vld [vmem:[#allocation9 + $0xb8] sm:$0xff] }
  0x7d   :  { %v181_v55 = vld [vmem:[#allocation9 + $0x1e0] sm:$0xff]  ;;  %v182_v58 = vld [vmem:[#allocation9 + $0x1e8] sm:$0xff]  ;;  %v3383_v62 = vcombine.low %v170_v49, %v174_v50  ;;  %v3356_v26 = vcombine.high %v140_v21, %v144_v22  ;;  %v147_v27 = vld [vmem:[#allocation9 + $0xd0] sm:$0xff]  ;;  %v3355_v32 = vcombine.low %v140_v21, %v144_v22 }
  0x7e   :  { %v116_v59 = vld [vmem:[%s5226_s1] sm:$0xff]  ;;  %v3390_v63 = vcombine.high %v177_v54, %v181_v55  ;;  %v3392_v1 = vcombine.high %v178_v56, %v182_v58  ;;  %v3389_v6 = vcombine.low %v177_v54, %v181_v55  ;;  %v3391_v7 = vcombine.low %v178_v56, %v182_v58  ;;  %v148_v29 = vld [vmem:[#allocation9 + $0xd8] sm:$0xff]  ;;  %s3969_s1 = smov 96  }
  0x7f   :  { %518 = vmatpush1.bf16.msra.mxu0 %v3357_v35  ;;  %561 = vmatpush1.bf16.msra.mxu1 %v3359_v36  ;;  %v151_v28 = vld [vmem:[#allocation9 + $0xf0] sm:$0xff]  ;;  %v152_v30 = vld [vmem:[#allocation9 + $0xf8] sm:$0xff] }
  0x80   :  { %519 = vmatprep.subr.bf16.mxu0 %v3366_v37  ;;  %562 = vmatprep.subr.bf16.mxu1 %v3368_v38  ;;  %v3362_v33 = vcombine.high %v147_v27, %v151_v28  ;;  %v3364_v34 = vcombine.high %v148_v29, %v152_v30  ;;  %v155_v35 = vld [vmem:[#allocation9 + $0x110] sm:$0xff]  ;;  %v156_v37 = vld [vmem:[#allocation9 + $0x118] sm:$0xff]  ;;  %v3361_v39 = vcombine.low %v147_v27, %v151_v28 }
  0x81   :  { %1588 = vperm.xlu0 %3591, %v116_v59   ;;  %v159_v36 = vld [vmem:[#allocation9 + $0x130] sm:$0xff]  ;;  %v160_v38 = vld [vmem:[#allocation9 + $0x138] sm:$0xff]  ;;  %v3363_v40 = vcombine.low %v148_v29, %v152_v30 }
  0x82   :  { %v3370_v41 = vcombine.high %v155_v35, %v159_v36  ;;  %v3372_v42 = vcombine.high %v156_v37, %v160_v38  ;;  %v3369_v47 = vcombine.low %v155_v35, %v159_v36  ;;  %v3371_v48 = vcombine.low %v156_v37, %v160_v38  ;;  %v176_v54 = vld [vmem:[#allocation9 + $0x1b8] sm:$0xff]  ;;  %v179_v59 = vld [vmem:[#allocation9 + $0x1d0] sm:$0xff] }
  0x83   :  { %520 = vmatpush1.bf16.msra.mxu0 %v3365_v43  ;;  %563 = vmatpush1.bf16.msra.mxu1 %v3367_v44  ;;  %v163_v43 = vld [vmem:[#allocation9 + $0x150] sm:$0xff] }
  0x84   :  { %521 = vmatprep.subr.bf16.mxu0 %v3374_v45  ;;  %564 = vmatprep.subr.bf16.mxu1 %v3376_v46  ;;  %v167_v44 = vld [vmem:[#allocation9 + $0x170] sm:$0xff]  ;;  %v164_v45 = vld [vmem:[#allocation9 + $0x158] sm:$0xff] }
  0x85   :  { %1591 = vperm.xlu0 %3591, %v117_v60   ;;  %v168_v46 = vld [vmem:[#allocation9 + $0x178] sm:$0xff]  ;;  %v3378_v49 = vcombine.high %v163_v43, %v167_v44  ;;  %v3377_v55 = vcombine.low %v163_v43, %v167_v44  ;;  %v183_v60 = vld [vmem:[#allocation9 + $0x1f0] sm:$0xff] }
  0x86   :  { %v3380_v50 = vcombine.high %v164_v45, %v168_v46  ;;  %v3379_v56 = vcombine.low %v164_v45, %v168_v46  ;;  %v3394_v2 = vcombine.high %v179_v59, %v183_v60  ;;  %v3393_v4 = vcombine.low %v179_v59, %v183_v60 }
  0x87   :  { %522 = vmatpush1.bf16.msra.mxu0 %v3373_v51  ;;  %565 = vmatpush1.bf16.msra.mxu1 %v3375_v52  ;;  %v171_v51 = vld [vmem:[#allocation9 + $0x190] sm:$0xff] }
  0x88   :  { %523 = vmatprep.subr.bf16.mxu0 %v3382_v53  ;;  %566 = vmatprep.subr.bf16.mxu1 %v3384_v57  ;;  %v175_v52 = vld [vmem:[#allocation9 + $0x1b0] sm:$0xff]  ;;  %v172_v53 = vld [vmem:[#allocation9 + $0x198] sm:$0xff] }
  0x89   :  { %v3386_v57 = vcombine.high %v171_v51, %v175_v52  ;;  %v3388_v58 = vcombine.high %v172_v53, %v176_v54 }
  0x8b   :  { %524 = vmatpush1.bf16.msra.mxu0 %v3381_v61  ;;  %567 = vmatpush1.bf16.msra.mxu1 %v3383_v62  ;;  %v180_v61 = vld [vmem:[#allocation9 + $0x1d8] sm:$0xff] }
  0x8c   :  { %525 = vmatprep.subr.bf16.mxu0 %v3390_v63  ;;  %568 = vmatprep.subr.bf16.mxu1 %v3392_v1  ;;  %v184_v62 = vld [vmem:[#allocation9 + $0x1f8] sm:$0xff]  ;;  %v3385_v63 = vcombine.low %v171_v51, %v175_v52  ;;  %v3387_v1 = vcombine.low %v172_v53, %v176_v54 }
  0x8d   :  { %v3396_v3 = vcombine.high %v180_v61, %v184_v62  ;;  %v3395_v5 = vcombine.low %v180_v61, %v184_v62 }
  0x8f   :  { %526 = vmatpush1.bf16.msra.mxu0 %v3389_v6  ;;  %569 = vmatpush1.bf16.msra.mxu1 %v3391_v7  ;;  %v5237_v6 = vmov 0.0  }
  0x90   :  { %597 = vmatprep.subr.bf16.mxu0 %v3338_v8  ;;  %640 = vmatprep.subr.bf16.mxu1 %v3340_v9 }
  0x92   :  { %544 = vmatmul.mubr.bf16.vlgmr.msra.gmra.mrb[0].mxu0 %v4129_v12  ;;  %587 = vmatmul.mubr.bf16.vlgmr.msra.gmra.mrb[0].mxu1 %v4129_v12 }
  0x93   :  { %598 = vmatpush1.bf16.msra.mxu0 %v3337_v15  ;;  %641 = vmatpush1.bf16.msra.mxu1 %v3339_v16 }
  0x94   :  { %599 = vmatprep.subr.bf16.mxu0 %v3346_v17  ;;  %642 = vmatprep.subr.bf16.mxu1 %v3348_v18 }
  0x95   :  { %629 = vmatprep.mubr.bf16.mxu0 %v5282_v0  ;;  %672 = vmatprep.mubr.bf16.mxu1 %v5282_v0 }
  0x97   :  { %600 = vmatpush1.bf16.msra.mxu0 %v3345_v23  ;;  %643 = vmatpush1.bf16.msra.mxu1 %v3347_v24 }
  0x98   :  { %601 = vmatprep.subr.bf16.mxu0 %v3354_v25  ;;  %644 = vmatprep.subr.bf16.mxu1 %v3356_v26 }
  0x9b   :  { %602 = vmatpush1.bf16.msra.mxu0 %v3353_v31  ;;  %645 = vmatpush1.bf16.msra.mxu1 %v3355_v32  ;;  %v3934_v31 = vmov 1.0  }
  0x9c   :  { %603 = vmatprep.subr.bf16.mxu0 %v3362_v33  ;;  %646 = vmatprep.subr.bf16.mxu1 %v3364_v34 }
  0x9f   :  { %604 = vmatpush1.bf16.msra.mxu0 %v3361_v39  ;;  %647 = vmatpush1.bf16.msra.mxu1 %v3363_v40 }
  0xa0   :  { %605 = vmatprep.subr.bf16.mxu0 %v3370_v41  ;;  %648 = vmatprep.subr.bf16.mxu1 %v3372_v42 }
  0xa3   :  { %606 = vmatpush1.bf16.msra.mxu0 %v3369_v47  ;;  %649 = vmatpush1.bf16.msra.mxu1 %v3371_v48 }
  0xa4   :  { %607 = vmatprep.subr.bf16.mxu0 %v3378_v49  ;;  %650 = vmatprep.subr.bf16.mxu1 %v3380_v50 }
  0xa7   :  { %608 = vmatpush1.bf16.msra.mxu0 %v3377_v55  ;;  %651 = vmatpush1.bf16.msra.mxu1 %v3379_v56  ;;  %v1343_v56 = vlaneseq }
  0xa8   :  { %609 = vmatprep.subr.bf16.mxu0 %v3386_v57  ;;  %652 = vmatprep.subr.bf16.mxu1 %v3388_v58  ;;  %v115_v58 = vld [vmem:[#allocation3] sm:$0xff] }
  0xa9   :  { %v1586_v59 = vand.u32 127, %v1343_v56  ;;  %v4238_v61 = vpack.c.bf16 %v115_v58, %v115_v58 }
  0xab   :  { %610 = vmatpush1.bf16.msra.mxu0 %v3385_v63  ;;  %653 = vmatpush1.bf16.msra.mxu1 %v3387_v1  ;;  %v1692_v62 = vsel %vm1690_vm1, %v4238_v61, 0 }
  0xac   :  { %611 = vmatprep.subr.bf16.mxu0 %v3394_v2  ;;  %654 = vmatprep.subr.bf16.mxu1 %v3396_v3  ;;  %v5300_v3 = vmov 1  }
  0xad   :  { %3592 = vset.pattern.permute.xlu1 %v5300_v3 }
  0xaf   :  { %612 = vmatpush1.bf16.msra.mxu0 %v3393_v4  ;;  %655 = vmatpush1.bf16.msra.mxu1 %v3395_v5  ;;  %v5296_v4 = vmov 2  }
  0xb0   :  { %3593 = vset.pattern.permute.xlu0 %v5296_v4 }
  0xb2   :  { %630 = vmatmul.mubr.bf16.vlgmr.msra.gmra.mrb[4].mxu0 %v4129_v12  ;;  %673 = vmatmul.mubr.bf16.vlgmr.msra.gmra.mrb[4].mxu1 %v4129_v12 }
  0xb3   :  { %751 = vmatprep.mubr.f32.mxu1 %v5237_v6  ;;  %893 = vmatprep.mubr.f32.mxu0 %v5237_v6 }
 0x100   :  { %v1589_v54 = vpop.permute.xlu0 %1588 }
 0x101   :  { %vm1593_vm2 = vcmp.eq.s32.totalorder %v1589_v54, %v1586_v59 }
 0x102   :  { %v3405_v63 = vsel %vm1593_vm2, 1.0, %v5237_v6 }
 0x104   :  { %v1592_v60 = vpop.permute.xlu0 %1591 }
 0x105   :  { %vm1594_vm3 = vcmp.eq.s32.totalorder %v1592_v60, %v1586_v59 }
 0x106   :  { %v3406_v1 = vsel %vm1594_vm3, 1.0, %v5237_v6 }
 0x107   :  { %v4260_v2 = vpack.c.bf16 %v3406_v1, %v3405_v63 }
 0x165   :  { %v4139_v7 = vpop.f32.mrb[0].mxu0  ;;  %v4145_v9 = vpop.f32.mrb[0].mxu1 }
 0x166   :  { %v4143_v8 = vmul.f32 %v4139_v7, %v4139_v7  ;;  %v4147_v10 = vpop.f32.mrb[1].mxu0  ;;  %v4151_v11 = vmul.f32 %v4145_v9, %v4145_v9  ;;  %v4155_v13 = vpop.f32.mrb[1].mxu1 }
 0x167   :  { %v980_v12 = vmul.f32 %v4147_v10, %v4147_v10  ;;  %v4157_v14 = vpop.f32.mrb[2].mxu0  ;;  %v4163_v17 = vpop.f32.mrb[2].mxu1  ;;  %v982_v24 = vmul.f32 %v4155_v13, %v4155_v13 }
 0x168   :  { %v3512_v15 = vpack.c.bf16 %v4157_v14, %v4139_v7  ;;  %v987_v16 = vmul.f32 %v4157_v14, %v4157_v14  ;;  %v4165_v18 = vpop.f32.mrb[3].mxu0  ;;  %v3516_v19 = vpack.c.bf16 %v4163_v17, %v4145_v9  ;;  %v989_v20 = vmul.f32 %v4163_v17, %v4163_v17  ;;  %v4175_v23 = vpop.f32.mrb[3].mxu1 }
 0x169   :  { %v3510_v21 = vpack.c.bf16 %v4165_v18, %v4147_v10  ;;  %v988_v22 = vmul.f32 %v4165_v18, %v4165_v18  ;;  %v3514_v26 = vpack.c.bf16 %v4175_v23, %v4155_v13  ;;  %v990_v27 = vmul.f32 %v4175_v23, %v4175_v23 }
 0x16a   :  { %v3528_v25 = vpack.c.bf16 %v987_v16, %v4143_v8  ;;  %v3532_v28 = vpack.c.bf16 %v989_v20, %v4151_v11 }
 0x16b   :  { %3511 = vmatprep.subr.bf16.mxu1 %v3510_v21  ;;  %v3526_v29 = vpack.c.bf16 %v988_v22, %v980_v12  ;;  %v3530_v30 = vpack.c.bf16 %v990_v27, %v982_v24 }
 0x16c   :  { %3513 = vmatpush1.bf16.msra.mxu1 %v3512_v15 }
 0x16d   :  { %3515 = vmatprep.subr.bf16.mxu1 %v3514_v26 }
 0x16f   :  { %3397 = vmatmul.mubr.msk.f32.vlgmr.msra.gmra.mrb[8].mxu1 %vm683_vm0, %v3934_v31 }
 0x170   :  { %3517 = vmatpush1.bf16.msra.mxu1 %v3516_v19  ;;  %822 = vmatprep.mubr.f32.mxu1 %v5237_v6 }
 0x173   :  { %3398 = vmatmul.mubr.msk.f32.vlgmr.msra.gmra.mrb[10].mxu1 %vm683_vm0, %v3934_v31 }
 0x174   :  { %964 = vmatprep.mubr.f32.mxu1 %v5237_v6 }
 0x185   :  { %v4191_v32 = vpop.f32.mrb[4].mxu0  ;;  %v4195_v34 = vpop.f32.mrb[4].mxu1 }
 0x186   :  { %v983_v33 = vmul.f32 %v4191_v32, %v4191_v32  ;;  %v4197_v35 = vpop.f32.mrb[5].mxu0  ;;  %v4201_v37 = vpop.f32.mrb[5].mxu1  ;;  %v985_v39 = vmul.f32 %v4195_v34, %v4195_v34 }
 0x187   :  { %v984_v36 = vmul.f32 %v4197_v35, %v4197_v35  ;;  %v4203_v38 = vpop.f32.mrb[6].mxu0  ;;  %v4211_v42 = vpop.f32.mrb[6].mxu1  ;;  %v986_v49 = vmul.f32 %v4201_v37, %v4201_v37 }
 0x188   :  { %v3520_v40 = vpack.c.bf16 %v4203_v38, %v4191_v32  ;;  %v991_v41 = vmul.f32 %v4203_v38, %v4203_v38  ;;  %v4213_v43 = vpop.f32.mrb[7].mxu0  ;;  %v3524_v44 = vpack.c.bf16 %v4211_v42, %v4195_v34  ;;  %v993_v45 = vmul.f32 %v4211_v42, %v4211_v42  ;;  %v4223_v48 = vpop.f32.mrb[7].mxu1 }
 0x189   :  { %v3518_v46 = vpack.c.bf16 %v4213_v43, %v4197_v35  ;;  %v992_v47 = vmul.f32 %v4213_v43, %v4213_v43  ;;  %v3522_v51 = vpack.c.bf16 %v4223_v48, %v4201_v37  ;;  %v994_v52 = vmul.f32 %v4223_v48, %v4223_v48 }
 0x18a   :  { %v3536_v50 = vpack.c.bf16 %v991_v41, %v983_v33  ;;  %v3540_v53 = vpack.c.bf16 %v993_v45, %v985_v39 }
 0x18b   :  { %3519 = vmatprep.subr.bf16.mxu0 %v3518_v46  ;;  %v3534_v55 = vpack.c.bf16 %v992_v47, %v984_v36  ;;  %3523 = vmatprep.subr.bf16.mxu1 %v3522_v51  ;;  %v3538_v57 = vpack.c.bf16 %v994_v52, %v986_v49 }
 0x18c   :  { %3521 = vmatpush1.bf16.msra.mxu0 %v3520_v40  ;;  %3525 = vmatpush1.bf16.msra.mxu1 %v3524_v44 }
 0x18d   :  { %3527 = vmatprep.subr.bf16.mxu0 %v3526_v29  ;;  %3531 = vmatprep.subr.bf16.mxu1 %v3530_v30 }
 0x18f   :  { %3399 = vmatmul.mubr.msk.f32.vlgmr.msra.gmra.mrb[8].mxu0 %vm683_vm0, %v3934_v31  ;;  %3400 = vmatmul.mubr.msk.f32.vlgmr.msra.gmra.mrb[12].mxu1 %vm683_vm0, %v3934_v31 }
 0x190   :  { %3529 = vmatpush1.bf16.msra.mxu0 %v3528_v25  ;;  %3533 = vmatpush1.bf16.msra.mxu1 %v3532_v28 }
 0x191   :  { %1059 = vmatprep.mubr.f32.mxu0 %v5237_v6  ;;  %3539 = vmatprep.subr.bf16.mxu1 %v3538_v57 }
 0x192   :  { %1130 = vmatprep.mubr.f32.mxu1 %v5237_v6  ;;  %3535 = vmatprep.subr.bf16.mxu0 %v3534_v55 }
 0x193   :  { %3401 = vmatmul.mubr.msk.f32.vlgmr.msra.gmra.mrb[10].mxu0 %vm683_vm0, %v3934_v31  ;;  %3402 = vmatmul.mubr.msk.f32.vlgmr.msra.gmra.mrb[14].mxu1 %vm683_vm0, %v3934_v31 }
 0x194   :  { %3537 = vmatpush1.bf16.msra.mxu0 %v3536_v50  ;;  %3541 = vmatpush1.bf16.msra.mxu1 %v3540_v53 }
 0x195   :  { %1201 = vmatprep.mubr.f32.mxu0 %v5237_v6  ;;  %1272 = vmatprep.mubr.f32.mxu1 %v5237_v6 }
 0x196   :  { %3454 = vmatprep.subr.bf16.mxu1 %v5237_v6  ;;  %3448 = vmatprep.subr.bf16.mxu0 %v5237_v6 }
 0x197   :  { %3403 = vmatmul.mubr.msk.f32.vlgmr.msra.gmra.mrb[12].mxu0 %vm683_vm0, %v3934_v31  ;;  %3404 = vmatmul.mubr.msk.f32.vlgmr.msra.gmra.mrb[16].mxu1 %vm683_vm0, %v3934_v31 }
 0x198   :  { %3450 = vmatprep.mubr.msk.bf16.mxu0 %vm3935_vm4, %v5237_v6  ;;  %3455 = vmatpush3.bf16.msra.mxu1 %v1692_v62 }
 0x199   :  { %3456 = vmatprep.mubr.msk.bf16.mxu1 %vm3935_vm4, %v5237_v6  ;;  %3466 = vmatprep.subr.bf16.mxu1 %v5237_v6 }
 0x19b   :  { %3457 = vmatmul.mubr.msk.bf16.vlgmr.msra.gmra.mrb[20].mxu1 %vm1686_vm5, %v4260_v2 }
 0x19c   :  { %3470 = vmatprep.mubr.msk.bf16.mxu1 %vm3935_vm4, %v5237_v6 }
 0x242   :  { %v753_v5 = vpop.f32.mrb[8].mxu1 }
 0x243   :  { %v755_v8 = vpop.f32.mrb[9].mxu1  ;;  %v4269_v16 = vmul.f32 0.0625, %v753_v5 }
 0x244   :  { %v4271_v21 = vmul.f32 0.0625, %v755_v8 }
 0x245   :  { %v1287_v30 = vmul.f32 %v4269_v16, %v4269_v16 }
 0x246   :  { %v824_v11 = vpop.f32.mrb[10].mxu1  ;;  %v1288_v40 = vmul.f32 %v4271_v21, %v4271_v21 }
 0x247   :  { %v826_v12 = vpop.f32.mrb[11].mxu1  ;;  %v4273_v22 = vmul.f32 0.0625, %v824_v11 }
 0x248   :  { %v4275_v25 = vmul.f32 0.0625, %v826_v12 }
 0x249   :  { %v1289_v41 = vmul.f32 %v4273_v22, %v4273_v22 }
 0x24a   :  { %v1290_v47 = vmul.f32 %v4275_v25, %v4275_v25 }
 0x262   :  { %v895_v15 = vpop.f32.mrb[8].mxu0  ;;  %v966_v19 = vpop.f32.mrb[12].mxu1 }
 0x263   :  { %v897_v20 = vpop.f32.mrb[9].mxu0  ;;  %v968_v24 = vpop.f32.mrb[13].mxu1  ;;  %v4277_v26 = vmul.f32 0.0625, %v895_v15  ;;  %v4279_v27 = vmul.f32 0.0625, %v966_v19 }
 0x264   :  { %v4281_v28 = vmul.f32 0.0625, %v897_v20  ;;  %v4285_v31 = vmul.f32 0.0625, %v968_v24 }
 0x265   :  { %v1291_v49 = vmul.f32 %v4277_v26, %v4277_v26  ;;  %v1293_v52 = vmul.f32 %v4279_v27, %v4279_v27 }
 0x266   :  { %v1061_v29 = vpop.f32.mrb[10].mxu0  ;;  %v1132_v36 = vpop.f32.mrb[14].mxu1  ;;  %v1292_v53 = vmul.f32 %v4281_v28, %v4281_v28  ;;  %v1294_v58 = vmul.f32 %v4285_v31, %v4285_v31 }
 0x267   :  { %v1279_v33 = vmul.f32 0.0625, %v1061_v29  ;;  %v1063_v39 = vpop.f32.mrb[11].mxu0  ;;  %v1281_v44 = vmul.f32 0.0625, %v1132_v36  ;;  %v1134_v46 = vpop.f32.mrb[15].mxu1 }
 0x268   :  { %v1280_v45 = vmul.f32 0.0625, %v1063_v39  ;;  %v1282_v51 = vmul.f32 0.0625, %v1134_v46 }
 0x269   :  { %v1295_v50 = vsub.f32 %v1279_v33, %v1287_v30  ;;  %v1297_v54 = vsub.f32 %v1281_v44, %v1289_v41 }
 0x26a   :  { %v1296_v55 = vsub.f32 %v1280_v45, %v1288_v40  ;;  %v1203_v57 = vpop.f32.mrb[12].mxu0  ;;  %v1298_v60 = vsub.f32 %v1282_v51, %v1290_v47  ;;  %v1274_v63 = vpop.f32.mrb[16].mxu1 }
 0x26b   :  { %v1303_v59 = vmax.f32 %v1295_v50, 0.0  ;;  %v1283_v62 = vmul.f32 0.0625, %v1203_v57  ;;  %v1205_v1 = vpop.f32.mrb[13].mxu0  ;;  %v1305_v5 = vmax.f32 %v1297_v54, 0.0  ;;  %v1285_v11 = vmul.f32 0.0625, %v1274_v63  ;;  %v1276_v15 = vpop.f32.mrb[17].mxu1 }
 0x26c   :  { %v1304_v8 = vmax.f32 %v1296_v55, 0.0  ;;  %v1284_v12 = vmul.f32 0.0625, %v1205_v1  ;;  %v1306_v20 = vmax.f32 %v1298_v60, 0.0  ;;  %v1286_v29 = vmul.f32 0.0625, %v1276_v15 }
 0x26d   :  { %v1312_v19 = vadd.f32 1e-05, %v1303_v59  ;;  %v1299_v24 = vsub.f32 %v1283_v62, %v1291_v49  ;;  %v1314_v30 = vadd.f32 1e-05, %v1305_v5  ;;  %v1301_v36 = vsub.f32 %v1285_v11, %v1293_v52 }
 0x26e   :  { %v1313_v33 = vadd.f32 1e-05, %v1304_v8  ;;  %v1300_v39 = vsub.f32 %v1284_v12, %v1292_v53  ;;  %v1315_v40 = vadd.f32 1e-05, %v1306_v20  ;;  %v1302_v44 = vsub.f32 %v1286_v29, %v1294_v58  ;;  %v4301_v45 = vpop.f32.mrb[20].mxu1 }
 0x26f   :  { %3727 = vrsqrt.f32 %v1312_v19  ;;  %v1307_v41 = vmax.f32 %v1299_v24, 0.0  ;;  %v1309_v46 = vmax.f32 %v1301_v36, 0.0  ;;  %1771 = vperm.xlu0 %3593, %v4301_v45   ;;  %1751 = vperm.xlu1 %3592, %v4301_v45   ;;  %v3458_v50 = vpop.f32.mrb[21].mxu1  ;;  %v3938_v52 = vmov 1966171168  }
 0x270   :  { %3729 = vrsqrt.f32 %v1314_v30  ;;  %v1308_v47 = vmax.f32 %v1300_v39, 0.0  ;;  %v1310_v51 = vmax.f32 %v1302_v44, 0.0  ;;  %v4305_v54 = vpop.f32.mrb[22].mxu1  ;;  %v1341_v53 = vunpack.c.l.s4 %v3938_v52 }
 0x271   :  { %3731 = vrsqrt.f32 %v1313_v33  ;;  %v1316_v49 = vadd.f32 1e-05, %v1307_v41  ;;  %v1318_v55 = vadd.f32 1e-05, %v1309_v46  ;;  %v3459_v58 = vpop.f32.mrb[23].mxu1  ;;  %v5253_v60 = vmov 6  }
 0x272   :  { %3733 = vrsqrt.f32 %v1315_v40  ;;  %v1317_v57 = vadd.f32 1e-05, %v1308_v47  ;;  %v1319_v59 = vadd.f32 1e-05, %v1310_v51  ;;  %v5281_v62 = vmov 3  }
 0x273   :  { %3735 = vrsqrt.f32 %v1316_v49  ;;  %3596 = vset.pattern.permute.xlu0 %v5253_v60  ;;  %3594 = vset.pattern.permute.xlu1 %v5281_v62  ;;  %v4310_v63 = vshrl.u32 %v1343_v56, 7  ;;  %v1342_v1 = vunpack.c.0.s8 %v1341_v53  ;;  %v5249_v8 = vmov 10  }
 0x274   :  { %3737 = vrsqrt.f32 %v1318_v55  ;;  %1846 = vperm.xlu0 %3596, %v4301_v45   ;;  %1791 = vperm.xlu1 %3594, %v4301_v45   ;;  %v5292_v11 = vmov 5   ;;  %v5245_v36 = vmov 14   ;;  %v5298_v39 = vmov 7  }
 0x275   :  { %3739 = vrsqrt.f32 %v1317_v57  ;;  %v4317_v15 = vsub.s32 %v1342_v1, %v4310_v63  ;;  %v5243_v52 = vmov 18   ;;  %v5251_v53 = vmov 9   ;;  %v1311_v1 = vld [vmem:[#allocation11] sm:$0xff] }
 0x276   :  { %3741 = vrsqrt.f32 %v1319_v59  ;;  %v1399_v59 = vsub.s32 2, %v4310_v63 }
 0x278   :  { %3599 = vset.pattern.permute.xlu0 %v5249_v8  ;;  %3595 = vset.pattern.permute.xlu1 %v5292_v11 }
 0x279   :  { %v3728_v5 = vpop.eup %3727  ;;  %1921 = vperm.xlu0 %3599, %v4301_v45   ;;  %1826 = vperm.xlu1 %3595, %v4301_v45  }
 0x27a   :  { %v3730_v12 = vpop.eup %3729 }
 0x27b   :  { %v3732_v56 = vpop.eup %3731 }
 0x27c   :  { %v3734_v19 = vpop.eup %3733  ;;  %v1336_v20 = vcombine.low %v3728_v5, %v3732_v56  ;;  %v5241_v5 = vmov 22   ;;  %v1403_v56 = vsub.s32 3, %v4310_v63 }
 0x27d   :  { %v3736_v24 = vpop.eup %3735  ;;  %v1337_v29 = vcombine.low %v3730_v12, %v3734_v19  ;;  %3602 = vset.pattern.permute.xlu0 %v5245_v36  ;;  %3597 = vset.pattern.permute.xlu1 %v5298_v39  ;;  %v5294_v12 = vmov 11   ;;  %v1407_v19 = vsub.s32 4, %v4310_v63 }
 0x27e   :  { %v3738_v30 = vpop.eup %3737  ;;  %v1346_v33 = vrot.slane %v1336_v20, %v4317_v15  ;;  %1996 = vperm.xlu0 %3602, %v4301_v45   ;;  %1866 = vperm.xlu1 %3597, %v4301_v45   ;;  %v1411_v20 = vsub.s32 5, %v4310_v63 }
 0x27f   :  { %v3740_v40 = vpop.eup %3739  ;;  %v1353_v41 = vrot.slane %v1337_v29, %v4317_v15  ;;  %v1391_v29 = vsub.s32 0, %v4310_v63 }
 0x280   :  { %v3742_v44 = vpop.eup %3741  ;;  %v1338_v46 = vcombine.low %v3736_v24, %v3740_v40 }
 0x281   :  { %v1368_v47 = vcombine.low %v1346_v33, %v1353_v41  ;;  %v1339_v50 = vcombine.low %v3738_v30, %v3742_v44  ;;  %v1415_v30 = vsub.s32 6, %v4310_v63  ;;  %v1419_v33 = vsub.s32 7, %v4310_v63 }
 0x282   :  { %v1360_v49 = vrot.slane %v1338_v46, %v4317_v15  ;;  %3605 = vset.pattern.permute.xlu0 %v5243_v52  ;;  %3598 = vset.pattern.permute.xlu1 %v5251_v53  ;;  %v1395_v41 = vsub.s32 1, %v4310_v63 }
 0x283   :  { %v1367_v51 = vrot.slane %v1339_v50, %v4317_v15  ;;  %2071 = vperm.xlu0 %3605, %v4301_v45   ;;  %1901 = vperm.xlu1 %3598, %v4301_v45   ;;  %v1376_v57 = vrot.slane %v1368_v47, %v4317_v15 }
 0x285   :  { %v1369_v55 = vcombine.low %v1360_v49, %v1367_v51  ;;  %v5239_v49 = vmov 26  }
 0x287   :  { %v1383_v58 = vrot.slane %v1369_v55, %v4317_v15  ;;  %3608 = vset.pattern.permute.xlu0 %v5241_v5  ;;  %3600 = vset.pattern.permute.xlu1 %v5294_v12 }
 0x288   :  { %2146 = vperm.xlu0 %3608, %v4301_v45   ;;  %1941 = vperm.xlu1 %3600, %v4301_v45  }
 0x289   :  { %v1384_v24 = vcombine.low %v1376_v57, %v1383_v58  ;;  %v5247_v57 = vmov 13  }
 0x28b   :  { %v1386_v40 = vmul.f32 %v1384_v24, %v1311_v1 }
 0x28c   :  { %3611 = vset.pattern.permute.xlu0 %v5239_v49  ;;  %3601 = vset.pattern.permute.xlu1 %v5247_v57 }
 0x28d   :  { %v1400_v44 = vrot.slane %v1386_v40, %v1399_v59  ;;  %v1404_v46 = vrot.slane %v1386_v40, %v1403_v56  ;;  %v1408_v47 = vrot.slane %v1386_v40, %v1407_v19  ;;  %v1412_v50 = vrot.slane %v1386_v40, %v1411_v20  ;;  %2221 = vperm.xlu0 %3611, %v4301_v45  }
 0x28e   :  { %v1416_v51 = vrot.slane %v1386_v40, %v1415_v30  ;;  %v1420_v55 = vrot.slane %v1386_v40, %v1419_v33  ;;  %v1392_v58 = vrot.slane %v1386_v40, %v1391_v29  ;;  %1976 = vperm.xlu1 %3601, %v4301_v45   ;;  %v1396_v6 = vrot.slane %v1386_v40, %v1395_v41 }
 0x28f   :  { %v1433_v1 = vmul.f32 %v1408_v47, %v4277_v26  ;;  %v1434_v24 = vmul.f32 %v1412_v50, %v4281_v28  ;;  %v1431_v49 = vmul.f32 %v1400_v44, %v4273_v22  ;;  %v1432_v57 = vmul.f32 %v1404_v46, %v4275_v25 }
 0x290   :  { %v1435_v5 = vmul.f32 %v1416_v51, %v4279_v27  ;;  %v1436_v52 = vmul.f32 %v1420_v55, %v4285_v31  ;;  %v1429_v36 = vmul.f32 %v1392_v58, %v4269_v16  ;;  %v1430_v26 = vmul.f32 %v1396_v6, %v4271_v21 }
 0x291   :  { %v1447_v8 = vcombine.low %v1433_v1, %v1434_v24  ;;  %v1496_v28 = vmul.f32 %v1392_v58, %v4139_v7  ;;  %v1504_v53 = vmul.f32 %v1392_v58, %v4157_v14  ;;  %3614 = vset.pattern.permute.xlu0 %v5282_v0  ;;  %v1446_v40 = vcombine.low %v1431_v49, %v1432_v57 }
 0x292   :  { %v1448_v60 = vcombine.low %v1435_v5, %v1436_v52  ;;  %v1497_v22 = vmul.f32 %v1396_v6, %v4147_v10  ;;  %v1505_v27 = vmul.f32 %v1396_v6, %v4165_v18  ;;  %v5290_v31 = vmov 15   ;;  %1740 = vperm.xlu0 %3614, %v4301_v45  }
 0x293   :  { %3603 = vset.pattern.permute.xlu1 %v5290_v31  ;;  %v1445_v16 = vcombine.low %v1429_v36, %v1430_v26  ;;  %v1469_v21 = vrot.slane %v1447_v8, %v4317_v15  ;;  %v1500_v7 = vmul.f32 %v1408_v47, %v4191_v32  ;;  %v1462_v14 = vrot.slane %v1446_v40, %v4317_v15 }
 0x294   :  { %2016 = vperm.xlu1 %3603, %v4301_v45   ;;  %v1476_v25 = vrot.slane %v1448_v60, %v4317_v15  ;;  %v1508_v10 = vmul.f32 %v1408_v47, %v4203_v38  ;;  %v1498_v6 = vmul.f32 %v1400_v44, %v4145_v9  ;;  %v1506_v52 = vmul.f32 %v1400_v44, %v4163_v17 }
 0x295   :  { %v1455_v18 = vrot.slane %v1445_v16, %v4317_v15  ;;  %v1499_v36 = vmul.f32 %v1404_v46, %v4155_v13  ;;  %v1507_v8 = vmul.f32 %v1404_v46, %v4175_v23  ;;  %v1502_v32 = vmul.f32 %v1416_v51, %v4195_v34 }
 0x296   :  { %v1478_v5 = vcombine.low %v1469_v21, %v1476_v25  ;;  %v1510_v49 = vmul.f32 %v1416_v51, %v4211_v42  ;;  %v1501_v57 = vmul.f32 %v1412_v50, %v4197_v35  ;;  %v5261_v60 = vmov 4   ;;  %v1387_v35 = vld [vmem:[#allocation12] sm:$0xff] }
 0x297   :  { %3617 = vset.pattern.permute.xlu0 %v5261_v60  ;;  %v1477_v38 = vcombine.low %v1455_v18, %v1462_v14  ;;  %v1509_v9 = vmul.f32 %v1412_v50, %v4213_v43  ;;  %v1503_v47 = vmul.f32 %v1420_v55, %v4201_v37  ;;  %v1511_v17 = vmul.f32 %v1420_v55, %v4223_v48 }
 0x298   :  { %v5275_v13 = vmov 17   ;;  %1814 = vperm.xlu0 %3617, %v4301_v45   ;;  %v1492_v23 = vrot.slane %v1478_v5, %v4317_v15  ;;  %v5259_v44 = vmov 12   ;;  %v5288_v43 = vmov 19  }
 0x299   :  { %3604 = vset.pattern.permute.xlu1 %v5275_v13  ;;  %v1485_v34 = vrot.slane %v1477_v38, %v4317_v15  ;;  %v5263_v1 = vmov 20   ;;  %v5286_v18 = vmov 23   ;;  %v5279_v38 = vmov 30  }
 0x29a   :  { %2051 = vperm.xlu1 %3604, %v4301_v45  }
 0x29b   :  { %v1493_v42 = vcombine.low %v1485_v34, %v1492_v23  ;;  %v5271_v23 = vmov 24   ;;  %v5310_v34 = vmov 6  }
 0x29c   :  { %3619 = vset.pattern.permute.xlu0 %v5259_v44 }
 0x29d   :  { %1964 = vperm.xlu0 %3619, %v4301_v45   ;;  %v1495_v37 = vsub.f32 %v1387_v35, %v1493_v42  ;;  %v5311_v35 = vmov 9   ;;  %v5312_v42 = vmov 10  }
 0x29e   :  { %3606 = vset.pattern.permute.xlu1 %v5288_v43 }
 0x29f   :  { %2091 = vperm.xlu1 %3606, %v4301_v45   ;;  %v1516_v48 = vrot.slane %v1495_v37, %v1391_v29  ;;  %v1520_v46 = vrot.slane %v1495_v37, %v1395_v41  ;;  %v1532_v15 = vrot.slane %v1495_v37, %v1407_v19  ;;  %v1524_v50 = vrot.slane %v1495_v37, %v1399_v59 }
 0x2a0   :  { %v1528_v51 = vrot.slane %v1495_v37, %v1403_v56  ;;  %v1540_v55 = vrot.slane %v1495_v37, %v1415_v30  ;;  %v1536_v58 = vrot.slane %v1495_v37, %v1411_v20  ;;  %v1544_v29 = vrot.slane %v1495_v37, %v1419_v33 }
 0x2a1   :  { %3621 = vset.pattern.permute.xlu0 %v5263_v1  ;;  %v1553_v41 = vadd.f32 %v1516_v48, %v1496_v28  ;;  %v1561_v19 = vadd.f32 %v1516_v48, %v1504_v53  ;;  %v1554_v24 = vadd.f32 %v1520_v46, %v1497_v22  ;;  %v1562_v26 = vadd.f32 %v1520_v46, %v1505_v27 }
 0x2a2   :  { %v5269_v59 = vmov 21   ;;  %2114 = vperm.xlu0 %3621, %v4301_v45   ;;  %v1557_v56 = vadd.f32 %v1532_v15, %v1500_v7  ;;  %v1565_v30 = vadd.f32 %v1532_v15, %v1508_v10  ;;  %v1555_v40 = vadd.f32 %v1524_v50, %v1498_v6 }
 0x2a3   :  { %3607 = vset.pattern.permute.xlu1 %v5269_v59  ;;  %v4429_v20 = vpack.c.bf16 %v1561_v19, %v1553_v41  ;;  %v4431_v33 = vpack.c.bf16 %v1562_v26, %v1554_v24  ;;  %v1563_v16 = vadd.f32 %v1524_v50, %v1506_v52  ;;  %v1556_v21 = vadd.f32 %v1528_v51, %v1499_v36 }
 0x2a4   :  { %2126 = vperm.xlu1 %3607, %v4301_v45   ;;  %v4433_v28 = vpack.c.bf16 %v1565_v30, %v1557_v56  ;;  %v1564_v53 = vadd.f32 %v1528_v51, %v1507_v8  ;;  %v1559_v22 = vadd.f32 %v1540_v55, %v1502_v32  ;;  %v1567_v27 = vadd.f32 %v1540_v55, %v1510_v49 }
 0x2a5   :  { %v4435_v14 = vpack.c.bf16 %v1563_v16, %v1555_v40  ;;  %v1558_v25 = vadd.f32 %v1536_v58, %v1501_v57  ;;  %v1566_v6 = vadd.f32 %v1536_v58, %v1509_v9  ;;  %v1560_v52 = vadd.f32 %v1544_v29, %v1503_v47 }
 0x2a6   :  { %3625 = vset.pattern.permute.xlu0 %v5281_v62  ;;  %v4438_v7 = vpack.c.bf16 %v1564_v53, %v1556_v21  ;;  %v4440_v10 = vpack.c.bf16 %v1567_v27, %v1559_v22  ;;  %v1568_v36 = vadd.f32 %v1544_v29, %v1511_v17  ;;  %v5255_v32 = vmov 25  }
 0x2a7   :  { %1795 = vperm.xlu0 %3625, %v4305_v54   ;;  %v4445_v8 = vpack.c.bf16 %v1566_v6, %v1558_v25  ;;  %v5284_v49 = vmov 27   ;;  %v5265_v57 = vmov 29   ;;  %v5257_v9 = vmov 31  }
 0x2a8   :  { %3609 = vset.pattern.permute.xlu1 %v5286_v18  ;;  %v4447_v5 = vpack.c.bf16 %v1568_v36, %v1560_v52  ;;  %v5277_v47 = vmov 8   ;;  %v5273_v17 = vmov 16   ;;  %v5313_v46 = vmov 13  }
 0x2a9   :  { %2166 = vperm.xlu1 %3609, %v4301_v45   ;;  %v4504_v15 = vunpack.c.l.bf16 %v4431_v33  ;;  %v5267_v55 = vmov 28   ;;  %v5315_v29 = vmov 14   ;;  %v5316_v30 = vmov 18  }
 0x2aa   :  { %v4523_v40 = vunpack.c.l.bf16 %v4438_v7  ;;  %v5318_v22 = vmov 22  }
 0x2ab   :  { %3628 = vset.pattern.permute.xlu0 %v5298_v39  ;;  %5314 = vst [vmem:[#allocation20_spill] sm:$0xff] %v4504_v15 }
 0x2ac   :  { %1870 = vperm.xlu0 %3628, %v4305_v54   ;;  %5317 = vst [vmem:[#allocation21_spill] sm:$0xff] %v4523_v40 }
 0x2ad   :  { %3610 = vset.pattern.permute.xlu1 %v5255_v32 }
 0x2ae   :  { %2201 = vperm.xlu1 %3610, %v4301_v45  }
 0x2b0   :  { %3631 = vset.pattern.permute.xlu0 %v5294_v12 }
 0x2b1   :  { %1945 = vperm.xlu0 %3631, %v4305_v54  }
 0x2b2   :  { %3612 = vset.pattern.permute.xlu1 %v5284_v49 }
 0x2b3   :  { %2241 = vperm.xlu1 %3612, %v4301_v45  }
 0x2b5   :  { %3634 = vset.pattern.permute.xlu0 %v5290_v31 }
 0x2b6   :  { %2020 = vperm.xlu0 %3634, %v4305_v54  }
 0x2b7   :  { %3613 = vset.pattern.permute.xlu1 %v5265_v57 }
 0x2b8   :  { %2276 = vperm.xlu1 %3613, %v4301_v45  }
 0x2ba   :  { %3637 = vset.pattern.permute.xlu0 %v5288_v43 }
 0x2bb   :  { %2095 = vperm.xlu0 %3637, %v4305_v54  }
 0x2bc   :  { %3615 = vset.pattern.permute.xlu1 %v5279_v38 }
 0x2bd   :  { %2296 = vperm.xlu1 %3615, %v4301_v45  }
 0x2bf   :  { %3640 = vset.pattern.permute.xlu0 %v5286_v18 }
 0x2c0   :  { %2170 = vperm.xlu0 %3640, %v4305_v54  }
 0x2c1   :  { %3616 = vset.pattern.permute.xlu1 %v5257_v9 }
 0x2c2   :  { %2316 = vperm.xlu1 %3616, %v4301_v45  }
 0x2c4   :  { %3643 = vset.pattern.permute.xlu0 %v5284_v49 }
 0x2c5   :  { %2245 = vperm.xlu0 %3643, %v4305_v54  }
 0x2c6   :  { %3618 = vset.pattern.permute.xlu1 %v5277_v47 }
 0x2c7   :  { %1889 = vperm.xlu1 %3618, %v4301_v45  }
 0x2c9   :  { %3646 = vset.pattern.permute.xlu0 %v5279_v38 }
 0x2ca   :  { %2300 = vperm.xlu0 %3646, %v4305_v54  }
 0x2cb   :  { %3620 = vset.pattern.permute.xlu1 %v5273_v17 }
 0x2cc   :  { %2039 = vperm.xlu1 %3620, %v4301_v45  }
 0x2ce   :  { %3649 = vset.pattern.permute.xlu0 %v5277_v47 }
 0x2cf   :  { %1893 = vperm.xlu0 %3649, %v4305_v54  }
 0x2d0   :  { %3622 = vset.pattern.permute.xlu1 %v5271_v23 }
 0x2d1   :  { %2189 = vperm.xlu1 %3622, %v4301_v45  }
 0x2d3   :  { %3651 = vset.pattern.permute.xlu0 %v5273_v17 }
 0x2d4   :  { %2043 = vperm.xlu0 %3651, %v4305_v54  }
 0x2d5   :  { %3623 = vset.pattern.permute.xlu1 %v5300_v3 }
 0x2d6   :  { %1755 = vperm.xlu1 %3623, %v4305_v54  }
 0x2d8   :  { %3653 = vset.pattern.permute.xlu0 %v5271_v23 }
 0x2d9   :  { %2193 = vperm.xlu0 %3653, %v4305_v54  }
 0x2da   :  { %3624 = vset.pattern.permute.xlu1 %v5296_v4 }
 0x2db   :  { %1775 = vperm.xlu1 %3624, %v4305_v54  }
 0x2dd   :  { %3654 = vset.pattern.permute.xlu0 %v5267_v55 }
 0x2df   :  { %3626 = vset.pattern.permute.xlu1 %v5292_v11 }
 0x2e0   :  { %1830 = vperm.xlu1 %3626, %v4305_v54  }
 0x2e4   :  { %3627 = vset.pattern.permute.xlu1 %v5310_v34 }
 0x2e5   :  { %1850 = vperm.xlu1 %3627, %v4305_v54  }
 0x2e9   :  { %3629 = vset.pattern.permute.xlu1 %v5311_v35 }
 0x2ea   :  { %1905 = vperm.xlu1 %3629, %v4305_v54  }
 0x2ee   :  { %3630 = vset.pattern.permute.xlu1 %v5312_v42  ;;  %v4497_v37 = vpop.permute.xlu0 %1771  ;;  %v4499_v48 = vpop.permute.xlu1 %1751 }
 0x2ef   :  { %1925 = vperm.xlu1 %3630, %v4305_v54  }
 0x2f3   :  { %3632 = vset.pattern.permute.xlu1 %v5313_v46  ;;  %v1847_v50 = vpop.permute.xlu0 %1846  ;;  %v4506_v51 = vpop.permute.xlu1 %1791 }
 0x2f4   :  { %1980 = vperm.xlu1 %3632, %v4305_v54   ;;  %v1853_v58 = vmul.f32 %v1847_v50, %v4504_v15  ;;  %v5319_v50 = vmov 26  }
 0x2f6   :  { %1857 = vrot.lane.b32.xlu0 %v1853_v58, %s3928_s0  ;;  %v4547_v58 = vunpack.c.l.bf16 %v4445_v8 }
 0x2f8   :  { %3633 = vset.pattern.permute.xlu1 %v5315_v29  ;;  %v4513_v41 = vpop.permute.xlu1 %1826  ;;  %v4515_v19 = vpop.permute.xlu0 %1921 }
 0x2f9   :  { %2000 = vperm.xlu1 %3633, %v4305_v54  }
 0x2fd   :  { %3635 = vset.pattern.permute.xlu1 %v5275_v13  ;;  %v1867_v24 = vpop.permute.xlu1 %1866  ;;  %v1997_v56 = vpop.permute.xlu0 %1996  ;;  %v4638_v13 = vunpack.c.l.bf16 %v4433_v28 }
 0x2fe   :  { %2055 = vperm.xlu1 %3635, %v4305_v54   ;;  %v1873_v26 = vmul.f32 %v1867_v24, %v4504_v15  ;;  %v2003_v21 = vmul.f32 %v1997_v56, %v4523_v40  ;;  %v3968_v24 = vmov 1065369472  }
 0x2ff   :  { %3449 = vmatpush3.bf16.msra.mxu0 %v3968_v24 }
 0x300   :  { %1877 = vrot.lane.b32.xlu0 %v1873_v26, %s3925_s18 }
 0x302   :  { %3636 = vset.pattern.permute.xlu1 %v5316_v30  ;;  %v4526_v16 = vpop.permute.xlu1 %1901  ;;  %v4538_v25 = vpop.permute.xlu0 %2071 }
 0x303   :  { %2075 = vperm.xlu1 %3636, %v4305_v54  }
 0x304   :  { %2007 = vrot.lane.b32.xlu0 %v2003_v21, %s3928_s0  ;;  %v5320_v21 = vmov 0.0  }
 0x305   :  { %3460 = vmatprep.subr.bf16.mxu0 %v5320_v21 }
 0x307   :  { %3638 = vset.pattern.permute.xlu1 %v5269_v59  ;;  %v4532_v53 = vpop.permute.xlu1 %1941  ;;  %v2147_v36 = vpop.permute.xlu0 %2146 }
 0x308   :  { %2130 = vperm.xlu1 %3638, %v4305_v54   ;;  %v2153_v56 = vmul.f32 %v2147_v36, %v4547_v58 }
 0x30c   :  { %3639 = vset.pattern.permute.xlu1 %v5318_v22 }
 0x30d   :  { %2150 = vperm.xlu1 %3639, %v4305_v54   ;;  %v4536_v27 = vpop.permute.xlu1 %1976 }
 0x311   :  { %3641 = vset.pattern.permute.xlu1 %v5255_v32 }
 0x312   :  { %2205 = vperm.xlu1 %3641, %v4305_v54  }
 0x313   :  { %v2017_v6 = vpop.permute.xlu1 %2016 }
 0x314   :  { %v2023_v52 = vmul.f32 %v2017_v6, %v4523_v40  ;;  %v3407_v6 = vld [vmem:[#allocation6] ss:$0 sm:$0xff] }
 0x315   :  { %vm1606_vm6 = vcmp.eq.s32.totalorder %v3407_v6, %v4310_v63 }
 0x316   :  { %3642 = vset.pattern.permute.xlu1 %v5319_v50  ;;  %2027 = vrot.lane.b32.xlu0 %v2023_v52, %s3925_s18  ;;  %v3408_v32 = vsel %vm1606_vm6, 1.0, %v5320_v21 }
 0x317   :  { %2225 = vperm.xlu1 %3642, %v4305_v54   ;;  %v4560_v24 = vpack.c.bf16 %v3408_v32, %v3408_v32 }
 0x319   :  { %v4549_v26 = vpop.permute.xlu1 %2051  ;;  %3451 = vmatmul.mubr.msk.bf16.vlgmr.msra.gmra.mrb[16].mxu0 %vm683_vm0, %v4560_v24 }
 0x31a   :  { %2157 = vrot.lane.b32.xlu0 %v2153_v56, %s3928_s0  ;;  %3462 = vmatprep.mubr.msk.bf16.mxu0 %vm3935_vm4, %v5320_v21  ;;  %v2058_v47 = vmul.f32 %v4549_v26, %v4638_v13 }
 0x31b   :  { %3644 = vset.pattern.permute.xlu1 %v5265_v57 }
 0x31c   :  { %2280 = vperm.xlu1 %3644, %v4305_v54  }
 0x31e   :  { %v4557_v52 = vpop.permute.xlu1 %2091 }
 0x320   :  { %3645 = vset.pattern.permute.xlu1 %v5282_v0 }
 0x321   :  { %1745 = vperm.xlu1 %3645, %v4305_v54  }
 0x323   :  { %v4568_v36 = vpop.permute.xlu1 %2126 }
 0x325   :  { %3647 = vset.pattern.permute.xlu1 %v5257_v9  ;;  %v4584_v9 = vunpack.c.l.bf16 %v4429_v20 }
 0x326   :  { %2320 = vperm.xlu1 %3647, %v4305_v54  }
 0x327   :  { %5321 = vst [vmem:[#allocation22_spill] sm:$0xff] %v4584_v9  ;;  %v1798_v57 = vmul.f32 %v4506_v51, %v4584_v9 }
 0x328   :  { %v2167_v63 = vpop.permute.xlu1 %2166 }
 0x329   :  { %v2173_v32 = vmul.f32 %v2167_v63, %v4547_v58  ;;  %v1758_v63 = vmul.f32 %v4499_v48, %v4584_v9 }
 0x32a   :  { %3648 = vset.pattern.permute.xlu1 %v5261_v60 }
 0x32b   :  { %2177 = vrot.lane.b32.xlu0 %v2173_v32, %s3925_s18  ;;  %1818 = vperm.xlu1 %3648, %v4305_v54  }
 0x32d   :  { %v4576_v56 = vpop.permute.xlu1 %2201 }
 0x32f   :  { %3650 = vset.pattern.permute.xlu1 %v5259_v44  ;;  %v1778_v44 = vmul.f32 %v4497_v37, %v4584_v9  ;;  %v4610_v37 = vunpack.c.l.bf16 %v4435_v14 }
 0x330   :  { %1968 = vperm.xlu1 %3650, %v4305_v54  }
 0x331   :  { %5322 = vst [vmem:[#allocation23_spill] sm:$0xff] %v4610_v37  ;;  %v1908_v59 = vmul.f32 %v4526_v16, %v4610_v37  ;;  %v1948_v23 = vmul.f32 %v4532_v53, %v4610_v37  ;;  %v4635_v16 = vunpack.c.h.bf16 %v4429_v20  ;;  %v2078_v20 = vmul.f32 %v4538_v25, %v4638_v13 }
 0x332   :  { %v4580_v6 = vpop.permute.xlu1 %2241 }
 0x334   :  { %3652 = vset.pattern.permute.xlu1 %v5263_v1  ;;  %v4598_v1 = vpop.permute.xlu0 %2221 }
 0x335   :  { %2118 = vperm.xlu1 %3652, %v4305_v54  }
 0x337   :  { %v4589_v32 = vpop.permute.xlu1 %2276 }
 0x339   :  { %1762 = vrot.lane.b32.xlu1 %v1758_v63, %s3969_s1  ;;  %v1833_v63 = vmul.f32 %v4513_v41, %v4504_v15  ;;  %v1928_v41 = vmul.f32 %v4515_v19, %v4610_v37 }
 0x33a   :  { %3655 = vset.pattern.permute.xlu1 %v5267_v55  ;;  %v4607_v55 = vpop.permute.xlu0 %1740 }
 0x33c   :  { %v4595_v60 = vpop.permute.xlu1 %2296 }
 0x33d   :  { %1782 = vrot.lane.b32.xlu1 %v1778_v44, %s3928_s0 }
 0x33e   :  { %v4618_v51 = vpop.permute.xlu0 %1814 }
 0x341   :  { %v4602_v48 = vpop.permute.xlu1 %2316  ;;  %1802 = vrot.lane.b32.xlu1 %v1798_v57, %s3925_s18 }
 0x345   :  { %1837 = vrot.lane.b32.xlu1 %v1833_v63, %s3969_s1  ;;  %v4627_v63 = vpop.permute.xlu0 %1964 }
 0x346   :  { %v4613_v44 = vpop.permute.xlu1 %1889 }
 0x349   :  { %1912 = vrot.lane.b32.xlu1 %v1908_v59, %s3969_s1  ;;  %v1983_v59 = vmul.f32 %v4536_v27, %v4523_v40 }
 0x34b   :  { %v4620_v57 = vpop.permute.xlu1 %2039 }
 0x34d   :  { %1932 = vrot.lane.b32.xlu1 %v1928_v41, %s3928_s0  ;;  %v4641_v41 = vpop.permute.xlu0 %2114 }
 0x350   :  { %v4629_v17 = vpop.permute.xlu1 %2189 }
 0x351   :  { %1952 = vrot.lane.b32.xlu1 %v1948_v23, %s3925_s18  ;;  %v1796_v38 = vpop.permute.xlu0 %1795 }
 0x352   :  { %v1799_v26 = vmul.f32 %v1796_v38, %v4635_v16 }
 0x355   :  { %1987 = vrot.lane.b32.xlu1 %v1983_v59, %s3969_s1  ;;  %v1756_v19 = vpop.permute.xlu1 %1755  ;;  %v2098_v59 = vmul.f32 %v4557_v52, %v4638_v13  ;;  %v4666_v52 = vunpack.c.h.bf16 %v4435_v14 }
 0x356   :  { %v1759_v53 = vmul.f32 %v1756_v19, %v4635_v16 }
 0x358   :  { %1764 = vrot.lane.b32.xlu0 %v1759_v53, %s3969_s1  ;;  %v4661_v53 = vunpack.c.h.bf16 %v4431_v33 }
 0x359   :  { %2062 = vrot.lane.b32.xlu1 %v2058_v47, %s3969_s1  ;;  %v2133_v47 = vmul.f32 %v4568_v36, %v4547_v58 }
 0x35a   :  { %v1776_v23 = vpop.permute.xlu1 %1775 }
 0x35b   :  { %v1779_v27 = vmul.f32 %v1776_v23, %v4635_v16 }
 0x35d   :  { %2082 = vrot.lane.b32.xlu1 %v2078_v20, %s3928_s0  ;;  %1784 = vrot.lane.b32.xlu0 %v1779_v27, %s3928_s0  ;;  %v1871_v20 = vpop.permute.xlu0 %1870 }
 0x35e   :  { %v1874_v36 = vmul.f32 %v1871_v20, %v4661_v53  ;;  %v4686_v20 = vunpack.c.h.bf16 %v4438_v7 }
 0x35f   :  { %v1831_v19 = vpop.permute.xlu1 %1830 }
 0x360   :  { %v1834_v23 = vmul.f32 %v1831_v19, %v4661_v53 }
 0x361   :  { %2102 = vrot.lane.b32.xlu1 %v2098_v59, %s3925_s18  ;;  %1804 = vrot.lane.b32.xlu0 %v1799_v26, %s3925_s18  ;;  %v1946_v26 = vpop.permute.xlu0 %1945 }
 0x364   :  { %v1851_v25 = vpop.permute.xlu1 %1850 }
 0x365   :  { %2137 = vrot.lane.b32.xlu1 %v2133_v47, %s3969_s1  ;;  %v1854_v59 = vmul.f32 %v1851_v25, %v4661_v53  ;;  %v1949_v47 = vmul.f32 %v1946_v26, %v4666_v52 }
 0x369   :  { %1839 = vrot.lane.b32.xlu1 %v1834_v23, %s3969_s1  ;;  %v1906_v38 = vpop.permute.xlu1 %1905  ;;  %v4679_v23 = vunpack.c.l.bf16 %v4440_v10 }
 0x36a   :  { %v1909_v27 = vmul.f32 %v1906_v38, %v4666_v52 }
 0x36b   :  { %v2208_v25 = vmul.f32 %v4576_v56, %v4679_v23  ;;  %v2021_v56 = vpop.permute.xlu0 %2020  ;;  %v2228_v26 = vmul.f32 %v4598_v1, %v4679_v23  ;;  %v4717_v1 = vunpack.c.h.bf16 %v4440_v10  ;;  %v4728_v10 = vunpack.c.l.bf16 %v4447_v5 }
 0x36c   :  { %1914 = vrot.lane.b32.xlu0 %v1909_v27, %s3969_s1 }
 0x36d   :  { %1859 = vrot.lane.b32.xlu1 %v1854_v59, %s3928_s0  ;;  %v4693_v59 = vunpack.c.h.bf16 %v4433_v28 }
 0x36e   :  { %v1926_v33 = vpop.permute.xlu1 %1925 }
 0x36f   :  { %v1929_v19 = vmul.f32 %v1926_v33, %v4666_v52 }
 0x371   :  { %1879 = vrot.lane.b32.xlu1 %v1874_v36, %s3925_s18  ;;  %1934 = vrot.lane.b32.xlu0 %v1929_v19, %s3928_s0  ;;  %v2024_v36 = vmul.f32 %v2021_v56, %v4686_v20  ;;  %v2096_v19 = vpop.permute.xlu0 %2095 }
 0x373   :  { %v1981_v14 = vpop.permute.xlu1 %1980 }
 0x374   :  { %v1984_v27 = vmul.f32 %v1981_v14, %v4686_v20 }
 0x375   :  { %2268 = vperm.xlu1 %3655, %v4305_v54   ;;  %1954 = vrot.lane.b32.xlu0 %v1949_v47, %s3925_s18  ;;  %v2099_v47 = vmul.f32 %v2096_v19, %v4693_v59  ;;  %v2171_v56 = vpop.permute.xlu0 %2170 }
 0x378   :  { %v2001_v38 = vpop.permute.xlu1 %2000 }
 0x379   :  { %2212 = vrot.lane.b32.xlu1 %v2208_v25, %s3969_s1  ;;  %2264 = vperm.xlu0 %3654, %v4301_v45   ;;  %v2004_v33 = vmul.f32 %v2001_v38, %v4686_v20  ;;  %v4709_v25 = vunpack.c.h.bf16 %v4445_v8  ;;  %v2246_v19 = vpop.permute.xlu0 %2245 }
 0x37a   :  { %3656 = vset.pattern.permute.xlu1 %v5282_v0 }
 0x37d   :  { %1989 = vrot.lane.b32.xlu1 %v1984_v27, %s3969_s1  ;;  %v2056_v54 = vpop.permute.xlu1 %2055  ;;  %3659 = vset.pattern.permute.xlu0 %v5281_v62 }
 0x37e   :  { %v2059_v7 = vmul.f32 %v2056_v54, %v4693_v59 }
 0x380   :  { %2064 = vrot.lane.b32.xlu0 %v2059_v7, %s3969_s1 }
 0x381   :  { %2009 = vrot.lane.b32.xlu1 %v2004_v33, %s3928_s0  ;;  %v2174_v33 = vmul.f32 %v2171_v56, %v4709_v25 }
 0x382   :  { %v2076_v45 = vpop.permute.xlu1 %2075 }
 0x383   :  { %v2079_v28 = vmul.f32 %v2076_v45, %v4693_v59 }
 0x385   :  { %2029 = vrot.lane.b32.xlu1 %v2024_v36, %s3925_s18  ;;  %2084 = vrot.lane.b32.xlu0 %v2079_v28, %s3928_s0  ;;  %v2248_v36 = vmul.f32 %v4580_v6, %v4679_v23  ;;  %v2303_v6 = vmul.f32 %v4595_v60, %v4728_v10 }
 0x387   :  { %v2131_v14 = vpop.permute.xlu1 %2130 }
 0x388   :  { %v2134_v38 = vmul.f32 %v2131_v14, %v4709_v25 }
 0x389   :  { %2232 = vrot.lane.b32.xlu1 %v2228_v26, %s3928_s0  ;;  %2104 = vrot.lane.b32.xlu0 %v2099_v47, %s3925_s18  ;;  %v2283_v26 = vmul.f32 %v4589_v32, %v4728_v10  ;;  %v2249_v47 = vmul.f32 %v2246_v19, %v4717_v1  ;;  %v2323_v32 = vmul.f32 %v4602_v48, %v4728_v10 }
 0x38c   :  { %v2151_v27 = vpop.permute.xlu1 %2150 }
 0x38d   :  { %2139 = vrot.lane.b32.xlu1 %v2134_v38, %s3969_s1  ;;  %v2154_v54 = vmul.f32 %v2151_v27, %v4709_v25  ;;  %v4736_v38 = vunpack.c.h.bf16 %v4447_v5 }
 0x391   :  { %2159 = vrot.lane.b32.xlu1 %v2154_v54, %s3928_s0  ;;  %v2206_v7 = vpop.permute.xlu1 %2205  ;;  %v2301_v54 = vpop.permute.xlu0 %2300 }
 0x392   :  { %v2209_v8 = vmul.f32 %v2206_v7, %v4717_v1  ;;  %v2304_v5 = vmul.f32 %v2301_v54, %v4736_v38 }
 0x394   :  { %2214 = vrot.lane.b32.xlu0 %v2209_v8, %s3969_s1 }
 0x395   :  { %2179 = vrot.lane.b32.xlu1 %v2174_v33, %s3925_s18  ;;  %v1894_v33 = vpop.permute.xlu0 %1893 }
 0x396   :  { %v2226_v45 = vpop.permute.xlu1 %2225 }
 0x397   :  { %v2229_v28 = vmul.f32 %v2226_v45, %v4717_v1  ;;  %v4755_v45 = vld [vmem:[%s5234_s9] sm:$0xff]  }
 0x398   :  { %3467 = vmatpush3.bf16.msra.mxu1 %v4755_v45 }
 0x399   :  { %2252 = vrot.lane.b32.xlu1 %v2248_v36, %s3925_s18  ;;  %2234 = vrot.lane.b32.xlu0 %v2229_v28, %s3928_s0  ;;  %v4761_v36 = vpop.permute.xlu0 %2043 }
 0x39a   :  { %3468 = vmatprep.subr.bf16.mxu1 %v5320_v21 }
 0x39b   :  { %v2281_v14 = vpop.permute.xlu1 %2280 }
 0x39c   :  { %v2284_v27 = vmul.f32 %v2281_v14, %v4736_v38  ;;  %v1748_v14 = vmul.f32 %v4607_v55, %v4584_v9 }
 0x39d   :  { %2287 = vrot.lane.b32.xlu1 %v2283_v26, %s3969_s1  ;;  %2254 = vrot.lane.b32.xlu0 %v2249_v47, %s3925_s18  ;;  %v4765_v19 = vpop.permute.xlu0 %2193 }
 0x3a0   :  { %v1746_v56 = vpop.permute.xlu1 %1745 }
 0x3a1   :  { %2307 = vrot.lane.b32.xlu1 %v2303_v6, %s3928_s0  ;;  %2289 = vrot.lane.b32.xlu0 %v2284_v27, %s3969_s1  ;;  %v1858_v47 = vpop.permute.xlu0 %1857 }
 0x3a5   :  { %2327 = vrot.lane.b32.xlu1 %v2323_v32, %s3925_s18  ;;  %2309 = vrot.lane.b32.xlu0 %v2304_v5, %s3928_s0  ;;  %v2321_v7 = vpop.permute.xlu1 %2320  ;;  %v1878_v54 = vpop.permute.xlu0 %1877 }
 0x3a6   :  { %v2324_v60 = vmul.f32 %v2321_v7, %v4736_v38  ;;  %v1821_v7 = vmul.f32 %v4618_v51, %v4504_v15 }
 0x3a9   :  { %2329 = vrot.lane.b32.xlu0 %v2324_v60, %s3925_s18  ;;  %v2008_v49 = vpop.permute.xlu0 %2007 }
 0x3aa   :  { %v1819_v8 = vpop.permute.xlu1 %1818 }
 0x3ad   :  { %v2028_v31 = vpop.permute.xlu0 %2027 }
 0x3af   :  { %v4758_v48 = vpop.permute.xlu1 %1968 }
 0x3b1   :  { %v4771_v4 = vpop.permute.xlu0 %2157 }
 0x3b4   :  { %v4763_v28 = vpop.permute.xlu1 %2118 }
 0x3b8   :  { %v1763_v26 = vpop.permute.xlu1 %1762 }
 0x3b9   :  { %v1768_v27 = vadd.f32 %v1763_v26, %v1748_v14  ;;  %v1896_v26 = vmul.f32 %v4613_v44, %v4610_v37  ;;  %v4775_v14 = vpop.permute.xlu0 %2177 }
 0x3bc   :  { %v1783_v6 = vpop.permute.xlu1 %1782 }
 0x3bd   :  { %v1788_v32 = vadd.f32 %v1783_v6, %v1768_v27 }
 0x3c0   :  { %v1803_v5 = vpop.permute.xlu1 %1802 }
 0x3c1   :  { %v1808_v60 = vadd.f32 %v1803_v5, %v1788_v32 }
 0x3c3   :  { %v1823_v62 = vadd.f32 %v1821_v7, %v1808_v60 }
 0x3c4   :  { %v1838_v0 = vpop.permute.xlu1 %1837 }
 0x3c5   :  { %v1843_v18 = vadd.f32 %v1838_v0, %v1823_v62 }
 0x3c7   :  { %v1863_v11 = vadd.f32 %v1858_v47, %v1843_v18  ;;  %v1971_v47 = vmul.f32 %v4627_v63, %v4523_v40 }
 0x3c8   :  { %v1913_v43 = vpop.permute.xlu1 %1912 }
 0x3c9   :  { %v1883_v55 = vadd.f32 %v1878_v54, %v1863_v11  ;;  %v1749_v11 = vmul.f32 %v1746_v56, %v4635_v16  ;;  %v2046_v56 = vmul.f32 %v4620_v57, %v4638_v13 }
 0x3ca   :  { %v1765_v32 = vpop.permute.xlu0 %1764 }
 0x3cb   :  { %v1898_v6 = vadd.f32 %v1896_v26, %v1883_v55  ;;  %v1769_v54 = vadd.f32 %v1765_v32, %v1749_v11  ;;  %v1897_v32 = vmul.f32 %v1894_v33, %v4666_v52 }
 0x3cc   :  { %v1933_v12 = vpop.permute.xlu1 %1932 }
 0x3cd   :  { %v1918_v27 = vadd.f32 %v1913_v43, %v1898_v6 }
 0x3cf   :  { %v1938_v7 = vadd.f32 %v1933_v12, %v1918_v27  ;;  %v1785_v62 = vpop.permute.xlu0 %1784  ;;  %v1822_v12 = vmul.f32 %v1819_v8, %v4661_v53 }
 0x3d0   :  { %v1953_v39 = vpop.permute.xlu1 %1952  ;;  %v1789_v37 = vadd.f32 %v1785_v62, %v1769_v54 }
 0x3d1   :  { %v1958_v60 = vadd.f32 %v1953_v39, %v1938_v7 }
 0x3d3   :  { %v1805_v3 = vpop.permute.xlu0 %1804  ;;  %v1973_v44 = vadd.f32 %v1971_v47, %v1958_v60 }
 0x3d4   :  { %v1988_v51 = vpop.permute.xlu1 %1987  ;;  %v1809_v55 = vadd.f32 %v1805_v3, %v1789_v37 }
 0x3d5   :  { %v1993_v26 = vadd.f32 %v1988_v51, %v1973_v44 }
 0x3d6   :  { %v1824_v9 = vadd.f32 %v1822_v12, %v1809_v55 }
 0x3d7   :  { %v2013_v27 = vadd.f32 %v2008_v49, %v1993_v26 }
 0x3d8   :  { %v2063_v5 = vpop.permute.xlu1 %2062 }
 0x3d9   :  { %v2033_v22 = vadd.f32 %v2028_v31, %v2013_v27 }
 0x3db   :  { %v2048_v3 = vadd.f32 %v2046_v56, %v2033_v22 }
 0x3dc   :  { %v2083_v0 = vpop.permute.xlu1 %2082 }
 0x3de   :  { %v1915_v43 = vpop.permute.xlu0 %1914 }
 0x3e0   :  { %v2103_v18 = vpop.permute.xlu1 %2102 }
 0x3e3   :  { %v1935_v7 = vpop.permute.xlu0 %1934 }
 0x3e4   :  { %v2138_v15 = vpop.permute.xlu1 %2137 }
 0x3e7   :  { %v1955_v37 = vpop.permute.xlu0 %1954 }
 0x3e8   :  { %v1840_v6 = vpop.permute.xlu1 %1839 }
 0x3e9   :  { %v1844_v50 = vadd.f32 %v1840_v6, %v1824_v9  ;;  %v2068_v9 = vadd.f32 %v2063_v5, %v2048_v3  ;;  %v2121_v5 = vmul.f32 %v4641_v41, %v4547_v58  ;;  %v5323_v3 = vmov 1  }
 0x3eb   :  { %v2088_v22 = vadd.f32 %v2083_v0, %v2068_v9  ;;  %v2122_v9 = vmul.f32 %v4763_v28, %v4709_v25 }
 0x3ec   :  { %v1860_v39 = vpop.permute.xlu1 %1859  ;;  %v1647_v8 = vpop.f32.mrb[16].mxu0 }
 0x3ed   :  { %v1864_v63 = vadd.f32 %v1860_v39, %v1844_v50  ;;  %v1653_v47 = vmax.f32 %v1647_v8, 1.0  ;;  %v3452_v11 = vpop.f32.mrb[17].mxu0  ;;  %v2108_v12 = vadd.f32 %v2103_v18, %v2088_v22 }
 0x3ee   :  { %v1650_v54 = vpop.f32.mrb[18].mxu0 }
 0x3ef   :  { %3743 = vrcp.f32 %v1653_v47  ;;  %v3453_v50 = vpop.f32.mrb[19].mxu0 }
 0x3f0   :  { %v1880_v40 = vpop.permute.xlu1 %1879 }
 0x3f1   :  { %v1884_v62 = vadd.f32 %v1880_v40, %v1864_v63  ;;  %v1972_v40 = vmul.f32 %v4758_v48, %v4686_v20  ;;  %v2123_v63 = vadd.f32 %v2121_v5, %v2108_v12  ;;  %v2047_v48 = vmul.f32 %v4761_v36, %v4693_v59 }
 0x3f3   :  { %v1899_v51 = vadd.f32 %v1897_v32, %v1884_v62 }
 0x3f4   :  { %v4784_v60 = vpop.permute.xlu1 %2268 }
 0x3f5   :  { %v1919_v49 = vadd.f32 %v1915_v43, %v1899_v51 }
 0x3f7   :  { %v1939_v31 = vadd.f32 %v1935_v7, %v1919_v49 }
 0x3f8   :  { %v2265_v44 = vpop.permute.xlu0 %2264  ;;  %v2213_v55 = vpop.permute.xlu1 %2212 }
 0x3f9   :  { %v1959_v57 = vadd.f32 %v1955_v37, %v1939_v31  ;;  %v3744_v39 = vpop.eup %3743  ;;  %v2143_v37 = vadd.f32 %v2138_v15, %v2123_v63  ;;  %v2196_v15 = vmul.f32 %v4629_v17, %v4679_v23  ;;  %v2271_v63 = vmul.f32 %v2265_v44, %v4728_v10  ;;  %v4817_v44 = vld [vmem:[%s5234_s9 + $0x8] sm:$0xff]  }
 0x3fa   :  { %1658 = vperm.xlu1 %3656, %v3744_v39   ;;  %3469 = vmatpush3.bf16.msra.mxu1 %v4817_v44 }
 0x3fb   :  { %v1974_v6 = vadd.f32 %v1972_v40, %v1959_v57  ;;  %v2163_v47 = vadd.f32 %v4771_v4, %v2143_v37  ;;  %v2197_v4 = vmul.f32 %v4765_v19, %v4717_v1  ;;  %3482 = vmatprep.subr.bf16.mxu1 %v5320_v21 }
 0x3fc   :  { %v2065_v33 = vpop.permute.xlu0 %2064  ;;  %v1990_v26 = vpop.permute.xlu1 %1989 }
 0x3fd   :  { %v1994_v7 = vadd.f32 %v1990_v26, %v1974_v6  ;;  %v2183_v50 = vadd.f32 %v4775_v14, %v2163_v47  ;;  %3471 = vmatmul.mubr.msk.bf16.vlgmr.msra.gmra.mrb[24].mxu1 %vm2392_vm7, %v4238_v61 }
 0x3fe   :  { %3657 = vset.pattern.permute.xlu1 %v5323_v3  ;;  %3484 = vmatprep.mubr.msk.bf16.mxu1 %vm3935_vm4, %v5320_v21 }
 0x3ff   :  { %v2198_v26 = vadd.f32 %v2196_v15, %v2183_v50 }
 0x400   :  { %v2085_v27 = vpop.permute.xlu0 %2084  ;;  %v2010_v43 = vpop.permute.xlu1 %2009 }
 0x401   :  { %v2014_v56 = vadd.f32 %v2010_v43, %v1994_v7  ;;  %v2218_v12 = vadd.f32 %v2213_v55, %v2198_v26 }
 0x404   :  { %v2105_v32 = vpop.permute.xlu0 %2104  ;;  %v2030_v62 = vpop.permute.xlu1 %2029 }
 0x405   :  { %v2034_v0 = vadd.f32 %v2030_v62, %v2014_v56 }
 0x407   :  { %v2049_v18 = vadd.f32 %v2047_v48, %v2034_v0 }
 0x408   :  { %v2215_v51 = vpop.permute.xlu0 %2214  ;;  %v2233_v8 = vpop.permute.xlu1 %2232 }
 0x409   :  { %v2069_v49 = vadd.f32 %v2065_v33, %v2049_v18  ;;  %v2238_v43 = vadd.f32 %v2233_v8, %v2218_v12 }
 0x40b   :  { %v2089_v41 = vadd.f32 %v2085_v27, %v2069_v49 }
 0x40c   :  { %v2235_v11 = vpop.permute.xlu0 %2234  ;;  %v2140_v54 = vpop.permute.xlu1 %2139 }
 0x40d   :  { %v2109_v31 = vadd.f32 %v2105_v32, %v2089_v41  ;;  %v2272_v32 = vmul.f32 %v4784_v60, %v4736_v38  ;;  %v4812_v60 = vld [vmem:[%s5233_s8] sm:$0xff]  }
 0x40f   :  { %v2124_v36 = vadd.f32 %v2122_v9, %v2109_v31 }
 0x410   :  { %v2160_v57 = vpop.permute.xlu1 %2159  ;;  %v2255_v22 = vpop.permute.xlu0 %2254 }
 0x411   :  { %v2144_v40 = vadd.f32 %v2140_v54, %v2124_v36  ;;  %v4839_v36 = vld [vmem:[%s5232_s7] ss:$0 sm:$0xff] }
 0x413   :  { %v2164_v33 = vadd.f32 %v2160_v57, %v2144_v40 }
 0x414   :  { %v2180_v6 = vpop.permute.xlu1 %2179  ;;  %v2290_v39 = vpop.permute.xlu0 %2289 }
 0x415   :  { %v2184_v27 = vadd.f32 %v2180_v6, %v2164_v33 }
 0x417   :  { %v2199_v28 = vadd.f32 %v2197_v4, %v2184_v27 }
 0x418   :  { %v2253_v5 = vpop.permute.xlu1 %2252  ;;  %v2310_v0 = vpop.permute.xlu0 %2309 }
 0x419   :  { %v2219_v14 = vadd.f32 %v2215_v51, %v2199_v28  ;;  %v2258_v7 = vadd.f32 %v2253_v5, %v2238_v43  ;;  %v4849_v43 = vld [vmem:[%s5235_s10] ss:$0 sm:$0xff]  ;;  %s3970_s10 = smov [#allocation14]  }
 0x41b   :  { %v2239_v56 = vadd.f32 %v2235_v11, %v2219_v14  ;;  %v2273_v48 = vadd.f32 %v2271_v63, %v2258_v7  ;;  %v4824_v11 = vld [vmem:[%s5233_s8 + $0x8] sm:$0xff]  }
 0x41c   :  { %v2288_v17 = vpop.permute.xlu1 %2287  ;;  %v2330_v47 = vpop.permute.xlu0 %2329 }
 0x41d   :  { %v2259_v62 = vadd.f32 %v2255_v22, %v2239_v56  ;;  %v2293_v18 = vadd.f32 %v2288_v17, %v2273_v48 }
 0x41f   :  { %v2274_v37 = vadd.f32 %v2272_v32, %v2259_v62 }
 0x420   :  { %v2308_v19 = vpop.permute.xlu1 %2307 }
 0x421   :  { %v2294_v55 = vadd.f32 %v2290_v39, %v2274_v37  ;;  %v2313_v49 = vadd.f32 %v2308_v19, %v2293_v18  ;;  %v4854_v37 = vld [vmem:[#allocation3] sm:$0xff] }
 0x423   :  { %v2314_v8 = vadd.f32 %v2310_v0, %v2294_v55 }
 0x424   :  { %v2328_v41 = vpop.permute.xlu1 %2327 }
 0x425   :  { %v2334_v51 = vadd.f32 %v2330_v47, %v2314_v8  ;;  %v2333_v54 = vadd.f32 %v2328_v41, %v2313_v49 }
 0x427   :  { %v2335_v9 = vpack.c.bf16 %v2334_v51, %v2333_v54 }
 0x429   :  { %3461 = vmatpush3.bf16.msra.mxu0 %v2335_v9 }
 0x42a   :  { %3474 = vmatprep.subr.bf16.mxu0 %v5320_v21 }
 0x42c   :  { %3463 = vmatmul.mubr.msk.bf16.vlgmr.msra.gmra.mrb[20].mxu0 %vm683_vm0, %v4560_v24 }
 0x42d   :  { %3478 = vmatprep.mubr.msk.bf16.mxu0 %vm3935_vm4, %v5320_v21  ;;  %3475 = vmatpush3.bf16.msra.mxu0 %v4812_v60 }
 0x42e   :  { %3476 = vmatprep.subr.bf16.mxu0 %v5320_v21 }
 0x431   :  { %3477 = vmatpush3.bf16.msra.mxu0 %v4824_v11 }
 0x432   :  { %3488 = vmatprep.subr.bf16.mxu0 %v5320_v21 }
 0x479   :  { %v4834_v31 = vpop.permute.xlu1 %1658 }
 0x4d0   :  { %v2429_v6 = vpop.f32.mrb[24].mxu1 }
 0x4d1   :  { %v3472_v4 = vpop.f32.mrb[25].mxu1 }
 0x4d2   :  { %v2432_v12 = vpop.f32.mrb[26].mxu1 }
 0x4d3   :  { %v3473_v27 = vpop.f32.mrb[27].mxu1 }
 0x4d4   :  { %v5328_v27 = vmov 15  }
 0x4ff   :  { %v2370_v50 = vpop.f32.mrb[20].mxu0 }
 0x500   :  { %v2376_v57 = vmul.f32 %v2370_v50, %v4834_v31  ;;  %v3464_v15 = vpop.f32.mrb[21].mxu0 }
 0x501   :  { %v2373_v40 = vpop.f32.mrb[22].mxu0 }
 0x502   :  { %v2377_v61 = vadd.f32 %v4839_v36, %v2376_v57  ;;  %v3465_v22 = vpop.f32.mrb[23].mxu0 }
 0x503   :  { %v5325_v22 = vmov 2  }
 0x504   :  { %v2378_v26 = vmax.f32 %v2377_v61, 0.0 }
 0x506   :  { %v2379_v33 = vpack.c.bf16 %v2378_v26, %v2378_v26 }
 0x508   :  { %3479 = vmatmul.mubr.msk.bf16.vlgmr.msra.gmra.mrb[24].mxu0 %vm2392_vm7, %v2379_v33  ;;  %v5326_v33 = vmov 11  }
 0x509   :  { %3490 = vmatprep.mubr.msk.bf16.mxu0 %vm3935_vm4, %v5320_v21 }
 0x5db   :  { %v2484_v28 = vpop.f32.mrb[24].mxu0 }
 0x5dc   :  { %v2485_v39 = vadd.f32 %v2484_v28, %v2429_v6  ;;  %v3480_v5 = vpop.f32.mrb[25].mxu0  ;;  %v5327_v6 = vmov 5   ;;  %v5329_v28 = vmov 19  }
 0x5dd   :  { %v2487_v14 = vpop.f32.mrb[26].mxu0  ;;  %v5331_v5 = vmov 27  }
 0x5de   :  { %v2490_v7 = vadd.f32 %v4849_v43, %v2485_v39  ;;  %v3481_v63 = vpop.f32.mrb[27].mxu0  ;;  %v5330_v39 = vmov 23   ;;  %v5332_v14 = vmov 30  }
 0x5df   :  { %v5334_v63 = vmov 17  }
 0x5e0   :  { %2498 = vrot.lane.b32.xlu0 %v2490_v7, %s3925_s18  ;;  %v3420_v56 = vmul.f32 -1.442695, %v2490_v7 }
 0x5e2   :  { %3745 = vpow2.f32 %v3420_v56  ;;  %v5335_v56 = vmov 16  }
 0x5ec   :  { %v3746_v17 = vpop.eup %3745 }
 0x5ed   :  { %v2494_v32 = vadd.f32 1.0, %v3746_v17  ;;  %v5336_v17 = vmov 24  }
 0x5ef   :  { %3747 = vrcp.f32 %v2494_v32  ;;  %v5337_v32 = vmov 21  }
 0x5f9   :  { %v3748_v62 = vpop.eup %3747 }
 0x5fa   :  { %v2508_v49 = vsub.f32 1.0, %v3748_v62 }
 0x652   :  { %v2499_v48 = vpop.permute.xlu0 %2498 }
 0x653   :  { %v2501_v0 = vmul.f32 %v3748_v62, %v2499_v48  ;;  %v5339_v48 = vmov 25  }
 0x655   :  { %2503 = vrot.lane.b32.xlu1 %v2501_v0, %s3928_s0  ;;  %v5340_v0 = vmov 26  }
 0x659   :  { %2515 = vrot.lane.b32.xlu1 %v4854_v37, %s3925_s18 }
 0x6c7   :  { %v2504_v19 = vpop.permute.xlu1 %2503 }
 0x6c8   :  { %v2506_v55 = vadd.f32 %v2504_v19, %v2490_v7  ;;  %v5333_v7 = vmov 8   ;;  %v5342_v19 = vmov 0  }
 0x6ca   :  { %3749 = vtanh.f32 %v2506_v55  ;;  %v5345_v55 = vmov 12  }
 0x6cb   :  { %v2516_v8 = vpop.permute.xlu1 %2515 }
 0x6cc   :  { %v2518_v41 = vmul.f32 %v3748_v62, %v2516_v8  ;;  %v5338_v62 = vmov 22   ;;  %v5347_v8 = vmov 3  }
 0x6d4   :  { %v3750_v18 = vpop.eup %3749 }
 0x6d5   :  { %2510 = vrot.lane.b32.xlu0 %v3750_v18, %s3969_s1  ;;  %v5346_v18 = vmov 20  }
 0x747   :  { %v2511_v47 = vpop.permute.xlu0 %2510 }
 0x748   :  { %v2513_v51 = vmul.f32 %v2511_v47, %v2508_v49  ;;  %v5348_v49 = vmov 28  }
 0x74a   :  { %v4859_v54 = vadd.f32 %v2518_v41, %v2513_v51  ;;  %v5349_v51 = vld [vmem:[#allocation22_spill] sm:$0xff] }
 0x74c   :  { %v2526_v9 = vpack.c.bf16 %v4859_v54, %v4859_v54 }
 0x74e   :  { %2528 = vrot.lane.b32.xlu0 %v2526_v9, %s3969_s1 }
 0x7c0   :  { %v2529_v50 = vpop.permute.xlu0 %2528 }
 0x7c1   :  { %v2531_v57 = vsel %vm1690_vm1, %v2529_v50, 0 }
 0x7c2   :  { %3483 = vmatpush3.bf16.msra.mxu1 %v2531_v57 }
 0x7c3   :  { %3494 = vmatprep.subr.bf16.mxu1 %v5320_v21 }
 0x7c5   :  { %3485 = vmatmul.mubr.msk.bf16.vlgmr.msra.gmra.mrb[28].mxu1 %vm1686_vm5, %v4260_v2 }
 0x7c6   :  { %3495 = vmatpush3.bf16.msra.mxu1 %v4755_v45  ;;  %3498 = vmatprep.mubr.msk.bf16.mxu1 %vm3935_vm4, %v5320_v21  ;;  %v5324_v45 = vmov 7  }
 0x7c7   :  { %3496 = vmatprep.subr.bf16.mxu1 %v5320_v21 }
 0x7ca   :  { %3497 = vmatpush3.bf16.msra.mxu1 %v4817_v44 }
 0x7cd   :  { %3499 = vmatmul.mubr.msk.bf16.vlgmr.msra.gmra.mrb[32].mxu1 %vm2392_vm7, %v2529_v50 }
 0x898   :  { %v4874_v15 = vpop.f32.mrb[28].mxu1 }
 0x899   :  { %2627 = vperm.xlu0 %3659, %v4874_v15   ;;  %2587 = vperm.xlu1 %3657, %v4874_v15   ;;  %v3486_v40 = vpop.f32.mrb[29].mxu1 }
 0x89a   :  { %v4878_v61 = vpop.f32.mrb[30].mxu1 }
 0x89b   :  { %v3487_v2 = vpop.f32.mrb[31].mxu1 }
 0x89d   :  { %3662 = vset.pattern.permute.xlu0 %v5324_v45  ;;  %3658 = vset.pattern.permute.xlu1 %v5325_v22 }
 0x89e   :  { %2699 = vperm.xlu0 %3662, %v4874_v15   ;;  %2607 = vperm.xlu1 %3658, %v4874_v15  }
 0x8a0   :  { %v4884_v44 = vpop.f32.mrb[32].mxu1 }
 0x8a1   :  { %v3500_v26 = vpop.f32.mrb[33].mxu1 }
 0x8a2   :  { %3665 = vset.pattern.permute.xlu0 %v5326_v33  ;;  %3660 = vset.pattern.permute.xlu1 %v5327_v6  ;;  %v3234_v4 = vpop.f32.mrb[34].mxu1 }
 0x8a3   :  { %2771 = vperm.xlu0 %3665, %v4874_v15   ;;  %2659 = vperm.xlu1 %3660, %v4874_v15   ;;  %v3501_v12 = vpop.f32.mrb[35].mxu1 }
 0x8a7   :  { %3668 = vset.pattern.permute.xlu0 %v5328_v27  ;;  %3661 = vset.pattern.permute.xlu1 %v5310_v34 }
 0x8a8   :  { %2843 = vperm.xlu0 %3668, %v4874_v15   ;;  %2679 = vperm.xlu1 %3661, %v4874_v15  }
 0x8ac   :  { %3671 = vset.pattern.permute.xlu0 %v5329_v28  ;;  %3663 = vset.pattern.permute.xlu1 %v5311_v35 }
 0x8ad   :  { %2915 = vperm.xlu0 %3671, %v4874_v15   ;;  %2731 = vperm.xlu1 %3663, %v4874_v15  }
 0x8b1   :  { %3674 = vset.pattern.permute.xlu0 %v5330_v39  ;;  %3664 = vset.pattern.permute.xlu1 %v5312_v42 }
 0x8b2   :  { %2987 = vperm.xlu0 %3674, %v4874_v15   ;;  %2751 = vperm.xlu1 %3664, %v4874_v15  }
 0x8b6   :  { %3677 = vset.pattern.permute.xlu0 %v5331_v5  ;;  %3666 = vset.pattern.permute.xlu1 %v5313_v46 }
 0x8b7   :  { %3059 = vperm.xlu0 %3677, %v4874_v15   ;;  %2803 = vperm.xlu1 %3666, %v4874_v15  }
 0x8bb   :  { %3680 = vset.pattern.permute.xlu0 %v5332_v14  ;;  %3667 = vset.pattern.permute.xlu1 %v5315_v29 }
 0x8bc   :  { %3111 = vperm.xlu0 %3680, %v4874_v15   ;;  %2823 = vperm.xlu1 %3667, %v4874_v15  }
 0x8c0   :  { %3683 = vset.pattern.permute.xlu0 %v5333_v7  ;;  %3669 = vset.pattern.permute.xlu1 %v5334_v63 }
 0x8c1   :  { %2719 = vperm.xlu0 %3683, %v4874_v15   ;;  %2875 = vperm.xlu1 %3669, %v4874_v15  }
 0x8c5   :  { %3685 = vset.pattern.permute.xlu0 %v5335_v56  ;;  %3670 = vset.pattern.permute.xlu1 %v5316_v30 }
 0x8c6   :  { %2863 = vperm.xlu0 %3685, %v4874_v15   ;;  %2895 = vperm.xlu1 %3670, %v4874_v15  }
 0x8ca   :  { %3687 = vset.pattern.permute.xlu0 %v5336_v17  ;;  %3672 = vset.pattern.permute.xlu1 %v5337_v32 }
 0x8cb   :  { %3007 = vperm.xlu0 %3687, %v4874_v15   ;;  %2947 = vperm.xlu1 %3672, %v4874_v15  }
 0x8cf   :  { %3688 = vset.pattern.permute.xlu0 %v5323_v3  ;;  %3673 = vset.pattern.permute.xlu1 %v5338_v62  ;;  %v5341_v3 = vmov 29  }
 0x8d0   :  { %2967 = vperm.xlu1 %3673, %v4874_v15   ;;  %2591 = vperm.xlu0 %3688, %v4878_v61  }
 0x8d4   :  { %3675 = vset.pattern.permute.xlu1 %v5339_v48  ;;  %3691 = vset.pattern.permute.xlu0 %v5327_v6  ;;  %v5350_v6 = vld [vmem:[#allocation23_spill] sm:$0xff] }
 0x8d5   :  { %3019 = vperm.xlu1 %3675, %v4874_v15   ;;  %2663 = vperm.xlu0 %3691, %v4878_v61  }
 0x8d9   :  { %3676 = vset.pattern.permute.xlu1 %v5340_v0  ;;  %3694 = vset.pattern.permute.xlu0 %v5311_v35  ;;  %v5343_v35 = vmov 31  }
 0x8da   :  { %3039 = vperm.xlu1 %3676, %v4874_v15   ;;  %2735 = vperm.xlu0 %3694, %v4878_v61  }
 0x8de   :  { %3678 = vset.pattern.permute.xlu1 %v5341_v3  ;;  %3697 = vset.pattern.permute.xlu0 %v5313_v46  ;;  %v5344_v46 = vmov 4  }
 0x8df   :  { %3091 = vperm.xlu1 %3678, %v4874_v15   ;;  %2807 = vperm.xlu0 %3697, %v4878_v61  }
 0x8e3   :  { %3679 = vset.pattern.permute.xlu1 %v5342_v19  ;;  %3700 = vset.pattern.permute.xlu0 %v5334_v63 }
 0x8e4   :  { %2576 = vperm.xlu1 %3679, %v4874_v15   ;;  %2879 = vperm.xlu0 %3700, %v4878_v61  }
 0x8e8   :  { %3681 = vset.pattern.permute.xlu1 %v5343_v35  ;;  %3703 = vset.pattern.permute.xlu0 %v5337_v32 }
 0x8e9   :  { %3131 = vperm.xlu1 %3681, %v4874_v15   ;;  %2951 = vperm.xlu0 %3703, %v4878_v61  }
 0x8ed   :  { %3682 = vset.pattern.permute.xlu1 %v5344_v46  ;;  %3706 = vset.pattern.permute.xlu0 %v5339_v48 }
 0x8ee   :  { %2647 = vperm.xlu1 %3682, %v4874_v15   ;;  %3023 = vperm.xlu0 %3706, %v4878_v61  }
 0x8f2   :  { %3684 = vset.pattern.permute.xlu1 %v5345_v55  ;;  %3709 = vset.pattern.permute.xlu0 %v5341_v3 }
 0x8f3   :  { %2791 = vperm.xlu1 %3684, %v4874_v15   ;;  %3095 = vperm.xlu0 %3709, %v4878_v61  }
 0x8f7   :  { %3686 = vset.pattern.permute.xlu1 %v5346_v18  ;;  %3712 = vset.pattern.permute.xlu0 %v5343_v35 }
 0x8f8   :  { %2935 = vperm.xlu1 %3686, %v4874_v15   ;;  %3135 = vperm.xlu0 %3712, %v4878_v61  }
 0x8fc   :  { %3689 = vset.pattern.permute.xlu1 %v5325_v22  ;;  %3715 = vset.pattern.permute.xlu0 %v5345_v55 }
 0x8fd   :  { %2611 = vperm.xlu1 %3689, %v4878_v61   ;;  %2795 = vperm.xlu0 %3715, %v4878_v61  }
 0x901   :  { %3690 = vset.pattern.permute.xlu1 %v5347_v8  ;;  %3717 = vset.pattern.permute.xlu0 %v5346_v18 }
 0x902   :  { %2631 = vperm.xlu1 %3690, %v4878_v61   ;;  %2939 = vperm.xlu0 %3717, %v4878_v61  }
 0x906   :  { %3692 = vset.pattern.permute.xlu1 %v5310_v34  ;;  %3720 = vset.pattern.permute.xlu0 %v5348_v49 }
 0x907   :  { %2683 = vperm.xlu1 %3692, %v4878_v61  }
 0x90b   :  { %3693 = vset.pattern.permute.xlu1 %v5324_v45 }
 0x90c   :  { %2703 = vperm.xlu1 %3693, %v4878_v61  }
 0x910   :  { %3695 = vset.pattern.permute.xlu1 %v5312_v42 }
 0x911   :  { %2755 = vperm.xlu1 %3695, %v4878_v61  }
 0x915   :  { %3696 = vset.pattern.permute.xlu1 %v5326_v33 }
 0x916   :  { %2775 = vperm.xlu1 %3696, %v4878_v61  }
 0x918   :  { %v2628_v47 = vpop.permute.xlu0 %2627  ;;  %v2588_v41 = vpop.permute.xlu1 %2587 }
 0x919   :  { %v2594_v34 = vmul.f32 %v2588_v41, %v5349_v51  ;;  %v2634_v57 = vmul.f32 %v2628_v47, %v5349_v51 }
 0x91a   :  { %3698 = vset.pattern.permute.xlu1 %v5315_v29 }
 0x91b   :  { %2827 = vperm.xlu1 %3698, %v4878_v61   ;;  %2598 = vrot.lane.b32.xlu0 %v2594_v34, %s3969_s1 }
 0x91d   :  { %v4979_v9 = vpop.permute.xlu0 %2699  ;;  %v2608_v50 = vpop.permute.xlu1 %2607 }
 0x91e   :  { %v2614_v42 = vmul.f32 %v2608_v50, %v5349_v51 }
 0x91f   :  { %3699 = vset.pattern.permute.xlu1 %v5328_v27 }
 0x920   :  { %2847 = vperm.xlu1 %3699, %v4878_v61   ;;  %2618 = vrot.lane.b32.xlu0 %v2614_v42, %s3928_s0 }
 0x922   :  { %v2772_v40 = vpop.permute.xlu0 %2771  ;;  %v2660_v2 = vpop.permute.xlu1 %2659 }
 0x923   :  { %v2778_v12 = vmul.f32 %v2772_v40, %v5350_v6 }
 0x924   :  { %3701 = vset.pattern.permute.xlu1 %v5316_v30  ;;  %2638 = vrot.lane.b32.xlu0 %v2634_v57, %s3925_s18 }
 0x925   :  { %2899 = vperm.xlu1 %3701, %v4878_v61  }
 0x927   :  { %v4989_v29 = vpop.permute.xlu0 %2843  ;;  %v2680_v45 = vpop.permute.xlu1 %2679 }
 0x929   :  { %3702 = vset.pattern.permute.xlu1 %v5329_v28 }
 0x92a   :  { %2919 = vperm.xlu1 %3702, %v4878_v61  }
 0x92c   :  { %v2916_v22 = vpop.permute.xlu0 %2915  ;;  %v2732_v26 = vpop.permute.xlu1 %2731 }
 0x92d   :  { %v2738_v40 = vmul.f32 %v2732_v26, %v5350_v6 }
 0x92e   :  { %3704 = vset.pattern.permute.xlu1 %v5338_v62 }
 0x92f   :  { %2971 = vperm.xlu1 %3704, %v4878_v61  }
 0x931   :  { %v4995_v33 = vpop.permute.xlu0 %2987  ;;  %v2752_v30 = vpop.permute.xlu1 %2751 }
 0x932   :  { %v2758_v4 = vmul.f32 %v2752_v30, %v5350_v6 }
 0x933   :  { %3705 = vset.pattern.permute.xlu1 %v5330_v39 }
 0x934   :  { %2991 = vperm.xlu1 %3705, %v4878_v61   ;;  %2762 = vrot.lane.b32.xlu0 %v2758_v4, %s3928_s0 }
 0x936   :  { %v5002_v27 = vpop.permute.xlu0 %3059  ;;  %v2804_v28 = vpop.permute.xlu1 %2803 }
 0x938   :  { %3707 = vset.pattern.permute.xlu1 %v5340_v0  ;;  %2782 = vrot.lane.b32.xlu0 %v2778_v12, %s3925_s18 }
 0x939   :  { %3043 = vperm.xlu1 %3707, %v4878_v61  }
 0x93b   :  { %v5007_v63 = vpop.permute.xlu0 %3111  ;;  %v2824_v32 = vpop.permute.xlu1 %2823 }
 0x93d   :  { %3708 = vset.pattern.permute.xlu1 %v5331_v5  ;;  %v2922_v5 = vmul.f32 %v2916_v22, %v4638_v13 }
 0x93e   :  { %3063 = vperm.xlu1 %3708, %v4878_v61  }
 0x940   :  { %v5011_v39 = vpop.permute.xlu0 %2719  ;;  %v2876_v62 = vpop.permute.xlu1 %2875 }
 0x941   :  { %v2882_v26 = vmul.f32 %v2876_v62, %v4638_v13 }
 0x942   :  { %3710 = vset.pattern.permute.xlu1 %v5342_v19 }
 0x943   :  { %2581 = vperm.xlu1 %3710, %v4878_v61  }
 0x945   :  { %v5015_v48 = vpop.permute.xlu0 %2863  ;;  %v2896_v0 = vpop.permute.xlu1 %2895 }
 0x946   :  { %v2902_v3 = vmul.f32 %v2896_v0, %v4638_v13 }
 0x947   :  { %3711 = vset.pattern.permute.xlu1 %v5332_v14 }
 0x948   :  { %3115 = vperm.xlu1 %3711, %v4878_v61   ;;  %2906 = vrot.lane.b32.xlu0 %v2902_v3, %s3928_s0 }
 0x94a   :  { %v5022_v55 = vpop.permute.xlu0 %3007  ;;  %v2948_v18 = vpop.permute.xlu1 %2947 }
 0x94c   :  { %3713 = vset.pattern.permute.xlu1 %v5344_v46  ;;  %2926 = vrot.lane.b32.xlu0 %v2922_v5, %s3925_s18 }
 0x94d   :  { %2651 = vperm.xlu1 %3713, %v4878_v61  }
 0x94f   :  { %v2968_v19 = vpop.permute.xlu1 %2967  ;;  %v2592_v8 = vpop.permute.xlu0 %2591 }
 0x950   :  { %v2974_v0 = vmul.f32 %v2968_v19, %v4547_v58  ;;  %v2595_v62 = vmul.f32 %v2592_v8, %v4635_v16 }
 0x951   :  { %3714 = vset.pattern.permute.xlu1 %v5333_v7  ;;  %v5351_v7 = vld [vmem:[#allocation20_spill] sm:$0xff] }
 0x952   :  { %2723 = vperm.xlu1 %3714, %v4878_v61   ;;  %v2666_v34 = vmul.f32 %v2660_v2, %v5351_v7  ;;  %v2706_v57 = vmul.f32 %v4979_v9, %v5351_v7 }
 0x954   :  { %v5029_v14 = vpop.permute.xlu1 %3019  ;;  %v2664_v47 = vpop.permute.xlu0 %2663 }
 0x955   :  { %v2667_v41 = vmul.f32 %v2664_v47, %v4661_v53 }
 0x956   :  { %3716 = vset.pattern.permute.xlu1 %v5335_v56  ;;  %v2686_v56 = vmul.f32 %v2680_v45, %v5351_v7 }
 0x957   :  { %2867 = vperm.xlu1 %3716, %v4878_v61   ;;  %2672 = vrot.lane.b32.xlu0 %v2667_v41, %s3969_s1 }
 0x959   :  { %v5035_v46 = vpop.permute.xlu1 %3039 }
 0x95b   :  { %3718 = vset.pattern.permute.xlu1 %v5336_v17 }
 0x95c   :  { %3011 = vperm.xlu1 %3718, %v4878_v61  }
 0x95e   :  { %v5040_v50 = vpop.permute.xlu1 %3091 }
 0x960   :  { %2670 = vrot.lane.b32.xlu1 %v2666_v34, %s3969_s1 }
 0x961   :  { %3719 = vset.pattern.permute.xlu1 %v5348_v49  ;;  %v5352_v49 = vld [vmem:[#allocation21_spill] sm:$0xff] }
 0x962   :  { %v2810_v22 = vmul.f32 %v2804_v28, %v5352_v49  ;;  %v2830_v45 = vmul.f32 %v2824_v32, %v5352_v49  ;;  %v2850_v9 = vmul.f32 %v4989_v29, %v5352_v49  ;;  %v2954_v28 = vmul.f32 %v2948_v18, %v4547_v58  ;;  %v2736_v18 = vpop.permute.xlu0 %2735 }
 0x963   :  { %v5045_v42 = vpop.permute.xlu1 %2576  ;;  %v2994_v29 = vmul.f32 %v4995_v33, %v4547_v58 }
 0x964   :  { %2690 = vrot.lane.b32.xlu1 %v2686_v56, %s3928_s0 }
 0x966   :  { %v2808_v34 = vpop.permute.xlu0 %2807 }
 0x967   :  { %v2811_v8 = vmul.f32 %v2808_v34, %v4686_v20  ;;  %v3066_v34 = vmul.f32 %v5002_v27, %v4679_v23  ;;  %v3118_v27 = vmul.f32 %v5007_v63, %v4728_v10 }
 0x968   :  { %v5050_v17 = vpop.permute.xlu1 %3131  ;;  %2710 = vrot.lane.b32.xlu1 %v2706_v57, %s3925_s18 }
 0x96c   :  { %2742 = vrot.lane.b32.xlu1 %v2738_v40, %s3969_s1  ;;  %v2739_v40 = vmul.f32 %v2736_v18, %v4666_v52 }
 0x96d   :  { %v5055_v2 = vpop.permute.xlu1 %2647 }
 0x970   :  { %2814 = vrot.lane.b32.xlu1 %v2810_v22, %s3969_s1 }
 0x972   :  { %v5060_v30 = vpop.permute.xlu1 %2791 }
 0x974   :  { %2834 = vrot.lane.b32.xlu1 %v2830_v45, %s3928_s0 }
 0x977   :  { %v5065_v4 = vpop.permute.xlu1 %2935 }
 0x978   :  { %2854 = vrot.lane.b32.xlu1 %v2850_v9, %s3925_s18  ;;  %v2880_v9 = vpop.permute.xlu0 %2879 }
 0x97c   :  { %2886 = vrot.lane.b32.xlu1 %v2882_v26, %s3969_s1  ;;  %v2612_v12 = vpop.permute.xlu1 %2611 }
 0x97d   :  { %v2615_v19 = vmul.f32 %v2612_v12, %v4635_v16 }
 0x980   :  { %2958 = vrot.lane.b32.xlu1 %v2954_v28, %s3969_s1 }
 0x981   :  { %v2632_v32 = vpop.permute.xlu1 %2631 }
 0x982   :  { %v2635_v56 = vmul.f32 %v2632_v32, %v4635_v16  ;;  %v2952_v32 = vpop.permute.xlu0 %2951 }
 0x984   :  { %2978 = vrot.lane.b32.xlu1 %v2974_v0, %s3928_s0  ;;  %v3026_v0 = vmul.f32 %v5029_v14, %v4679_v23 }
 0x986   :  { %v2684_v3 = vpop.permute.xlu1 %2683 }
 0x987   :  { %v2687_v5 = vmul.f32 %v2684_v3, %v4661_v53 }
 0x988   :  { %2998 = vrot.lane.b32.xlu1 %v2994_v29, %s3925_s18  ;;  %v2955_v29 = vmul.f32 %v2952_v32, %v4709_v25 }
 0x989   :  { %2692 = vrot.lane.b32.xlu0 %v2687_v5, %s3928_s0  ;;  %v2883_v5 = vmul.f32 %v2880_v9, %v4693_v59 }
 0x98b   :  { %v2704_v47 = vpop.permute.xlu1 %2703 }
 0x98c   :  { %v2707_v41 = vmul.f32 %v2704_v47, %v4661_v53  ;;  %2600 = vrot.lane.b32.xlu1 %v2595_v62, %s3969_s1  ;;  %v3024_v47 = vpop.permute.xlu0 %3023 }
 0x98e   :  { %2712 = vrot.lane.b32.xlu0 %v2707_v41, %s3925_s18 }
 0x990   :  { %v2756_v33 = vpop.permute.xlu1 %2755  ;;  %2620 = vrot.lane.b32.xlu1 %v2615_v19, %s3928_s0 }
 0x992   :  { %3083 = vperm.xlu0 %3720, %v4878_v61   ;;  %v2759_v61 = vmul.f32 %v2756_v33, %v4666_v52  ;;  %v3027_v33 = vmul.f32 %v3024_v47, %v4717_v1 }
 0x994   :  { %2640 = vrot.lane.b32.xlu1 %v2635_v56, %s3925_s18 }
 0x995   :  { %v2776_v57 = vpop.permute.xlu1 %2775 }
 0x996   :  { %2816 = vrot.lane.b32.xlu0 %v2811_v8, %s3969_s1  ;;  %v3096_v8 = vpop.permute.xlu0 %3095 }
 0x997   :  { %3721 = vset.pattern.permute.xlu0 %v5343_v35  ;;  %v2779_v35 = vmul.f32 %v2776_v57, %v4666_v52  ;;  %v3099_v9 = vmul.f32 %v3096_v8, %v4736_v38 }
 0x998   :  { %3079 = vperm.xlu1 %3719, %v4874_v15   ;;  %v3046_v15 = vmul.f32 %v5035_v46, %v4679_v23 }
 0x99a   :  { %v2828_v22 = vpop.permute.xlu1 %2827 }
 0x99b   :  { %v2831_v45 = vmul.f32 %v2828_v22, %v4686_v20 }
 0x99c   :  { %2744 = vrot.lane.b32.xlu1 %v2739_v40, %s3969_s1  ;;  %v3098_v40 = vmul.f32 %v5040_v50, %v4728_v10  ;;  %v3138_v50 = vmul.f32 %v5050_v17, %v4728_v10 }
 0x99d   :  { %2836 = vrot.lane.b32.xlu0 %v2831_v45, %s3928_s0 }
 0x99f   :  { %v2848_v26 = vpop.permute.xlu1 %2847 }
 0x9a0   :  { %v2851_v12 = vmul.f32 %v2848_v26, %v4686_v20  ;;  %2764 = vrot.lane.b32.xlu1 %v2759_v61, %s3928_s0  ;;  %v3136_v61 = vpop.permute.xlu0 %3135 }
 0x9a2   :  { %2856 = vrot.lane.b32.xlu0 %v2851_v12, %s3925_s18 }
 0x9a4   :  { %v2900_v28 = vpop.permute.xlu1 %2899  ;;  %2784 = vrot.lane.b32.xlu1 %v2779_v35, %s3925_s18  ;;  %v5141_v12 = vpop.permute.xlu0 %2795 }
 0x9a5   :  { %v2903_v46 = vmul.f32 %v2900_v28, %v4693_v59  ;;  %v3139_v28 = vmul.f32 %v3136_v61, %v4736_v38 }
 0x9a6   :  { %3050 = vrot.lane.b32.xlu0 %v3046_v15, %s3928_s0 }
 0x9a8   :  { %3030 = vrot.lane.b32.xlu1 %v3026_v0, %s3969_s1  ;;  %v5146_v15 = vpop.permute.xlu0 %2939 }
 0x9a9   :  { %v2920_v3 = vpop.permute.xlu1 %2919 }
 0x9aa   :  { %2960 = vrot.lane.b32.xlu0 %v2955_v29, %s3969_s1  ;;  %v2923_v14 = vmul.f32 %v2920_v3, %v4693_v59 }
 0x9ac   :  { %2888 = vrot.lane.b32.xlu1 %v2883_v5, %s3969_s1  ;;  %v2599_v17 = vpop.permute.xlu0 %2598  ;;  %v2584_v5 = vmul.f32 %v5045_v42, %v5349_v51 }
 0x9ae   :  { %v2972_v62 = vpop.permute.xlu1 %2971 }
 0x9af   :  { %v2975_v18 = vmul.f32 %v2972_v62, %v4709_v25 }
 0x9b0   :  { %2908 = vrot.lane.b32.xlu1 %v2903_v46, %s3928_s0  ;;  %v2619_v29 = vpop.permute.xlu0 %2618  ;;  %v2604_v46 = vadd.f32 %v2599_v17, %v2584_v5 }
 0x9b1   :  { %2980 = vrot.lane.b32.xlu0 %v2975_v18, %s3928_s0 }
 0x9b3   :  { %v2992_v41 = vpop.permute.xlu1 %2991 }
 0x9b4   :  { %v2995_v19 = vmul.f32 %v2992_v41, %v4709_v25  ;;  %2928 = vrot.lane.b32.xlu1 %v2923_v14, %s3925_s18  ;;  %v2639_v62 = vpop.permute.xlu0 %2638  ;;  %v2624_v14 = vadd.f32 %v2619_v29, %v2604_v46 }
 0x9b6   :  { %3000 = vrot.lane.b32.xlu0 %v2995_v19, %s3925_s18  ;;  %v2644_v47 = vadd.f32 %v2639_v62, %v2624_v14  ;;  %v2654_v19 = vmul.f32 %v5055_v2, %v5351_v7 }
 0x9b8   :  { %v3044_v56 = vpop.permute.xlu1 %3043  ;;  %3032 = vrot.lane.b32.xlu1 %v3027_v33, %s3969_s1  ;;  %v2656_v33 = vadd.f32 %v2654_v19, %v2644_v47  ;;  %v2763_v51 = vpop.permute.xlu0 %2762 }
 0x9b9   :  { %v3047_v57 = vmul.f32 %v3044_v56, %v4717_v1 }
 0x9ba   :  { %3070 = vrot.lane.b32.xlu0 %v3066_v34, %s3925_s18 }
 0x9bc   :  { %3052 = vrot.lane.b32.xlu1 %v3047_v57, %s3928_s0 }
 0x9bd   :  { %v3064_v22 = vpop.permute.xlu1 %3063 }
 0x9be   :  { %v3067_v45 = vmul.f32 %v3064_v22, %v4717_v1  ;;  %3102 = vrot.lane.b32.xlu0 %v3098_v40, %s3969_s1  ;;  %v2726_v40 = vmul.f32 %v5011_v39, %v5350_v6  ;;  %v2870_v6 = vmul.f32 %v5015_v48, %v4638_v13  ;;  %v3014_v13 = vmul.f32 %v5022_v55, %v4679_v23 }
 0x9c0   :  { %3072 = vrot.lane.b32.xlu1 %v3067_v45, %s3925_s18 }
 0x9c2   :  { %v5135_v26 = vpop.permute.xlu1 %2581  ;;  %3122 = vrot.lane.b32.xlu0 %v3118_v27, %s3928_s0 }
 0x9c4   :  { %3104 = vrot.lane.b32.xlu1 %v3099_v9, %s3969_s1  ;;  %v2783_v9 = vpop.permute.xlu0 %2782 }
 0x9c6   :  { %3142 = vrot.lane.b32.xlu0 %v3138_v50, %s3925_s18 }
 0x9c7   :  { %v3116_v35 = vpop.permute.xlu1 %3115 }
 0x9c8   :  { %v3119_v63 = vmul.f32 %v3116_v35, %v4736_v38  ;;  %v2798_v35 = vmul.f32 %v5060_v30, %v5352_v49  ;;  %v2907_v5 = vpop.permute.xlu0 %2906  ;;  %v2942_v49 = vmul.f32 %v5065_v4, %v4547_v58 }
 0x9ca   :  { %3124 = vrot.lane.b32.xlu1 %v3119_v63, %s3928_s0 }
 0x9cc   :  { %v5149_v32 = vpop.permute.xlu1 %2651 }
 0x9ce   :  { %3144 = vrot.lane.b32.xlu1 %v3139_v28, %s3925_s18 }
 0x9d1   :  { %v5152_v0 = vpop.permute.xlu1 %2723 }
 0x9d6   :  { %v5154_v3 = vpop.permute.xlu1 %2867 }
 0x9db   :  { %v5158_v18 = vpop.permute.xlu1 %3011 }
 0x9df   :  { %v2671_v41 = vpop.permute.xlu1 %2670 }
 0x9e0   :  { %v2676_v56 = vadd.f32 %v2671_v41, %v2656_v33  ;;  %v2927_v41 = vpop.permute.xlu0 %2926 }
 0x9e3   :  { %v2691_v34 = vpop.permute.xlu1 %2690 }
 0x9e4   :  { %v2696_v8 = vadd.f32 %v2691_v34, %v2676_v56  ;;  %v2673_v34 = vpop.permute.xlu0 %2672 }
 0x9e7   :  { %v2711_v57 = vpop.permute.xlu1 %2710 }
 0x9e8   :  { %v2716_v22 = vadd.f32 %v2711_v57, %v2696_v8 }
 0x9ea   :  { %v2728_v42 = vadd.f32 %v2726_v40, %v2716_v22 }
 0x9eb   :  { %v2743_v45 = vpop.permute.xlu1 %2742 }
 0x9ec   :  { %v2748_v61 = vadd.f32 %v2743_v45, %v2728_v42 }
 0x9ee   :  { %v2768_v27 = vadd.f32 %v2763_v51, %v2748_v61  ;;  %v2585_v61 = vmul.f32 %v5135_v26, %v4635_v16 }
 0x9ef   :  { %v2815_v50 = vpop.permute.xlu1 %2814 }
 0x9f0   :  { %v2788_v7 = vadd.f32 %v2783_v9, %v2768_v27 }
 0x9f2   :  { %v2800_v2 = vadd.f32 %v2798_v35, %v2788_v7  ;;  %v2655_v35 = vmul.f32 %v5149_v32, %v4661_v53  ;;  %v2799_v53 = vmul.f32 %v5141_v12, %v4686_v20  ;;  %v2943_v20 = vmul.f32 %v5146_v15, %v4709_v25 }
 0x9f3   :  { %v2835_v63 = vpop.permute.xlu1 %2834 }
 0x9f4   :  { %v2820_v28 = vadd.f32 %v2815_v50, %v2800_v2 }
 0x9f6   :  { %v2840_v17 = vadd.f32 %v2835_v63, %v2820_v28 }
 0x9f7   :  { %v2855_v29 = vpop.permute.xlu1 %2854 }
 0x9f8   :  { %v2860_v39 = vadd.f32 %v2855_v29, %v2840_v17 }
 0x9fa   :  { %v2872_v46 = vadd.f32 %v2870_v6, %v2860_v39  ;;  %v2727_v6 = vmul.f32 %v5152_v0, %v4666_v52  ;;  %v2871_v52 = vmul.f32 %v5154_v3, %v4693_v59  ;;  %v3015_v59 = vmul.f32 %v5158_v18, %v4717_v1 }
 0x9fb   :  { %v2887_v62 = vpop.permute.xlu1 %2886  ;;  %v2693_v40 = vpop.permute.xlu0 %2692 }
 0x9fc   :  { %v2892_v14 = vadd.f32 %v2887_v62, %v2872_v46 }
 0x9fe   :  { %v2912_v47 = vadd.f32 %v2907_v5, %v2892_v14 }
 0x9ff   :  { %v2959_v19 = vpop.permute.xlu1 %2958 }
 0xa00   :  { %v2932_v30 = vadd.f32 %v2927_v41, %v2912_v47  ;;  %v2713_v45 = vpop.permute.xlu0 %2712 }
 0xa02   :  { %v2944_v33 = vadd.f32 %v2942_v49, %v2932_v30 }
 0xa03   :  { %v2979_v56 = vpop.permute.xlu1 %2978 }
 0xa04   :  { %v2964_v8 = vadd.f32 %v2959_v19, %v2944_v33 }
 0xa06   :  { %v2984_v57 = vadd.f32 %v2979_v56, %v2964_v8 }
 0xa07   :  { %v2999_v22 = vpop.permute.xlu1 %2998 }
 0xa08   :  { %v3004_v48 = vadd.f32 %v2999_v22, %v2984_v57 }
 0xa0a   :  { %v3016_v51 = vadd.f32 %v3014_v13, %v3004_v48 }
 0xa0b   :  { %v2601_v42 = vpop.permute.xlu1 %2600 }
 0xa0c   :  { %v2605_v58 = vadd.f32 %v2601_v42, %v2585_v61 }
 0xa0f   :  { %v2621_v27 = vpop.permute.xlu1 %2620 }
 0xa10   :  { %v2625_v9 = vadd.f32 %v2621_v27, %v2605_v58 }
 0xa11   :  { %v3084_v4 = vpop.permute.xlu0 %3083 }
 0xa13   :  { %v2641_v50 = vpop.permute.xlu1 %2640 }
 0xa14   :  { %v2645_v7 = vadd.f32 %v2641_v50, %v2625_v9 }
 0xa15   :  { %v2817_v2 = vpop.permute.xlu0 %2816 }
 0xa16   :  { %v2657_v63 = vadd.f32 %v2655_v35, %v2645_v7 }
 0xa17   :  { %v3080_v28 = vpop.permute.xlu1 %3079 }
 0xa18   :  { %v2677_v23 = vadd.f32 %v2673_v34, %v2657_v63  ;;  %v3086_v25 = vmul.f32 %v3080_v28, %v4728_v10 }
 0xa19   :  { %v2837_v55 = vpop.permute.xlu0 %2836 }
 0xa1a   :  { %v2697_v17 = vadd.f32 %v2693_v40, %v2677_v23 }
 0xa1b   :  { %v2745_v29 = vpop.permute.xlu1 %2744 }
 0xa1c   :  { %v2717_v16 = vadd.f32 %v2713_v45, %v2697_v17 }
 0xa1d   :  { %v2857_v26 = vpop.permute.xlu0 %2856 }
 0xa1e   :  { %v2729_v39 = vadd.f32 %v2727_v6, %v2717_v16  ;;  %v3087_v6 = vmul.f32 %v3084_v4, %v4736_v38 }
 0xa1f   :  { %v2765_v5 = vpop.permute.xlu1 %2764 }
 0xa20   :  { %v2749_v46 = vadd.f32 %v2745_v29, %v2729_v39 }
 0xa21   :  { %v3051_v62 = vpop.permute.xlu0 %3050 }
 0xa22   :  { %v2769_v14 = vadd.f32 %v2765_v5, %v2749_v46 }
 0xa23   :  { %v2785_v47 = vpop.permute.xlu1 %2784 }
 0xa24   :  { %v2789_v32 = vadd.f32 %v2785_v47, %v2769_v14 }
 0xa25   :  { %v2961_v41 = vpop.permute.xlu0 %2960 }
 0xa26   :  { %v2801_v19 = vadd.f32 %v2799_v53, %v2789_v32 }
 0xa27   :  { %v3031_v49 = vpop.permute.xlu1 %3030 }
 0xa28   :  { %v2821_v30 = vadd.f32 %v2817_v2, %v2801_v19  ;;  %v3036_v58 = vadd.f32 %v3031_v49, %v3016_v51 }
 0xa29   :  { %v2981_v34 = vpop.permute.xlu0 %2980 }
 0xa2a   :  { %v2841_v33 = vadd.f32 %v2837_v55, %v2821_v30  ;;  %v3056_v7 = vadd.f32 %v3051_v62, %v3036_v58 }
 0xa2b   :  { %v2889_v56 = vpop.permute.xlu1 %2888 }
 0xa2c   :  { %v2861_v0 = vadd.f32 %v2857_v26, %v2841_v33 }
 0xa2d   :  { %v3001_v22 = vpop.permute.xlu0 %3000 }
 0xa2e   :  { %v2873_v8 = vadd.f32 %v2871_v52, %v2861_v0 }
 0xa2f   :  { %v2909_v57 = vpop.permute.xlu1 %2908 }
 0xa30   :  { %v2893_v40 = vadd.f32 %v2889_v56, %v2873_v8 }
 0xa31   :  { %v3071_v45 = vpop.permute.xlu0 %3070 }
 0xa32   :  { %v2913_v13 = vadd.f32 %v2909_v57, %v2893_v40  ;;  %v3076_v23 = vadd.f32 %v3071_v45, %v3056_v7 }
 0xa33   :  { %v2929_v48 = vpop.permute.xlu1 %2928 }
 0xa34   :  { %v2933_v12 = vadd.f32 %v2929_v48, %v2913_v13  ;;  %v3088_v51 = vadd.f32 %v3086_v25, %v3076_v23 }
 0xa35   :  { %v3103_v35 = vpop.permute.xlu0 %3102 }
 0xa36   :  { %v2945_v42 = vadd.f32 %v2943_v20, %v2933_v12  ;;  %v3108_v5 = vadd.f32 %v3103_v35, %v3088_v51  ;;  %v1684_v12 = vadd.f32 %v4854_v37, %v4854_v37 }
 0xa37   :  { %v3033_v61 = vpop.permute.xlu1 %3032 }
 0xa38   :  { %v2965_v27 = vadd.f32 %v2961_v41, %v2945_v42 }
 0xa39   :  { %v3123_v17 = vpop.permute.xlu0 %3122 }
 0xa3a   :  { %v2985_v9 = vadd.f32 %v2981_v34, %v2965_v27  ;;  %v3128_v46 = vadd.f32 %v3123_v17, %v3108_v5 }
 0xa3b   :  { %v3053_v50 = vpop.permute.xlu1 %3052 }
 0xa3c   :  { %v3005_v3 = vadd.f32 %v3001_v22, %v2985_v9 }
 0xa3d   :  { %v3143_v18 = vpop.permute.xlu0 %3142 }
 0xa3e   :  { %v3017_v2 = vadd.f32 %v3015_v59, %v3005_v3  ;;  %v3148_v47 = vadd.f32 %v3143_v18, %v3128_v46 }
 0xa3f   :  { %v3073_v63 = vpop.permute.xlu1 %3072 }
 0xa40   :  { %v3037_v55 = vadd.f32 %v3033_v61, %v3017_v2 }
 0xa42   :  { %v3057_v15 = vadd.f32 %v3053_v50, %v3037_v55 }
 0xa43   :  { %v3105_v29 = vpop.permute.xlu1 %3104 }
 0xa44   :  { %v3077_v16 = vadd.f32 %v3073_v63, %v3057_v15 }
 0xa46   :  { %v3089_v26 = vadd.f32 %v3087_v6, %v3077_v16 }
 0xa47   :  { %v3125_v39 = vpop.permute.xlu1 %3124 }
 0xa48   :  { %v3109_v1 = vadd.f32 %v3105_v29, %v3089_v26 }
 0xa4a   :  { %v3129_v62 = vadd.f32 %v3125_v39, %v3109_v1 }
 0xa4b   :  { %v3145_v14 = vpop.permute.xlu1 %3144 }
 0xa4c   :  { %v3149_v53 = vadd.f32 %v3145_v14, %v3129_v62 }
 0xa4e   :  { %v3150_v32 = vpack.c.bf16 %v3149_v53, %v3148_v47 }
 0xa50   :  { %3489 = vmatpush3.bf16.msra.mxu0 %v3150_v32 }
 0xa51   :  { %3502 = vmatprep.subr.bf16.mxu0 %v5320_v21 }
 0xa53   :  { %3491 = vmatmul.mubr.msk.bf16.vlgmr.msra.gmra.mrb[28].mxu0 %vm683_vm0, %v4560_v24 }
 0xa54   :  { %3503 = vmatpush3.bf16.msra.mxu0 %v4812_v60  ;;  %3506 = vmatprep.mubr.msk.bf16.mxu0 %vm3935_vm4, %v5320_v21 }
 0xa55   :  { %3504 = vmatprep.subr.bf16.mxu0 %v5320_v21 }
 0xa58   :  { %3505 = vmatpush3.bf16.msra.mxu0 %v4824_v11 }
 0xb26   :  { %v3185_v10 = vpop.f32.mrb[28].mxu0 }
 0xb27   :  { %v3191_v38 = vmul.f32 %v3185_v10, %v4834_v31  ;;  %v3492_v4 = vpop.f32.mrb[29].mxu0 }
 0xb28   :  { %v3188_v28 = vpop.f32.mrb[30].mxu0 }
 0xb29   :  { %v3192_v41 = vadd.f32 %v4839_v36, %v3191_v38  ;;  %v3493_v19 = vpop.f32.mrb[31].mxu0 }
 0xb2b   :  { %v3193_v49 = vmax.f32 %v3192_v41, 0.0 }
 0xb2d   :  { %v3194_v30 = vpack.c.bf16 %v3193_v49, %v3193_v49 }
 0xb2f   :  { %3507 = vmatmul.mubr.msk.bf16.vlgmr.msra.gmra.mrb[32].mxu0 %vm2392_vm7, %v3194_v30 }
 0xc02   :  { %v3274_v24 = vpop.f32.mrb[32].mxu0 }
 0xc03   :  { %v3275_v60 = vadd.f32 %v3274_v24, %v4884_v44  ;;  %v3508_v33 = vpop.f32.mrb[33].mxu0 }
 0xc04   :  { %v3277_v34 = vpop.f32.mrb[34].mxu0 }
 0xc05   :  { %v3280_v21 = vadd.f32 %v4849_v43, %v3275_v60  ;;  %v3509_v11 = vpop.f32.mrb[35].mxu0 }
 0xc07   :  { %3288 = vrot.lane.b32.xlu0 %v3280_v21, %s3925_s18  ;;  %v3425_v31 = vmul.f32 -1.442695, %v3280_v21  ;;  %s3320_s18 = sshll.u32 %s3970_s10, 4  ;;  %s3321_s18 = int_to_ptr.vmem [resolvable:$true] %s3320_s18 }
 0xc08   :  { %p3895_p7 = scmp.lt.s32.totalorder %s3321_s18, %s3321_s18 }
 0xc09   :  { %3751 = vpow2.f32 %v3425_v31 }
 0xc13   :  { %v3752_v56 = vpop.eup %3751 }
 0xc14   :  { %v3284_v52 = vadd.f32 1.0, %v3752_v56 }
 0xc16   :  { %3753 = vrcp.f32 %v3284_v52 }
 0xc20   :  { %v3754_v36 = vpop.eup %3753 }
 0xc21   :  { %v3298_v40 = vsub.f32 1.0, %v3754_v36  ;;  %v3304_v13 = vmul.f32 %v3754_v36, %v4859_v54 }
 0xc79   :  { %v3289_v0 = vpop.permute.xlu0 %3288 }
 0xc7a   :  { %v3291_v8 = vmul.f32 %v3754_v36, %v3289_v0 }
 0xc7c   :  { %3293 = vrot.lane.b32.xlu1 %v3291_v8, %s3928_s0  ;;  %s3890_s0 = scalar_lea.vmem %s3321_s18, 128 }
 0xc7d   :  { %p3891_p6 = scmp.ne.s32.totalorder %s3321_s18, %s3890_s0  ;;  %p3896_p8 = scmp.lt.s32.totalorder %s3890_s0, %s3890_s0 }
 0xc7f   :  { %p3897_p9 = por %p3896_p8, %p3895_p7 }
 0xc80   :  { %2521 = vrot.lane.b32.xlu1 %v4859_v54, %s3969_s1 }
 0xc81   :  { %p3898_p10 = pnand %p3897_p9, %p3891_p6 }
 0xcee   :  { %v3294_v44 = vpop.permute.xlu1 %3293 }
 0xcef   :  { %v3296_v57 = vadd.f32 %v3294_v44, %v3280_v21 }
 0xcf1   :  { %3755 = vtanh.f32 %v3296_v57 }
 0xcf2   :  { %v2522_v42 = vpop.permute.xlu1 %2521 }
 0xcf3   :  { %v2524_v45 = vadd.f32 %v2522_v42, %v1684_v12 }
 0xcf5   :  { %v2525_v61 = vadd.f32 %v4854_v37, %v2524_v45 }
 0xcfb   :  { %v3756_v43 = vpop.eup %3755 }
 0xcfc   :  { %3300 = vrot.lane.b32.xlu0 %v3756_v43, %s3969_s1 }
 0xd6e   :  { %v3301_v22 = vpop.permute.xlu0 %3300 }
 0xd6f   :  { %v3303_v48 = vmul.f32 %v3301_v22, %v3298_v40 }
 0xd71   :  { %v3305_v20 = vadd.f32 %v3304_v13, %v3303_v48 }
 0xd73   :  { %3307 = vrot.lane.b32.xlu0 %v3305_v20, %s3969_s1 }
 0xde5   :  { %v3308_v27 = vpop.permute.xlu0 %3307 }
 0xde6   :  { %v3310_v58 = vadd.f32 %v3308_v27, %v2525_v61 }
 0xde8   :  { %v3311_v9 = vadd.f32 %v4854_v37, %v3310_v58 }
 0xdea   :  { %v3312_v50 = vmul.f32 0.33333334, %v3311_v9 }
 0xdec   :  { %3313 = vst.msk [vmem:[#allocation14] sm:$0xff] %vm2392_vm7, %v3312_v50 }
 0xded   :  { %3901 = shalt.err (!%p3898_p10)
}
 0xdee   :  { %s3902_s25 = scalar_lea.hbm %s5236_s11, 128 }
 0xdef   :  { %p3903_p11 = scmp.ne.s32.totalorder %s5236_s11, %s3902_s25  ;;  %p3906_p12 = scmp.lt.u32.totalorder %s3902_s25, %s5236_s11 }
 0xdf1   :  { %p3908_p13 = pnand %p3906_p12, %p3903_p11 }
 0xdf3   :  { %3911 = shalt.err (!%p3908_p13)
}
 0xdf4   :  { %3323 = dma.vmem_to_hbm [thread:$0]  %s3321_s18, 128, %s5236_s11, [#allocation5]  }
 0xdf5   :  { %3920 = dma.done.wait [#allocation5], 128  }
 0xdf6   :  { %3921 = vsyncadd [#allocation5], 4294967168 }
 0xdf7   :  { %3327 = vsyncpa [#allocation4], 1 }
 0xdf8   :  { %3328 = vsyncpa [#allocation7], 1 }
 0xdf9   :  { %3329 = vsyncpa [#allocation10], 1 }
 0xdfa   :  { %3330 = vsyncpa [#allocation13], 1 }
 0xdfb   :  { %3331 = vsyncpa [#allocation5], 1 }

</bundles_post_ra>
